<compile_context>
chip_gen: v6e
topology: v6e:2x2x1
jax: 0.10.0
libtpu: 0.0.40
codegen_flags: <defaults>
</compile_context>

<pallas_src>
import numpy as np

import jax
import jax.numpy as jnp
from jax.experimental import pallas as pl
from jax.experimental.pallas import tpu as pltpu

IN_DIM = 256
MID_DIM = 128
OUT_HW = 16                        # 8x8 feature map after 2x nearest upsample
PIX = OUT_HW * OUT_HW              # 256 pixels per image (lane-dense)
DIFFUSION_STEPS = 5
TAPS = tuple((dy, dx) for dy in range(3) for dx in range(3))
TAP_PAD = 16                       # tap axis padded 9 -> 16 for clean tiling


# ---------------------------------------------------------------------------
# Host-side constants (precomputed once; passed to the kernel as operands).
# ---------------------------------------------------------------------------
def _build_tap_mask():
    """mk[p, t] = 1 iff the 3x3 tap t reads an in-bounds pixel at output p."""
    mk = np.zeros((PIX, TAP_PAD), np.float32)
    for t, (dy, dx) in enumerate(TAPS):
        for p in range(PIX):
            i, j = divmod(p, OUT_HW)
            si, sj = i + dy - 1, j + dx - 1
            if 0 <= si < OUT_HW and 0 <= sj < OUT_HW:
                mk[p, t] = 1.0
    return mk


def _build_diffusion_operator(steps=DIFFUSION_STEPS):
    """Transpose of the composite `steps`-fold zero-padded 3x3 mean-blur operator."""
    a = np.zeros((PIX, PIX), np.float64)
    for q in range(PIX):
        qi, qj = divmod(q, OUT_HW)
        for dy, dx in TAPS:
            si, sj = qi + dy - 1, qj + dx - 1
            if 0 <= si < OUT_HW and 0 <= sj < OUT_HW:
                a[q, si * OUT_HW + sj] = 1.0 / 9.0
    a5 = np.linalg.matrix_power(a, steps)
    return np.ascontiguousarray(a5.T.astype(np.float32))


_MASK_NP = _build_tap_mask()            # (PIX, 16) 0/1 tap-validity mask
_DIFF_NP = _build_diffusion_operator()  # (PIX, PIX) 5-step blur operator^T


# ---------------------------------------------------------------------------
# Kernel
# ---------------------------------------------------------------------------
def _calligraphy_kernel(v_ref, mk_ref, b1_ref, w2_ref, b2_ref, w3_ref, b3_ref,
                        d_ref, out_ref, h2_ref):
    bt = v_ref.shape[1]
    mk = mk_ref[...]                          # (PIX, 16) f32, 0/1 tap masks
    mk_bf = mk.astype(jnp.bfloat16)
    b1 = b1_ref[...]                          # (1, C)
    b2 = b2_ref[...]                          # (1, C)
    w2s = w2_ref[...]                         # (9*C, C) bf16, taps stacked on K

    # Per-image chunks: accumulators stay small and h2 is written to the
    # scratch exactly once per image (no multi-pass read-modify-write).
    for b in range(bt):
        # ---- UpBlock: 2x upsample of a spatially constant map + 3x3 conv + ReLU.
        # The conv collapses to a masked sum of the 9 tap products v_t, done as
        # one tiny MXU dot against the precomputed 0/1 mask matrix.
        vb = v_ref[0, b].astype(jnp.bfloat16)                       # (16, C)
        h1 = jnp.dot(mk_bf, vb, preferred_element_type=jnp.float32)  # (PIX, C)
        h1 = jnp.maximum(h1 + b1, 0.0)

        # ---- ACmix: 3x3 conv + residual + ReLU.
        # Build the 9 shifted+masked copies of h1 (rolls on the flat per-image
        # pixel axis; wrapped rows are always masked) and contract them with
        # the stacked weights in ONE K = 9*C = 1152 matmul, so the tap
        # accumulation runs on the MXU at full contraction depth.
        pieces = []
        for t, (dy, dx) in enumerate(TAPS):
            off = (dy - 1) * OUT_HW + (dx - 1)
            sh = h1 if off == 0 else pltpu.roll(h1, (-off) % PIX, 0)
            pieces.append((mk[:, t:t + 1] * sh).astype(jnp.bfloat16))
        hcat = jnp.concatenate(pieces, axis=1)                       # (PIX, 9*C)
        h2 = jnp.dot(hcat, w2s, preferred_element_type=jnp.float32)  # (PIX, C)
        h2_ref[b] = jnp.maximum(h2 + b2 + h1, 0.0)

    # ---- VectorRenderer: 1x1 conv (C -> 1) + sigmoid; lane-dense (bt, PIX).
    h2_all = h2_ref[...]                                             # (bt, PIX, C)
    logits = jnp.sum(h2_all * w3_ref[...].reshape(1, 1, MID_DIM), axis=-1)
    img = jax.nn.sigmoid(logits + b3_ref[...])                       # (bt, PIX)

    # ---- Ink diffusion: 5 zero-padded 3x3 mean-blur steps folded into one
    # precomputed (PIX, PIX) operator -> a single small f32 matmul instead of
    # a 45-op serial roll/FMA tail.
    out_ref[0] = jnp.dot(img, d_ref[...], preferred_element_type=jnp.float32)


# ---------------------------------------------------------------------------
# Wrapper
# ---------------------------------------------------------------------------
def _choose_tiling(batch):
    """Images per grid step (bt) and number of grid steps."""
    if batch <= 1:
        return 1, 1
    n_steps = max(2, -(-batch // 8))      # <= 8 images/step (VMEM-safe on v7x)
    if n_steps % 2:
        n_steps += 1                      # even step count: balances the 2 TCs
    bt = -(-batch // n_steps)
    return bt, n_steps


@jax.jit
def calligraphy_generator(fused_feat, w1, b1, w2, b2, w3, b3):
    B, in_dim = fused_feat.shape
    assert in_dim == IN_DIM
    bt, n_steps = _choose_tiling(B)
    b_pad = bt * n_steps

    # conv1 channel contraction hoisted to one whole-batch XLA matmul (the
    # in-kernel (bt,256)@(256,1152) shape is a poor MXU shape and would keep
    # ~1.1 MB of double-buffered w1 resident in VMEM).
    w1_wide = jnp.transpose(w1, (1, 0, 2)).reshape(IN_DIM, 9 * MID_DIM)
    v = jnp.dot(fused_feat.astype(jnp.float32), w1_wide.astype(jnp.float32))
    v = v.reshape(B, 9, MID_DIM)
    v = jnp.pad(v, ((0, b_pad - B), (0, TAP_PAD - 9), (0, 0)))
    v = v.reshape(n_steps, bt, TAP_PAD, MID_DIM)

    w2s = w2.reshape(9 * MID_DIM, MID_DIM).astype(jnp.bfloat16)  # stacked taps
    mk = jnp.asarray(_MASK_NP)
    dmat = jnp.asarray(_DIFF_NP)
    b1f, b2f = b1.astype(jnp.float32), b2.astype(jnp.float32)
    w3f, b3f = w3.astype(jnp.float32), b3.astype(jnp.float32)

    out = pl.pallas_call(
        _calligraphy_kernel,
        out_shape=jax.ShapeDtypeStruct((n_steps, bt, PIX), jnp.float32),
        grid_spec=pltpu.PrefetchScalarGridSpec(
            num_scalar_prefetch=0,
            grid=(n_steps,),
            in_specs=[
                pl.BlockSpec((1, bt, TAP_PAD, MID_DIM), lambda g: (g, 0, 0, 0)),  # v
                pl.BlockSpec((PIX, TAP_PAD), lambda g: (0, 0)),                   # mask
                pl.BlockSpec((1, MID_DIM), lambda g: (0, 0)),                     # b1
                pl.BlockSpec((9 * MID_DIM, MID_DIM), lambda g: (0, 0)),           # w2 stacked
                pl.BlockSpec((1, MID_DIM), lambda g: (0, 0)),                     # b2
                pl.BlockSpec((1, MID_DIM), lambda g: (0, 0)),                     # w3
                pl.BlockSpec((1, 1), lambda g: (0, 0)),                           # b3
                pl.BlockSpec((PIX, PIX), lambda g: (0, 0)),                       # blur op
            ],
            out_specs=pl.BlockSpec((1, bt, PIX), lambda g: (g, 0, 0)),
            scratch_shapes=[pltpu.VMEM((bt, PIX, MID_DIM), jnp.float32)],
        ),
        compiler_params=pltpu.CompilerParams(
            dimension_semantics=("parallel",),
            vmem_limit_bytes=32 * 1024 * 1024,
        ),
    )(v, mk, b1f, w2s, b2f, w3f, b3f, dmat)

    out = out.reshape(b_pad, PIX)[:B]
    return out.reshape(B, 1, OUT_HW, OUT_HW)


# ---------------------------------------------------------------------------
# Pure-JAX reference (same stand-in ops, f32 highest precision) and params
# ---------------------------------------------------------------------------
@jax.jit
def reference_forward(fused_feat, w1, b1, w2, b2, w3, b3):
    hp = jax.lax.Precision.HIGHEST
    B = fused_feat.shape[0]
    C = MID_DIM
    mk = jnp.asarray(_MASK_NP[:, :9])
    # UpBlock on a spatially-constant (upsampled) 16x16 map.
    v = jnp.einsum('bk,tkc->btc', fused_feat, w1, precision=hp)
    h1 = jax.nn.relu(jnp.einsum('pt,btc->bpc', mk, v, precision=hp)
                     + b1.reshape(1, 1, C))
    h1 = h1.reshape(B, OUT_HW, OUT_HW, C)
    # ACmix: 3x3 conv + residual + ReLU.
    h1p = jnp.pad(h1, ((0, 0), (1, 1), (1, 1), (0, 0)))
    pre = jnp.zeros_like(h1)
    for t, (dy, dx) in enumerate(TAPS):
        patch = h1p[:, dy:dy + OUT_HW, dx:dx + OUT_HW, :]
        pre = pre + jnp.einsum('bijk,kc->bijc', patch, w2[t], precision=hp)
    h2 = jax.nn.relu(pre + b2.reshape(1, 1, 1, C) + h1)
    # VectorRenderer: 1x1 conv + sigmoid.
    img = jax.nn.sigmoid(jnp.einsum('bijc,c->bij', h2, w3[0], precision=hp)
                         + b3[0, 0])
    # apply_diffusion: 5 zero-padded 3x3 mean blurs.
    for _ in range(DIFFUSION_STEPS):
        p = jnp.pad(img, ((0, 0), (1, 1), (1, 1)))
        acc = jnp.zeros_like(img)
        for dy, dx in TAPS:
            acc = acc + p[:, dy:dy + OUT_HW, dx:dx + OUT_HW]
        img = acc / 9.0
    return img.reshape(B, 1, OUT_HW, OUT_HW)


def init_params(key):
    """Deterministic synthetic parameters (He-style scaling)."""
    k1, k2, k3 = jax.random.split(key, 3)
    s1 = (2.0 / (9 * IN_DIM)) ** 0.5
    s2 = (2.0 / (9 * MID_DIM)) ** 0.5
    s3 = (2.0 / MID_DIM) ** 0.5
    w1 = s1 * jax.random.normal(k1, (9, IN_DIM, MID_DIM), jnp.float32)
    b1 = jnp.zeros((1, MID_DIM), jnp.float32)
    w2 = s2 * jax.random.normal(k2, (9, MID_DIM, MID_DIM), jnp.float32)
    b2 = jnp.zeros((1, MID_DIM), jnp.float32)
    w3 = s3 * jax.random.normal(k3, (1, MID_DIM), jnp.float32)
    b3 = jnp.zeros((1, 1), jnp.float32)
    return w1, b1, w2, b2, w3, b3


if __name__ == "__main__":
    key = jax.random.PRNGKey(0)
    k_feat, k_params = jax.random.split(key)

    B = 2
    fused_feat = jax.random.normal(k_feat, (B, IN_DIM), jnp.float32)
    params = init_params(k_params)

    out = calligraphy_generator(fused_feat, *params)
    out = jax.block_until_ready(out)

    assert out.shape == (B, 1, OUT_HW, OUT_HW), out.shape
    assert bool(jnp.all(jnp.isfinite(out)))
    assert bool(jnp.all((out >= -1e-5) & (out <= 1.0 + 1e-5)))

    ref = reference_forward(fused_feat, *params)
    err = float(jnp.max(jnp.abs(out - ref)))
    assert err < 3e-2, f"max abs error vs reference: {err}"

    print("KERNEL_OK")
</pallas_src>

<mosaic_0001>
module attributes {stable_mosaic.version = 11 : i64} {
  func.func @_calligraphy_kernel(%arg0: i32, %arg1: memref<1x1x16x128xf32, #tpu.memory_space<vmem>>, %arg2: memref<256x16xf32, #tpu.memory_space<vmem>>, %arg3: memref<1x128xf32, #tpu.memory_space<vmem>>, %arg4: memref<1152x128xbf16, #tpu.memory_space<vmem>>, %arg5: memref<1x128xf32, #tpu.memory_space<vmem>>, %arg6: memref<1x128xf32, #tpu.memory_space<vmem>>, %arg7: memref<1x1xf32, #tpu.memory_space<vmem>>, %arg8: memref<256x256xf32, #tpu.memory_space<vmem>>, %arg9: memref<1x1x256xf32, #tpu.memory_space<vmem>>, %arg10: memref<1x256x128xf32, #tpu.memory_space<vmem>>) attributes {dimension_semantics = [#tpu.dimension_semantics<parallel>], iteration_bounds = array<i64: 2>, scalar_prefetch = 0 : i64, scratch_operands = 1 : i64, tpu.core_type = #tpu.core_type<tc>, window_params = [{transform_indices = @transform_0, window_bounds = array<i64: 1, 1, 16, 128>}, {pipeline_mode = #tpu.pipeline_mode<synchronous>, transform_indices = @transform_1, window_bounds = array<i64: 256, 16>}, {pipeline_mode = #tpu.pipeline_mode<synchronous>, transform_indices = @transform_2, window_bounds = array<i64: 1, 128>}, {pipeline_mode = #tpu.pipeline_mode<synchronous>, transform_indices = @transform_3, window_bounds = array<i64: 1152, 128>}, {pipeline_mode = #tpu.pipeline_mode<synchronous>, transform_indices = @transform_4, window_bounds = array<i64: 1, 128>}, {pipeline_mode = #tpu.pipeline_mode<synchronous>, transform_indices = @transform_5, window_bounds = array<i64: 1, 128>}, {pipeline_mode = #tpu.pipeline_mode<synchronous>, transform_indices = @transform_6, window_bounds = array<i64: 1, 1>}, {pipeline_mode = #tpu.pipeline_mode<synchronous>, transform_indices = @transform_7, window_bounds = array<i64: 256, 256>}, {transform_indices = @transform_8, window_bounds = array<i64: 1, 1, 256>}]} {
    %c0 = arith.constant 0 : index
    %c0_0 = arith.constant 0 : index
    %0 = vector.load %arg2[%c0, %c0_0] : memref<256x16xf32, #tpu.memory_space<vmem>>, vector<256x16xf32>
    %1 = arith.truncf %0 : vector<256x16xf32> to vector<256x16xbf16>
    %c0_1 = arith.constant 0 : index
    %c0_2 = arith.constant 0 : index
    %2 = vector.load %arg3[%c0_1, %c0_2] : memref<1x128xf32, #tpu.memory_space<vmem>>, vector<1x128xf32>
    %c0_3 = arith.constant 0 : index
    %c0_4 = arith.constant 0 : index
    %3 = vector.load %arg5[%c0_3, %c0_4] : memref<1x128xf32, #tpu.memory_space<vmem>>, vector<1x128xf32>
    %c0_5 = arith.constant 0 : index
    %c0_6 = arith.constant 0 : index
    %4 = vector.load %arg4[%c0_5, %c0_6] : memref<1152x128xbf16, #tpu.memory_space<vmem>>, vector<1152x128xbf16>
    %c0_7 = arith.constant 0 : index
    %c0_8 = arith.constant 0 : index
    %c0_9 = arith.constant 0 : index
    %c0_10 = arith.constant 0 : index
    %5 = vector.load %arg1[%c0_7, %c0_8, %c0_9, %c0_10] : memref<1x1x16x128xf32, #tpu.memory_space<vmem>>, vector<1x1x16x128xf32>
    %6 = vector.shape_cast %5 : vector<1x1x16x128xf32> to vector<16x128xf32>
    %7 = arith.truncf %6 : vector<16x128xf32> to vector<16x128xbf16>
    %cst = arith.constant dense<0.000000e+00> : vector<256x128xf32>
    %8 = tpu.matmul %1, %7, %cst {dimension_numbers = #tpu.dot_dimension_numbers<[1], [0], [0], [1], [0, 0, 1, 1], [], []>} : vector<256x16xbf16>, vector<16x128xbf16>, vector<256x128xf32> -> vector<256x128xf32>
    %9 = vector.broadcast %2 : vector<1x128xf32> to vector<256x128xf32>
    %10 = arith.addf %8, %9 : vector<256x128xf32>
    %cst_11 = arith.constant 0.000000e+00 : f32
    %11 = vector.broadcast %cst_11 : f32 to vector<256x128xf32>
    %12 = arith.maximumf %10, %11 : vector<256x128xf32>
    %c17_i32 = arith.constant 17 : i32
    %13 = tpu.dynamic_rotate %12 by %c17_i32 dim 0 : vector<256x128xf32>, i32 -> vector<256x128xf32>
    %14 = vector.extract_strided_slice %0 {offsets = [0, 0], sizes = [256, 1], strides = [1, 1]} : vector<256x16xf32> to vector<256x1xf32>
    %15 = vector.broadcast %14 : vector<256x1xf32> to vector<256x128xf32>
    %16 = arith.mulf %15, %13 : vector<256x128xf32>
    %17 = arith.truncf %16 : vector<256x128xf32> to vector<256x128xbf16>
    %c16_i32 = arith.constant 16 : i32
    %18 = tpu.dynamic_rotate %12 by %c16_i32 dim 0 : vector<256x128xf32>, i32 -> vector<256x128xf32>
    %19 = vector.extract_strided_slice %0 {offsets = [0, 1], sizes = [256, 1], strides = [1, 1]} : vector<256x16xf32> to vector<256x1xf32>
    %20 = vector.broadcast %19 : vector<256x1xf32> to vector<256x128xf32>
    %21 = arith.mulf %20, %18 : vector<256x128xf32>
    %22 = arith.truncf %21 : vector<256x128xf32> to vector<256x128xbf16>
    %c15_i32 = arith.constant 15 : i32
    %23 = tpu.dynamic_rotate %12 by %c15_i32 dim 0 : vector<256x128xf32>, i32 -> vector<256x128xf32>
    %24 = vector.extract_strided_slice %0 {offsets = [0, 2], sizes = [256, 1], strides = [1, 1]} : vector<256x16xf32> to vector<256x1xf32>
    %25 = vector.broadcast %24 : vector<256x1xf32> to vector<256x128xf32>
    %26 = arith.mulf %25, %23 : vector<256x128xf32>
    %27 = arith.truncf %26 : vector<256x128xf32> to vector<256x128xbf16>
    %c1_i32 = arith.constant 1 : i32
    %28 = tpu.dynamic_rotate %12 by %c1_i32 dim 0 : vector<256x128xf32>, i32 -> vector<256x128xf32>
    %29 = vector.extract_strided_slice %0 {offsets = [0, 3], sizes = [256, 1], strides = [1, 1]} : vector<256x16xf32> to vector<256x1xf32>
    %30 = vector.broadcast %29 : vector<256x1xf32> to vector<256x128xf32>
    %31 = arith.mulf %30, %28 : vector<256x128xf32>
    %32 = arith.truncf %31 : vector<256x128xf32> to vector<256x128xbf16>
    %33 = vector.extract_strided_slice %0 {offsets = [0, 4], sizes = [256, 1], strides = [1, 1]} : vector<256x16xf32> to vector<256x1xf32>
    %34 = vector.broadcast %33 : vector<256x1xf32> to vector<256x128xf32>
    %35 = arith.mulf %34, %12 : vector<256x128xf32>
    %36 = arith.truncf %35 : vector<256x128xf32> to vector<256x128xbf16>
    %c255_i32 = arith.constant 255 : i32
    %37 = tpu.dynamic_rotate %12 by %c255_i32 dim 0 : vector<256x128xf32>, i32 -> vector<256x128xf32>
    %38 = vector.extract_strided_slice %0 {offsets = [0, 5], sizes = [256, 1], strides = [1, 1]} : vector<256x16xf32> to vector<256x1xf32>
    %39 = vector.broadcast %38 : vector<256x1xf32> to vector<256x128xf32>
    %40 = arith.mulf %39, %37 : vector<256x128xf32>
    %41 = arith.truncf %40 : vector<256x128xf32> to vector<256x128xbf16>
    %c241_i32 = arith.constant 241 : i32
    %42 = tpu.dynamic_rotate %12 by %c241_i32 dim 0 : vector<256x128xf32>, i32 -> vector<256x128xf32>
    %43 = vector.extract_strided_slice %0 {offsets = [0, 6], sizes = [256, 1], strides = [1, 1]} : vector<256x16xf32> to vector<256x1xf32>
    %44 = vector.broadcast %43 : vector<256x1xf32> to vector<256x128xf32>
    %45 = arith.mulf %44, %42 : vector<256x128xf32>
    %46 = arith.truncf %45 : vector<256x128xf32> to vector<256x128xbf16>
    %c240_i32 = arith.constant 240 : i32
    %47 = tpu.dynamic_rotate %12 by %c240_i32 dim 0 : vector<256x128xf32>, i32 -> vector<256x128xf32>
    %48 = vector.extract_strided_slice %0 {offsets = [0, 7], sizes = [256, 1], strides = [1, 1]} : vector<256x16xf32> to vector<256x1xf32>
    %49 = vector.broadcast %48 : vector<256x1xf32> to vector<256x128xf32>
    %50 = arith.mulf %49, %47 : vector<256x128xf32>
    %51 = arith.truncf %50 : vector<256x128xf32> to vector<256x128xbf16>
    %c239_i32 = arith.constant 239 : i32
    %52 = tpu.dynamic_rotate %12 by %c239_i32 dim 0 : vector<256x128xf32>, i32 -> vector<256x128xf32>
    %53 = vector.extract_strided_slice %0 {offsets = [0, 8], sizes = [256, 1], strides = [1, 1]} : vector<256x16xf32> to vector<256x1xf32>
    %54 = vector.broadcast %53 : vector<256x1xf32> to vector<256x128xf32>
    %55 = arith.mulf %54, %52 : vector<256x128xf32>
    %56 = arith.truncf %55 : vector<256x128xf32> to vector<256x128xbf16>
    %57 = tpu.concatenate %17, %22, %27, %32, %36, %41, %46, %51, %56 in 1 : vector<256x128xbf16>, vector<256x128xbf16>, vector<256x128xbf16>, vector<256x128xbf16>, vector<256x128xbf16>, vector<256x128xbf16>, vector<256x128xbf16>, vector<256x128xbf16>, vector<256x128xbf16> -> vector<256x1152xbf16>
    %cst_12 = arith.constant dense<0.000000e+00> : vector<256x128xf32>
    %58 = tpu.matmul %57, %4, %cst_12 {dimension_numbers = #tpu.dot_dimension_numbers<[1], [0], [0], [1], [0, 0, 1, 1], [], []>} : vector<256x1152xbf16>, vector<1152x128xbf16>, vector<256x128xf32> -> vector<256x128xf32>
    %59 = vector.broadcast %3 : vector<1x128xf32> to vector<256x128xf32>
    %60 = arith.addf %58, %59 : vector<256x128xf32>
    %61 = arith.addf %60, %12 : vector<256x128xf32>
    %cst_13 = arith.constant 0.000000e+00 : f32
    %62 = vector.broadcast %cst_13 : f32 to vector<256x128xf32>
    %63 = arith.maximumf %61, %62 : vector<256x128xf32>
    %c0_14 = arith.constant 0 : index
    %c0_15 = arith.constant 0 : index
    %c0_16 = arith.constant 0 : index
    %64 = vector.load %arg10[%c0_14, %c0_15, %c0_16] : memref<1x256x128xf32, #tpu.memory_space<vmem>>, vector<1x256x128xf32>
    %65 = vector.shape_cast %64 : vector<1x256x128xf32> to vector<256x128xf32>
    %66 = vector.shape_cast %63 : vector<256x128xf32> to vector<1x256x128xf32>
    tpu.vector_store %arg10[%c0_14, %c0_15, %c0_16], %66 {strides = array<i32>} : memref<1x256x128xf32, #tpu.memory_space<vmem>>, vector<1x256x128xf32>,
    %c0_17 = arith.constant 0 : index
    %c0_18 = arith.constant 0 : index
    %c0_19 = arith.constant 0 : index
    %67 = vector.load %arg10[%c0_17, %c0_18, %c0_19] : memref<1x256x128xf32, #tpu.memory_space<vmem>>, vector<1x256x128xf32>
    %c0_20 = arith.constant 0 : index
    %c0_21 = arith.constant 0 : index
    %68 = vector.load %arg6[%c0_20, %c0_21] : memref<1x128xf32, #tpu.memory_space<vmem>>, vector<1x128xf32>
    %69 = vector.shape_cast %68 : vector<1x128xf32> to vector<1x1x128xf32>
    %70 = vector.broadcast %69 : vector<1x1x128xf32> to vector<1x256x128xf32>
    %71 = arith.mulf %67, %70 : vector<1x256x128xf32>
    %cst_22 = arith.constant dense<0.000000e+00> : vector<1x256xf32>
    %72 = vector.multi_reduction <add>, %71, %cst_22 [2] : vector<1x256x128xf32> to vector<1x256xf32>
    %c0_23 = arith.constant 0 : index
    %c0_24 = arith.constant 0 : index
    %73 = vector.load %arg7[%c0_23, %c0_24] : memref<1x1xf32, #tpu.memory_space<vmem>>, vector<1x1xf32>
    %74 = vector.broadcast %73 : vector<1x1xf32> to vector<1x256xf32>
    %75 = arith.addf %72, %74 : vector<1x256xf32>
    %76 = arith.negf %75 : vector<1x256xf32>
    %77 = math.exp %76 : vector<1x256xf32>
    %cst_25 = arith.constant 1.000000e+00 : f32
    %78 = vector.broadcast %cst_25 : f32 to vector<1x256xf32>
    %79 = arith.addf %78, %77 : vector<1x256xf32>
    %80 = arith.divf %78, %79 : vector<1x256xf32>
    %c0_26 = arith.constant 0 : index
    %c0_27 = arith.constant 0 : index
    %81 = vector.load %arg8[%c0_26, %c0_27] : memref<256x256xf32, #tpu.memory_space<vmem>>, vector<256x256xf32>
    %cst_28 = arith.constant dense<0.000000e+00> : vector<1x256xf32>
    %82 = tpu.matmul %80, %81, %cst_28 {dimension_numbers = #tpu.dot_dimension_numbers<[1], [0], [0], [1], [0, 0, 1, 1], [], []>} : vector<1x256xf32>, vector<256x256xf32>, vector<1x256xf32> -> vector<1x256xf32>
    %c0_29 = arith.constant 0 : index
    %c0_30 = arith.constant 0 : index
    %c0_31 = arith.constant 0 : index
    %83 = vector.load %arg9[%c0_29, %c0_30, %c0_31] : memref<1x1x256xf32, #tpu.memory_space<vmem>>, vector<1x1x256xf32>
    %84 = vector.shape_cast %83 : vector<1x1x256xf32> to vector<1x256xf32>
    %85 = vector.shape_cast %82 : vector<1x256xf32> to vector<1x1x256xf32>
    tpu.vector_store %arg9[%c0_29, %c0_30, %c0_31], %85 {strides = array<i32>} : memref<1x1x256xf32, #tpu.memory_space<vmem>>, vector<1x1x256xf32>,
    return
  }
  func.func @transform_0(%arg0: i32) -> (i32, i32, i32, i32) {
    %c0_i32 = arith.constant 0 : i32
    %c0_i32_0 = arith.constant 0 : i32
    %c0_i32_1 = arith.constant 0 : i32
    %c0_i32_2 = arith.constant 0 : i32
    return %arg0, %c0_i32, %c0_i32_0, %c0_i32_1 : i32, i32, i32, i32
  }
  func.func @transform_1(%arg0: i32) -> (i32, i32) {
    %c0_i32 = arith.constant 0 : i32
    %c0_i32_0 = arith.constant 0 : i32
    %c0_i32_1 = arith.constant 0 : i32
    return %c0_i32, %c0_i32_0 : i32, i32
  }
  func.func @transform_2(%arg0: i32) -> (i32, i32) {
    %c0_i32 = arith.constant 0 : i32
    %c0_i32_0 = arith.constant 0 : i32
    %c0_i32_1 = arith.constant 0 : i32
    return %c0_i32, %c0_i32_0 : i32, i32
  }
  func.func @transform_3(%arg0: i32) -> (i32, i32) {
    %c0_i32 = arith.constant 0 : i32
    %c0_i32_0 = arith.constant 0 : i32
    %c0_i32_1 = arith.constant 0 : i32
    return %c0_i32, %c0_i32_0 : i32, i32
  }
  func.func @transform_4(%arg0: i32) -> (i32, i32) {
    %c0_i32 = arith.constant 0 : i32
    %c0_i32_0 = arith.constant 0 : i32
    %c0_i32_1 = arith.constant 0 : i32
    return %c0_i32, %c0_i32_0 : i32, i32
  }
  func.func @transform_5(%arg0: i32) -> (i32, i32) {
    %c0_i32 = arith.constant 0 : i32
    %c0_i32_0 = arith.constant 0 : i32
    %c0_i32_1 = arith.constant 0 : i32
    return %c0_i32, %c0_i32_0 : i32, i32
  }
  func.func @transform_6(%arg0: i32) -> (i32, i32) {
    %c0_i32 = arith.constant 0 : i32
    %c0_i32_0 = arith.constant 0 : i32
    %c0_i32_1 = arith.constant 0 : i32
    return %c0_i32, %c0_i32_0 : i32, i32
  }
  func.func @transform_7(%arg0: i32) -> (i32, i32) {
    %c0_i32 = arith.constant 0 : i32
    %c0_i32_0 = arith.constant 0 : i32
    %c0_i32_1 = arith.constant 0 : i32
    return %c0_i32, %c0_i32_0 : i32, i32
  }
  func.func @transform_8(%arg0: i32) -> (i32, i32, i32) {
    %c0_i32 = arith.constant 0 : i32
    %c0_i32_0 = arith.constant 0 : i32
    %c0_i32_1 = arith.constant 0 : i32
    return %arg0, %c0_i32, %c0_i32_0 : i32, i32, i32
  }
}

</mosaic_0001>

<bundles_post_ra>
// kernel: calligraphy_generator.1
= control target key start
LH: loop header
LB: loop body
LE: loop exit
PB: predicated region body
PF: predicated region fallthrough
CT: control target
= control target key end

     0   :  { %s5797_s29 = smov 0   ;;  %s8970_s0 = inlined_call_operand.vmem [shape: f32[2,1,16,128], index: 0, kind: input, shape index: {}]   ;;  %s8971_s1 = inlined_call_operand.vmem [shape: f32[256,16], index: 1, kind: input, shape index: {}]   ;;  %s8972_s2 = inlined_call_operand.vmem [shape: f32[1,128], index: 2, kind: input, shape index: {}]   ;;  %s8973_s3 = inlined_call_operand.vmem [shape: bf16[1152,128], index: 3, kind: input, shape index: {}]   ;;  %s8974_s4 = inlined_call_operand.vmem [shape: f32[1,128], index: 4, kind: input, shape index: {}]   ;;  %s8975_s5 = inlined_call_operand.vmem [shape: f32[1,128], index: 5, kind: input, shape index: {}]   ;;  %s8976_s6 = inlined_call_operand.<no memory space> [shape: f32[1,1], index: 6, kind: input, shape index: {}]   ;;  %s8977_s7 = inlined_call_operand.vmem [shape: f32[256,256], index: 7, kind: input, shape index: {}]   ;;  %s8978_s8 = inlined_call_operand.vmem [shape: f32[2,1,256], index: 8, kind: output, shape index: {}]  }
   0x1   :  { %v13_v0 = vstv %s8976_s6 }
   0x2   :  { %14 = vst [vmem:[#allocation3] sm:$0x1] %v13_v0 }
   0x3 LB: > { %s4643_s30 = sadd.s32 4294967295, %s5737_s29   ;;  %p4647_p0 = scmp.ge.s32.totalorder %s5737_s29, 1  ;;  %s5737_s29 = sphi %s5797_s29, %s20_s29  }
   0x4   : > { %p264_p1 = scmp.lt.s32.totalorder %s5737_s29, 3 }
   0x6   : > { %p265_p2 = pnand %p4647_p0, %p264_p1 }
   0x8   : > { %268 = sbr.rel (%p265_p2) target bundleno = 1489 (0x5d1), region = 52 }
   0xd   : > { %v5808_v1 = vld [vmem:[%s8971_s1 + $0x10] sm:$0xff]  ;;  %v5813_v2 = vld [vmem:[%s8971_s1] sm:$0xff]  ;;  %p297_p3 = scmp.lt.s32.totalorder %s4643_s30, 1  ;;  %v8979_v3 = vmov 0   ;;  %v5820_v4 = vld [vmem:[%s8971_s1 + $0x8] sm:$0xff]  ;;  %vm510_vm0 = vcmask 130048  }
   0xe   : > { %5367 = vset.pattern.permute.xlu1 %v8979_v3  ;;  %5366 = vset.pattern.permute.xlu0 %v8979_v3  ;;  %v339_v5 = vpack.c.bf16 %v5820_v4, %v5813_v2  ;;  %v5831_v6 = vld [vmem:[%s8971_s1 + $0x18] sm:$0xff]  ;;  %v5843_v10 = vld [vmem:[%s8971_s1 + $0x28] sm:$0xff]  ;;  %v5848_v11 = vld [vmem:[%s8971_s1 + $0x20] sm:$0xff]  ;;  %v5740_v52 = vmov 1   ;;  %vm4315_vm3 = vcmask 130112   ;;  %vm4322_vm4 = vcmask 195712  }
   0xf   : > { %831 = vperm.xlu1 %5367, %v5808_v1   ;;  %821 = vperm.xlu0 %5366, %v5813_v2   ;;  %s9721_s30 = smov (!%p297_p3, %s4643_s30), 1  ;;  %v340_v12 = vpack.c.bf16 %v5831_v6, %v5808_v1  ;;  %v5857_v13 = vld [vmem:[%s8971_s1 + $0x38] sm:$0xff]  ;;  %v5862_v14 = vld [vmem:[%s8971_s1 + $0x30] sm:$0xff]  ;;  %v341_v15 = vpack.c.bf16 %v5843_v10, %v5848_v11  ;;  %v5869_v16 = vld [vmem:[%s8971_s1 + $0x48] sm:$0xff]  ;;  %vm4329_vm5 = vcmask 261312   ;;  %vm4336_vm6 = vcmask 326912  }
  0x10   : > { %s4776_s16 = sshll.u32 %s9721_s30, 4  ;;  %5268 = vmatprep.mubr.msk.bf16.mxu0 %vm510_vm0, %v339_v5  ;;  %v5876_v17 = vld [vmem:[%s8971_s1 + $0x40] sm:$0xff]  ;;  %v5883_v18 = vld [vmem:[%s8971_s1 + $0x58] sm:$0xff]  ;;  %v342_v19 = vpack.c.bf16 %v5857_v13, %v5862_v14  ;;  %v5891_v20 = vld [vmem:[%s8971_s1 + $0x50] sm:$0xff]  ;;  %v5741_v5 = vmov 2   ;;  %vm4343_vm7 = vcmask 392512  }
  0x11   : > { %s301_s19 = scalar_lea.vmem %s8970_s0, %s4776_s16  ;;  %v343_v21 = vpack.c.bf16 %v5869_v16, %v5876_v17  ;;  %v5899_v22 = vld [vmem:[%s8971_s1 + $0x68] sm:$0xff]  ;;  %v5906_v23 = vld [vmem:[%s8971_s1 + $0x60] sm:$0xff]  ;;  %v5913_v24 = vld [vmem:[%s8971_s1 + $0x78] sm:$0xff]  ;;  %v344_v25 = vpack.c.bf16 %v5883_v18, %v5891_v20  ;;  %vm4350_vm8 = vcmask 458112   ;;  %vm4357_vm9 = vcmask 523712   ;;  %s4650_s17 = sshll.u32 %s9721_s30, 1 }
  0x12   : > { %v501_v7 = vld [vmem:[%s301_s19] sm:$0xff]  ;;  %v502_v8 = vld [vmem:[%s301_s19 + $0x8] sm:$0xff]  ;;  %v5921_v26 = vld [vmem:[%s8971_s1 + $0x70] sm:$0xff]  ;;  %v345_v27 = vpack.c.bf16 %v5899_v22, %v5906_v23  ;;  %vm4364_vm10 = vcmask 589312   ;;  %vm4371_vm11 = vcmask 654912   ;;  %vm4378_vm12 = vcmask 720512   ;;  %s305_s20 = scalar_lea.vmem %s8978_s8, %s4650_s17 }
  0x13   : > { %836 = vperm.xlu1 %5367, %v5831_v6   ;;  %826 = vperm.xlu0 %5366, %v5820_v4   ;;  %v503_v9 = vpack.c.bf16 %v502_v8, %v501_v7  ;;  %v5929_v28 = vld [vmem:[%s8971_s1 + $0x88] sm:$0xff]  ;;  %v5936_v29 = vld [vmem:[%s8971_s1 + $0x80] sm:$0xff]  ;;  %v5943_v30 = vld [vmem:[%s8971_s1 + $0x98] sm:$0xff]  ;;  %v346_v31 = vpack.c.bf16 %v5913_v24, %v5921_v26  ;;  %vm4385_vm13 = vcmask 786112   ;;  %vm4392_vm14 = vcmask 851712  }
  0x14   : > { %v5951_v32 = vld [vmem:[%s8971_s1 + $0x90] sm:$0xff]  ;;  %v347_v33 = vpack.c.bf16 %v5929_v28, %v5936_v29  ;;  %v5959_v34 = vld [vmem:[%s8971_s1 + $0xa8] sm:$0xff]  ;;  %v5966_v35 = vld [vmem:[%s8971_s1 + $0xa0] sm:$0xff]  ;;  %vm4399_vm15 = vcmask 917312  }
  0x15   : > { %5266 = vmatprep.subr.bf16.mxu0 %v503_v9  ;;  %v5973_v36 = vld [vmem:[%s8971_s1 + $0xb8] sm:$0xff]  ;;  %v348_v37 = vpack.c.bf16 %v5943_v30, %v5951_v32  ;;  %v5981_v38 = vld [vmem:[%s8971_s1 + $0xb0] sm:$0xff]  ;;  %v349_v39 = vpack.c.bf16 %v5959_v34, %v5966_v35  ;;  %v5989_v40 = vld [vmem:[%s8971_s1 + $0xc8] sm:$0xff] }
  0x16   : > { %5267 = vmatpush3.bf16.msra.mxu0 %v503_v9  ;;  %v5996_v41 = vld [vmem:[%s8971_s1 + $0xc0] sm:$0xff]  ;;  %v6003_v42 = vld [vmem:[%s8971_s1 + $0xd8] sm:$0xff]  ;;  %v350_v43 = vpack.c.bf16 %v5973_v36, %v5981_v38  ;;  %v6011_v44 = vld [vmem:[%s8971_s1 + $0xd0] sm:$0xff] }
  0x17   : > { %846 = vperm.xlu1 %5367, %v5843_v10   ;;  %841 = vperm.xlu0 %5366, %v5848_v11   ;;  %v351_v45 = vpack.c.bf16 %v5989_v40, %v5996_v41  ;;  %v6019_v46 = vld [vmem:[%s8971_s1 + $0xe8] sm:$0xff]  ;;  %v6026_v47 = vld [vmem:[%s8971_s1 + $0xe0] sm:$0xff]  ;;  %v352_v48 = vpack.c.bf16 %v6003_v42, %v6011_v44  ;;  %v6037_v49 = vld [vmem:[%s8971_s1 + $0xf8] sm:$0xff] }
  0x18   : > { %v353_v50 = vpack.c.bf16 %v6019_v46, %v6026_v47  ;;  %v6044_v51 = vld [vmem:[%s8971_s1 + $0xf0] sm:$0xff]  ;;  %v5458_v54 = vld [vmem:[%s8973_s3 + $0x78] sm:$0xff]   ;;  %v5462_v60 = vld [vmem:[%s8973_s3 + $0x68] sm:$0xff]  }
  0x19   : > { %5269 = vmatmul.mubr.msk.bf16.vlgmr.msra.gmra.mxu0 %vm510_vm0, %v340_v12  ;;  %v354_v53 = vpack.c.bf16 %v6037_v49, %v6044_v51  ;;  %v5459_v55 = vld [vmem:[%s8973_s3 + $0x38] sm:$0xff]   ;;  %4794 = vmatprep.subr.bf16.mxu1 %v5458_v54  ;;  %v5460_v56 = vld [vmem:[%s8973_s3 + $0x70] sm:$0xff]   ;;  %v5463_v61 = vld [vmem:[%s8973_s3 + $0x28] sm:$0xff]  }
  0x1a   : > { %5272 = vmatprep.mubr.msk.bf16.mxu0 %vm510_vm0, %v341_v15  ;;  %4795 = vmatpush3.bf16.msra.mxu1 %v5459_v55  ;;  %v5461_v57 = vld [vmem:[%s8973_s3 + $0x30] sm:$0xff]   ;;  %v5464_v0 = vld [vmem:[%s8973_s3 + $0x60] sm:$0xff]   ;;  %v5466_v12 = vld [vmem:[%s8973_s3 + $0x58] sm:$0xff]  }
  0x1b   : > { %856 = vperm.xlu1 %5367, %v5857_v13   ;;  %851 = vperm.xlu0 %5366, %v5862_v14   ;;  %v5465_v7 = vld [vmem:[%s8973_s3 + $0x20] sm:$0xff]   ;;  %v5467_v15 = vld [vmem:[%s8973_s3 + $0x18] sm:$0xff]   ;;  %v5477_v3 = vld [vmem:[%s8973_s3 + $0xb0] sm:$0xff]  }
  0x1c   : > { %4796 = vmatprep.subr.bf16.mxu1 %v5460_v56 }
  0x1e   : > { %4797 = vmatpush3.bf16.msra.mxu1 %v5461_v57 }
  0x1f   : > { %866 = vperm.xlu1 %5367, %v5869_v16   ;;  %861 = vperm.xlu0 %5366, %v5876_v17  }
  0x20   : > { %4798 = vmatprep.subr.bf16.mxu1 %v5462_v60 }
  0x21   : > { %5273 = vmatmul.mubr.msk.bf16.gmra.mxu0 %vm510_vm0, %v342_v19 }
  0x22   : > { %5276 = vmatprep.mubr.msk.bf16.mxu0 %vm510_vm0, %v343_v21  ;;  %4799 = vmatpush3.bf16.msra.mxu1 %v5463_v61 }
  0x23   : > { %876 = vperm.xlu1 %5367, %v5883_v18   ;;  %871 = vperm.xlu0 %5366, %v5891_v20  }
  0x24   : > { %4800 = vmatprep.subr.bf16.mxu1 %v5464_v0 }
  0x26   : > { %4801 = vmatpush3.bf16.msra.mxu1 %v5465_v7 }
  0x27   : > { %886 = vperm.xlu1 %5367, %v5899_v22   ;;  %881 = vperm.xlu0 %5366, %v5906_v23  }
  0x28   : > { %4802 = vmatprep.subr.bf16.mxu1 %v5466_v12 }
  0x29   : > { %5277 = vmatmul.mubr.msk.bf16.gmra.mxu0 %vm510_vm0, %v344_v25  ;;  %v5468_v25 = vld [vmem:[%s8973_s3 + $0x50] sm:$0xff]  }
  0x2a   : > { %5280 = vmatprep.mubr.msk.bf16.mxu0 %vm510_vm0, %v345_v27  ;;  %4803 = vmatpush3.bf16.msra.mxu1 %v5467_v15  ;;  %v5469_v27 = vld [vmem:[%s8973_s3 + $0x10] sm:$0xff]  }
  0x2b   : > { %896 = vperm.xlu1 %5367, %v5913_v24   ;;  %891 = vperm.xlu0 %5366, %v5921_v26  }
  0x2c   : > { %4804 = vmatprep.subr.bf16.mxu1 %v5468_v25 }
  0x2e   : > { %4805 = vmatpush3.bf16.msra.mxu1 %v5469_v27  ;;  %v5474_v27 = vld [vmem:[%s8973_s3 + $0xf8] sm:$0xff]  }
  0x2f   : > { %906 = vperm.xlu1 %5367, %v5929_v28   ;;  %901 = vperm.xlu0 %5366, %v5936_v29  }
  0x30   : > { %4906 = vmatprep.subr.bf16.mxu0 %v5474_v27 }
  0x31   : > { %5281 = vmatmul.mubr.msk.bf16.gmra.mxu0 %vm510_vm0, %v346_v31 }
  0x32   : > { %5284 = vmatprep.mubr.msk.bf16.mxu0 %vm510_vm0, %v347_v33 }
  0x33   : > { %916 = vperm.xlu1 %5367, %v5943_v30   ;;  %911 = vperm.xlu0 %5366, %v5951_v32  }
  0x37   : > { %926 = vperm.xlu1 %5367, %v5959_v34   ;;  %921 = vperm.xlu0 %5366, %v5966_v35  }
  0x39   : > { %5285 = vmatmul.mubr.msk.bf16.gmra.mxu0 %vm510_vm0, %v348_v37  ;;  %v5470_v37 = vld [vmem:[%s8973_s3 + $0x48] sm:$0xff]  }
  0x3a   : > { %5288 = vmatprep.mubr.msk.bf16.mxu0 %vm510_vm0, %v349_v39  ;;  %v5471_v39 = vld [vmem:[%s8973_s3 + $0x8] sm:$0xff]   ;;  %4806 = vmatprep.subr.bf16.mxu1 %v5470_v37  ;;  %v5475_v37 = vld [vmem:[%s8973_s3 + $0xb8] sm:$0xff]  }
  0x3b   : > { %936 = vperm.xlu1 %5367, %v5973_v36   ;;  %931 = vperm.xlu0 %5366, %v5981_v38  }
  0x3c   : > { %4807 = vmatpush3.bf16.msra.mxu1 %v5471_v39  ;;  %4907 = vmatpush3.bf16.msra.mxu0 %v5475_v37  ;;  %v5478_v37 = vld [vmem:[%s8973_s3 + $0xe8] sm:$0xff]  }
  0x3f   : > { %946 = vperm.xlu1 %5367, %v5989_v40   ;;  %941 = vperm.xlu0 %5366, %v5996_v41  }
  0x41   : > { %5289 = vmatmul.mubr.msk.bf16.gmra.mxu0 %vm510_vm0, %v350_v43 }
  0x42   : > { %5292 = vmatprep.mubr.msk.bf16.mxu0 %vm510_vm0, %v351_v45 }
  0x43   : > { %956 = vperm.xlu1 %5367, %v6003_v42   ;;  %951 = vperm.xlu0 %5366, %v6011_v44  }
  0x47   : > { %966 = vperm.xlu1 %5367, %v6019_v46   ;;  %961 = vperm.xlu0 %5366, %v6026_v47  }
  0x49   : > { %5293 = vmatmul.mubr.msk.bf16.gmra.mxu0 %vm510_vm0, %v352_v48  ;;  %v5472_v48 = vld [vmem:[%s8973_s3 + $0x40] sm:$0xff]  }
  0x4a   : > { %5296 = vmatprep.mubr.msk.bf16.mxu0 %vm510_vm0, %v353_v50  ;;  %v5473_v50 = vld [vmem:[%s8973_s3] sm:$0xff]   ;;  %4808 = vmatprep.subr.bf16.mxu1 %v5472_v48 }
  0x4b   : > { %976 = vperm.xlu1 %5367, %v6037_v49   ;;  %971 = vperm.xlu0 %5366, %v6044_v51  }
  0x4c   : > { %4809 = vmatpush3.bf16.msra.mxu1 %v5473_v50  ;;  %v5476_v50 = vld [vmem:[%s8973_s3 + $0xf0] sm:$0xff]  }
  0x4d   : > { %4908 = vmatprep.subr.bf16.mxu0 %v5476_v50 }
  0x4e   : > { %4909 = vmatpush3.bf16.msra.mxu0 %v5477_v3  ;;  %v5480_v3 = vld [vmem:[%s8973_s3 + $0xe0] sm:$0xff]  }
  0x4f   : > { %5369 = vset.pattern.permute.xlu1 %v5740_v52  ;;  %5368 = vset.pattern.permute.xlu0 %v5740_v52 }
  0x50   : > { %1032 = vperm.xlu1 %5369, %v5820_v4   ;;  %1028 = vperm.xlu0 %5368, %v5813_v2  }
  0x51   : > { %5297 = vmatmul.mubr.msk.bf16.gmra.mxu0 %vm510_vm0, %v354_v53  ;;  %4910 = vmatprep.subr.bf16.mxu0 %v5478_v37  ;;  %v5483_v37 = vld [vmem:[%s8973_s3 + $0x98] sm:$0xff]   ;;  %vm4406_vm0 = vcmask 982912  }
  0x54   : > { %1036 = vperm.xlu1 %5369, %v5808_v1   ;;  %1040 = vperm.xlu0 %5368, %v5831_v6  }
  0x58   : > { %1044 = vperm.xlu1 %5369, %v5848_v11   ;;  %1048 = vperm.xlu0 %5368, %v5843_v10  }
  0x5c   : > { %1052 = vperm.xlu1 %5369, %v5862_v14   ;;  %1056 = vperm.xlu0 %5368, %v5857_v13  }
  0x60   : > { %1060 = vperm.xlu1 %5369, %v5876_v17   ;;  %1064 = vperm.xlu0 %5368, %v5869_v16  }
  0x64   : > { %1068 = vperm.xlu1 %5369, %v5891_v20   ;;  %1072 = vperm.xlu0 %5368, %v5883_v18  }
  0x68   : > { %1076 = vperm.xlu1 %5369, %v5906_v23   ;;  %1080 = vperm.xlu0 %5368, %v5899_v22  }
  0x6c   : > { %1084 = vperm.xlu1 %5369, %v5921_v26   ;;  %1088 = vperm.xlu0 %5368, %v5913_v24  }
  0x70   : > { %1092 = vperm.xlu1 %5369, %v5936_v29   ;;  %1096 = vperm.xlu0 %5368, %v5929_v28  }
  0x74   : > { %1100 = vperm.xlu1 %5369, %v5951_v32   ;;  %1104 = vperm.xlu0 %5368, %v5943_v30  }
  0x78   : > { %1108 = vperm.xlu1 %5369, %v5966_v35   ;;  %1112 = vperm.xlu0 %5368, %v5959_v34  }
  0x7c   : > { %1116 = vperm.xlu1 %5369, %v5981_v38   ;;  %1120 = vperm.xlu0 %5368, %v5973_v36  }
  0x80   : > { %1124 = vperm.xlu1 %5369, %v5996_v41   ;;  %1128 = vperm.xlu0 %5368, %v5989_v40  }
  0x84   : > { %1132 = vperm.xlu1 %5369, %v6011_v44   ;;  %1136 = vperm.xlu0 %5368, %v6003_v42  }
  0x88   : > { %1140 = vperm.xlu1 %5369, %v6026_v47   ;;  %1144 = vperm.xlu0 %5368, %v6019_v46  }
  0x8a   : > { %v6095_v58 = vpop.permute.xlu1 %831  ;;  %v6097_v59 = vpop.permute.xlu0 %821 }
  0x8c   : > { %1148 = vperm.xlu1 %5369, %v6044_v51   ;;  %1152 = vperm.xlu0 %5368, %v6037_v49  }
  0x8e   : > { %v6107_v62 = vpop.permute.xlu1 %836  ;;  %v6109_v63 = vpop.permute.xlu0 %826 }
  0x90   : > { %5370 = vset.pattern.permute.xlu1 %v5741_v5  ;;  %5371 = vset.pattern.permute.xlu0 %v5741_v5 }
  0x91   : > { %1269 = vperm.xlu1 %5370, %v5813_v2   ;;  %1273 = vperm.xlu0 %5371, %v5820_v4  }
  0x92   : > { %v6119_v8 = vpop.permute.xlu1 %846  ;;  %v6121_v9 = vpop.permute.xlu0 %841 }
  0x95   : > { %1277 = vperm.xlu1 %5370, %v5808_v1   ;;  %1285 = vperm.xlu0 %5371, %v5848_v11  }
  0x96   : > { %v6131_v19 = vpop.permute.xlu1 %856  ;;  %v6133_v21 = vpop.permute.xlu0 %851 }
  0x99   : > { %1281 = vperm.xlu1 %5370, %v5831_v6   ;;  %1293 = vperm.xlu0 %5371, %v5862_v14  }
  0x9a   : > { %v6143_v31 = vpop.permute.xlu1 %866  ;;  %v6145_v33 = vpop.permute.xlu0 %861 }
  0x9d   : > { %1289 = vperm.xlu1 %5370, %v5843_v10   ;;  %1301 = vperm.xlu0 %5371, %v5876_v17  }
  0x9e   : > { %v6155_v43 = vpop.permute.xlu1 %876  ;;  %v6157_v45 = vpop.permute.xlu0 %871 }
  0xa1   : > { %1297 = vperm.xlu1 %5370, %v5857_v13   ;;  %1309 = vperm.xlu0 %5371, %v5891_v20  }
  0xa2   : > { %v6167_v52 = vpop.permute.xlu1 %886  ;;  %v6169_v53 = vpop.permute.xlu0 %881 }
  0xa3   : > { %9179 = vst [vmem:[#allocation4_spill] sm:$0xff] %v6167_v52 }
  0xa5   : > { %1305 = vperm.xlu1 %5370, %v5869_v16   ;;  %1317 = vperm.xlu0 %5371, %v5906_v23  }
  0xa6   : > { %v6173_v54 = vpop.permute.xlu1 %896  ;;  %v6175_v55 = vpop.permute.xlu0 %891 }
  0xa7   : > { %9180 = vst [vmem:[#allocation5_spill] sm:$0xff] %v6173_v54  ;;  %9181 = vst [vmem:[#allocation6_spill] sm:$0xff] %v6175_v55 }
  0xa9   : > { %1313 = vperm.xlu1 %5370, %v5883_v18   ;;  %1325 = vperm.xlu0 %5371, %v5921_v26  }
  0xaa   : > { %v6179_v56 = vpop.permute.xlu1 %906  ;;  %v6181_v57 = vpop.permute.xlu0 %901 }
  0xab   : > { %9182 = vst [vmem:[#allocation7_spill] sm:$0xff] %v6179_v56  ;;  %9183 = vst [vmem:[#allocation8_spill] sm:$0xff] %v6181_v57 }
  0xad   : > { %1321 = vperm.xlu1 %5370, %v5899_v22   ;;  %1333 = vperm.xlu0 %5371, %v5936_v29  }
  0xae   : > { %v6185_v60 = vpop.permute.xlu1 %916  ;;  %v6187_v61 = vpop.permute.xlu0 %911 }
  0xaf   : > { %9184 = vst [vmem:[#allocation9_spill] sm:$0xff] %v6185_v60  ;;  %9185 = vst [vmem:[#allocation10_spill] sm:$0xff] %v6187_v61 }
  0xb1   : > { %1329 = vperm.xlu1 %5370, %v5913_v24   ;;  %1341 = vperm.xlu0 %5371, %v5951_v32  }
  0xb2   : > { %v6191_v0 = vpop.permute.xlu1 %926  ;;  %v6193_v5 = vpop.permute.xlu0 %921 }
  0xb3   : > { %9186 = vst [vmem:[#allocation11_spill] sm:$0xff] %v6191_v0  ;;  %9187 = vst [vmem:[#allocation12_spill] sm:$0xff] %v6193_v5 }
  0xb5   : > { %1337 = vperm.xlu1 %5370, %v5929_v28   ;;  %1349 = vperm.xlu0 %5371, %v5966_v35  }
  0xb6   : > { %v6197_v7 = vpop.permute.xlu1 %936  ;;  %v6199_v12 = vpop.permute.xlu0 %931 }
  0xb7   : > { %9188 = vst [vmem:[#allocation13_spill] sm:$0xff] %v6197_v7  ;;  %9189 = vst [vmem:[#allocation14_spill] sm:$0xff] %v6199_v12 }
  0xb9   : > { %1345 = vperm.xlu1 %5370, %v5943_v30   ;;  %1357 = vperm.xlu0 %5371, %v5981_v38  }
  0xba   : > { %v6203_v15 = vpop.permute.xlu1 %946  ;;  %v6205_v25 = vpop.permute.xlu0 %941 }
  0xbb   : > { %9190 = vst [vmem:[#allocation15_spill] sm:$0xff] %v6203_v15  ;;  %9191 = vst [vmem:[#allocation16_spill] sm:$0xff] %v6205_v25  ;;  %v8983_v25 = vmov 3  }
  0xbd   : > { %1353 = vperm.xlu1 %5370, %v5959_v34   ;;  %1365 = vperm.xlu0 %5371, %v5996_v41  }
  0xbe   : > { %v6215_v39 = vpop.permute.xlu1 %956  ;;  %v6217_v48 = vpop.permute.xlu0 %951 }
  0xbf   : > { %9192 = vst [vmem:[#allocation17_spill] sm:$0xff] %v6215_v39  ;;  %9193 = vst [vmem:[#allocation18_spill] sm:$0xff] %v6217_v48  ;;  %v5479_v48 = vld [vmem:[%s8973_s3 + $0xa8] sm:$0xff]  }
  0xc0   : > { %4911 = vmatpush3.bf16.msra.mxu0 %v5479_v48  ;;  %v5482_v48 = vld [vmem:[%s8973_s3 + $0xd8] sm:$0xff]  }
  0xc1   : > { %1361 = vperm.xlu1 %5370, %v5973_v36   ;;  %1373 = vperm.xlu0 %5371, %v6011_v44  }
  0xc2   : > { %v6227_v27 = vpop.permute.xlu1 %966  ;;  %v6229_v39 = vpop.permute.xlu0 %961  ;;  %4912 = vmatprep.subr.bf16.mxu0 %v5480_v3  ;;  %v5485_v3 = vld [vmem:[%s8973_s3 + $0x90] sm:$0xff]  }
  0xc3   : > { %9194 = vst [vmem:[#allocation19_spill] sm:$0xff] %v6227_v27  ;;  %9195 = vst [vmem:[#allocation20_spill] sm:$0xff] %v6229_v39  ;;  %v5481_v27 = vld [vmem:[%s8973_s3 + $0xa0] sm:$0xff]  }
  0xc4   : > { %4913 = vmatpush3.bf16.msra.mxu0 %v5481_v27  ;;  %v5484_v27 = vld [vmem:[%s8973_s3 + $0xd0] sm:$0xff]  }
  0xc5   : > { %1369 = vperm.xlu1 %5370, %v5989_v40   ;;  %1381 = vperm.xlu0 %5371, %v6026_v47  }
  0xc6   : > { %v6239_v50 = vpop.permute.xlu1 %976  ;;  %v6241_v44 = vpop.permute.xlu0 %971  ;;  %4914 = vmatprep.subr.bf16.mxu0 %v5482_v48  ;;  %v5486_v48 = vld [vmem:[%s8973_s3 + $0xc8] sm:$0xff]  }
  0xc7   : > { %9196 = vst [vmem:[#allocation21_spill] sm:$0xff] %v6239_v50  ;;  %9197 = vst [vmem:[#allocation22_spill] sm:$0xff] %v6241_v44  ;;  %v8981_v44 = vmov 5  }
  0xc8   : > { %4915 = vmatpush3.bf16.msra.mxu0 %v5483_v37  ;;  %v5487_v37 = vld [vmem:[%s8973_s3 + $0x88] sm:$0xff]  }
  0xc9   : > { %1377 = vperm.xlu1 %5370, %v6003_v42   ;;  %1389 = vperm.xlu0 %5371, %v6044_v51  }
  0xca   : > { %4916 = vmatprep.subr.bf16.mxu0 %v5484_v27  ;;  %v5488_v27 = vld [vmem:[%s8973_s3 + $0xc0] sm:$0xff]  }
  0xcb   : > { %v6251_v47 = vpop.permute.xlu1 %1032  ;;  %v6259_v50 = vpop.permute.xlu0 %1028 }
  0xcc   : > { %4917 = vmatpush3.bf16.msra.mxu0 %v5485_v3  ;;  %v5489_v3 = vld [vmem:[%s8973_s3 + $0x80] sm:$0xff]  }
  0xcd   : > { %1385 = vperm.xlu1 %5370, %v6019_v46   ;;  %5373 = vset.pattern.permute.xlu0 %v8981_v44 }
  0xce   : > { %1797 = vperm.xlu0 %5373, %v5813_v2   ;;  %4918 = vmatprep.subr.bf16.mxu0 %v5486_v48 }
  0xcf   : > { %v6264_v51 = vpop.permute.xlu1 %1036  ;;  %v6275_v39 = vpop.permute.xlu0 %1040 }
  0xd0   : > { %4919 = vmatpush3.bf16.msra.mxu0 %v5487_v37 }
  0xd1   : > { %1393 = vperm.xlu1 %5370, %v6037_v49   ;;  %4920 = vmatprep.subr.bf16.mxu0 %v5488_v27 }
  0xd2   : > { %1813 = vperm.xlu0 %5373, %v5848_v11  }
  0xd3   : > { %v6282_v44 = vpop.permute.xlu1 %1044  ;;  %v6284_v15 = vpop.permute.xlu0 %1048 }
  0xd4   : > { %4921 = vmatpush3.bf16.msra.mxu0 %v5489_v3 }
  0xd5   : > { %5372 = vset.pattern.permute.xlu1 %v8983_v25 }
  0xd6   : > { %1449 = vperm.xlu1 %5372, %v5820_v4   ;;  %5378 = vset.pattern.permute.xlu0 %v8983_v25 }
  0xd7   : > { %v6295_v7 = vpop.permute.xlu1 %1052  ;;  %1445 = vperm.xlu0 %5378, %v5813_v2   ;;  %v6298_v48 = vpop.permute.xlu0 %1056 }
  0xd9   : > { %v6301_v4 = vpop.f32.mrf.mxu0 }
  0xda   : > { %1453 = vperm.xlu1 %5372, %v5808_v1  }
  0xdb   : > { %v6303_v37 = vpop.permute.xlu1 %1060  ;;  %1457 = vperm.xlu0 %5378, %v5831_v6   ;;  %v6306_v12 = vpop.permute.xlu0 %1064 }
  0xdc   : > { %v6308_v0 = vpop.f32.mrf.mxu0 }
  0xde   : > { %1461 = vperm.xlu1 %5372, %v5848_v11   ;;  %v6311_v25 = vpop.f32.mrf.mxu0 }
  0xdf   : > { %v6313_v2 = vpop.permute.xlu1 %1068  ;;  %1465 = vperm.xlu0 %5378, %v5843_v10   ;;  %v6316_v1 = vpop.permute.xlu0 %1072 }
  0xe0   : > { %v6318_v27 = vpop.f32.mrf.mxu0 }
  0xe2   : > { %1469 = vperm.xlu1 %5372, %v5862_v14   ;;  %v6321_v3 = vpop.f32.mrf.mxu0 }
  0xe3   : > { %v6323_v6 = vpop.permute.xlu1 %1076  ;;  %1473 = vperm.xlu0 %5378, %v5857_v13   ;;  %v6326_v5 = vpop.permute.xlu0 %1080 }
  0xe4   : > { %v6328_v11 = vpop.f32.mrf.mxu0 }
  0xe6   : > { %1477 = vperm.xlu1 %5372, %v5876_v17   ;;  %v6331_v60 = vpop.f32.mrf.mxu0 }
  0xe7   : > { %v6333_v10 = vpop.permute.xlu1 %1084  ;;  %1481 = vperm.xlu0 %5378, %v5869_v16   ;;  %v6336_v61 = vpop.permute.xlu0 %1088 }
  0xe8   : > { %9198 = vst [vmem:[#allocation23_spill] sm:$0xff] %v6333_v10  ;;  %v6338_v14 = vpop.f32.mrf.mxu0 }
  0xea   : > { %1485 = vperm.xlu1 %5372, %v5891_v20   ;;  %v6341_v56 = vpop.f32.mrf.mxu0 }
  0xeb   : > { %v6343_v13 = vpop.permute.xlu1 %1092  ;;  %1489 = vperm.xlu0 %5378, %v5883_v18   ;;  %v6346_v57 = vpop.permute.xlu0 %1096 }
  0xec   : > { %9199 = vst [vmem:[#allocation24_spill] sm:$0xff] %v6343_v13  ;;  %9200 = vst [vmem:[#allocation25_spill] sm:$0xff] %v6346_v57  ;;  %v6348_v17 = vpop.f32.mrf.mxu0 }
  0xee   : > { %1493 = vperm.xlu1 %5372, %v5906_v23   ;;  %v6351_v54 = vpop.f32.mrf.mxu0 }
  0xef   : > { %v6353_v16 = vpop.permute.xlu1 %1100  ;;  %1497 = vperm.xlu0 %5378, %v5899_v22   ;;  %v6356_v55 = vpop.permute.xlu0 %1104 }
  0xf0   : > { %9201 = vst [vmem:[#allocation26_spill] sm:$0xff] %v6353_v16  ;;  %9202 = vst [vmem:[#allocation27_spill] sm:$0xff] %v6356_v55  ;;  %v6358_v20 = vpop.f32.mrf.mxu0 }
  0xf2   : > { %1501 = vperm.xlu1 %5372, %v5921_v26   ;;  %v6361_v13 = vpop.f32.mrf.mxu0 }
  0xf3   : > { %v6363_v18 = vpop.permute.xlu1 %1108  ;;  %1505 = vperm.xlu0 %5378, %v5913_v24   ;;  %v6366_v57 = vpop.permute.xlu0 %1112  ;;  %v6384_v24 = vld [vmem:[%s8972_s2] ss:$0 sm:$0xff] }
  0xf4   : > { %9203 = vst [vmem:[#allocation28_spill] sm:$0xff] %v6363_v18  ;;  %9204 = vst [vmem:[#allocation29_spill] sm:$0xff] %v6366_v57  ;;  %v6368_v23 = vpop.f32.mrf.mxu0 }
  0xf6   : > { %1509 = vperm.xlu1 %5372, %v5936_v29   ;;  %v6371_v16 = vpop.f32.mrf.mxu0 }
  0xf7   : > { %v6373_v22 = vpop.permute.xlu1 %1116  ;;  %1513 = vperm.xlu0 %5378, %v5929_v28   ;;  %v6376_v55 = vpop.permute.xlu0 %1120 }
  0xf8   : > { %9205 = vst [vmem:[#allocation30_spill] sm:$0xff] %v6373_v22  ;;  %9206 = vst [vmem:[#allocation31_spill] sm:$0xff] %v6376_v55  ;;  %v6378_v26 = vpop.f32.mrf.mxu0 }
  0xfa   : > { %1517 = vperm.xlu1 %5372, %v5951_v32   ;;  %v5286_v18 = vpop.f32.mrf.mxu0 }
  0xfb   : > { %v6386_v57 = vpop.permute.xlu1 %1124  ;;  %v6389_v29 = vadd.f32 %v5286_v18, %v6384_v24  ;;  %1521 = vperm.xlu0 %5378, %v5943_v30   ;;  %v6392_v28 = vpop.permute.xlu0 %1128 }
  0xfc   : > { %9207 = vst [vmem:[#allocation32_spill] sm:$0xff] %v6386_v57  ;;  %9209 = vst [vmem:[#allocation34_spill] sm:$0xff] %v6392_v28  ;;  %v657_v22 = vpop.f32.mrf.mxu0 }
  0xfd   : > { %9208 = vst [vmem:[#allocation33_spill] sm:$0xff] %v6389_v29  ;;  %v6395_v55 = vadd.f32 %v6384_v24, %v657_v22  ;;  %v597_v29 = vadd.f32 %v6384_v24, %v6318_v27 }
  0xfe   : > { %1525 = vperm.xlu1 %5372, %v5966_v35   ;;  %v5287_v32 = vpop.f32.mrf.mxu0 }
  0xff   : > { %9210 = vst [vmem:[#allocation35_spill] sm:$0xff] %v6395_v55  ;;  %v6398_v10 = vpop.permute.xlu1 %1132  ;;  %v6401_v52 = vadd.f32 %v5287_v32, %v6384_v24  ;;  %1529 = vperm.xlu0 %5378, %v5959_v34   ;;  %v6404_v18 = vpop.permute.xlu0 %1136  ;;  %v5490_v34 = vld [vmem:[%s8973_s3 + $0x178] sm:$0xff]  }
 0x100   : > { %9211 = vst [vmem:[#allocation36_spill] sm:$0xff] %v6398_v10  ;;  %9213 = vst [vmem:[#allocation38_spill] sm:$0xff] %v6404_v18  ;;  %v6406_v57 = vpop.f32.mrf.mxu0  ;;  %5018 = vmatprep.subr.bf16.mxu1 %v5490_v34 }
 0x101   : > { %9212 = vst [vmem:[#allocation37_spill] sm:$0xff] %v6401_v52  ;;  %9214 = vst [vmem:[#allocation39_spill] sm:$0xff] %v6406_v57 }
 0x102   : > { %1533 = vperm.xlu1 %5372, %v5981_v38   ;;  %v5290_v30 = vpop.f32.mrf.mxu0 }
 0x103   : > { %v6409_v28 = vpop.permute.xlu1 %1140  ;;  %v6412_v22 = vadd.f32 %v5290_v30, %v6384_v24  ;;  %1537 = vperm.xlu0 %5378, %v5973_v36   ;;  %v6415_v35 = vpop.permute.xlu0 %1144 }
 0x104   : > { %9215 = vst [vmem:[#allocation40_spill] sm:$0xff] %v6409_v28  ;;  %9217 = vst [vmem:[#allocation42_spill] sm:$0xff] %v6415_v35  ;;  %v673_v32 = vpop.f32.mrf.mxu0  ;;  %v5658_v35 = vld [vmem:[%s8971_s1 + $0x8] sm:$0xff] }
 0x105   : > { %9216 = vst [vmem:[#allocation41_spill] sm:$0xff] %v6412_v22  ;;  %v6418_v10 = vadd.f32 %v6384_v24, %v673_v32  ;;  %v9223_v32 = vmov 5  }
 0x106   : > { %1541 = vperm.xlu1 %5372, %v5996_v41   ;;  %v5291_v38 = vpop.f32.mrf.mxu0 }
 0x107   : > { %9218 = vst [vmem:[#allocation43_spill] sm:$0xff] %v6418_v10  ;;  %v6424_v18 = vpop.permute.xlu1 %1148  ;;  %v6427_v30 = vadd.f32 %v5291_v38, %v6384_v24  ;;  %1545 = vperm.xlu0 %5378, %v5989_v40   ;;  %v6430_v36 = vpop.permute.xlu0 %1152 }
 0x108   : > { %9219 = vst [vmem:[#allocation44_spill] sm:$0xff] %v6424_v18  ;;  %9221 = vst [vmem:[#allocation46_spill] sm:$0xff] %v6430_v36  ;;  %v6432_v28 = vpop.f32.mrf.mxu0 }
 0x109   : > { %9220 = vst [vmem:[#allocation45_spill] sm:$0xff] %v6427_v30  ;;  %9222 = vst [vmem:[#allocation47_spill] sm:$0xff] %v6432_v28  ;;  %v8985_v30 = vmov 4  }
 0x10a   : > { %5374 = vset.pattern.permute.xlu1 %v9223_v32  ;;  %v5294_v41 = vpop.f32.mrf.mxu0 }
 0x10b   : > { %1801 = vperm.xlu1 %5374, %v5658_v35   ;;  %v6439_v18 = vadd.f32 %v5294_v41, %v6384_v24  ;;  %1553 = vperm.xlu0 %5378, %v6003_v42   ;;  %v6457_v42 = vld [vmem:[%s8971_s1] sm:$0xff] }
 0x10c   : > { %v6442_v38 = vpop.permute.xlu1 %1269  ;;  %v689_v40 = vpop.f32.mrf.mxu0  ;;  %9228 = vst [vmem:[#allocation52_spill] sm:$0xff] %v6457_v42 }
 0x10d   : > { %9224 = vst [vmem:[#allocation48_spill] sm:$0xff] %v6439_v18  ;;  %v6444_v36 = vpop.permute.xlu0 %1273  ;;  %v6447_v34 = vadd.f32 %v6384_v24, %v689_v40 }
 0x10e   : > { %9225 = vst [vmem:[#allocation49_spill] sm:$0xff] %v6444_v36  ;;  %v5295_v22 = vpop.f32.mrf.mxu0 }
 0x10f   : > { %9226 = vst [vmem:[#allocation50_spill] sm:$0xff] %v6447_v34  ;;  %5375 = vset.pattern.permute.xlu1 %v8985_v30  ;;  %v6451_v10 = vadd.f32 %v5295_v22, %v6384_v24  ;;  %1561 = vperm.xlu0 %5378, %v6019_v46  }
 0x110   : > { %1621 = vperm.xlu1 %5375, %v6457_v42   ;;  %v6460_v41 = vpop.permute.xlu1 %1277  ;;  %v6462_v40 = vpop.f32.mrf.mxu0  ;;  %v6474_v42 = vld [vmem:[%s8971_s1 + $0x10] sm:$0xff] }
 0x111   : > { %9227 = vst [vmem:[#allocation51_spill] sm:$0xff] %v6451_v10  ;;  %9229 = vst [vmem:[#allocation53_spill] sm:$0xff] %v6460_v41  ;;  %v6464_v18 = vpop.permute.xlu0 %1285  ;;  %v594_v41 = vadd.f32 %v6384_v24, %v6308_v0 }
 0x112   : > { %9230 = vst [vmem:[#allocation54_spill] sm:$0xff] %v6462_v40  ;;  %9231 = vst [vmem:[#allocation55_spill] sm:$0xff] %v6464_v18  ;;  %v5298_v34 = vpop.f32.mrf.mxu0  ;;  %v8989_v18 = vmov 7  }
 0x113   : > { %v714_v30 = vadd.f32 %v5298_v34, %v6384_v24  ;;  %1569 = vperm.xlu0 %5378, %v6037_v49  }
 0x114   : > { %5376 = vset.pattern.permute.xlu1 %v9223_v32  ;;  %v6469_v46 = vpop.permute.xlu1 %1281  ;;  %v705_v10 = vpop.f32.mrf.mxu0 }
 0x115   : > { %9232 = vst [vmem:[#allocation56_spill] sm:$0xff] %v6469_v46  ;;  %1805 = vperm.xlu1 %5376, %v6474_v42   ;;  %v6477_v40 = vpop.permute.xlu0 %1293  ;;  %v6479_v28 = vmax.f32 %v714_v30, 0.0  ;;  %v6482_v34 = vadd.f32 %v6384_v24, %v705_v10 }
 0x116   : > { %9233 = vst [vmem:[#allocation57_spill] sm:$0xff] %v6477_v40  ;;  %v5299_v49 = vpop.f32.mrf.mxu0  ;;  %v9237_v40 = vlaneseq }
 0x117   : > { %9234 = vst [vmem:[#allocation58_spill] sm:$0xff] %v6479_v28  ;;  %9235 = vst [vmem:[#allocation59_spill] sm:$0xff] %v6482_v34  ;;  %v717_v22 = vadd.f32 %v5299_v49, %v6384_v24  ;;  %5395 = vset.pattern.permute.xlu0 %v8989_v18  ;;  %v5661_v34 = vld [vmem:[%s8971_s1 + $0x18] sm:$0xff]  ;;  %v782_v0 = vrot.slane %v6479_v28, 7 }
 0x118   : > { %v6488_v52 = vpop.permute.xlu1 %1289  ;;  %v6493_v30 = vshrl.u32 %v9237_v40, 7  ;;  %2153 = vperm.xlu0 %5395, %v5658_v35   ;;  %v708_v10 = vpop.f32.mrf.mxu0  ;;  %v6506_v40 = vmax.f32 %v597_v29, 0.0 }
 0x119   : > { %9236 = vst [vmem:[#allocation60_spill] sm:$0xff] %v6488_v52  ;;  %1809 = vperm.xlu1 %5376, %v5661_v34   ;;  %v6498_v27 = vpop.permute.xlu0 %1301  ;;  %v6500_v49 = vmax.f32 %v717_v22, 0.0  ;;  %v709_v18 = vadd.f32 %v6384_v24, %v708_v10  ;;  %v1155_v52 = vmul.f32 %v6259_v50, %v6479_v28  ;;  %v9244_v22 = vmov 4  }
 0x11a   : > { %9238 = vst [vmem:[#allocation61_spill] sm:$0xff] %v6493_v30  ;;  %9239 = vst [vmem:[#allocation62_spill] sm:$0xff] %v6498_v27  ;;  %vm786_vm1 = vcmp.lt.s32.totalorder %v6493_v30, 1  ;;  %v6520_v50 = vmax.f32 %v594_v41, 0.0  ;;  %v605_v41 = vadd.f32 %v6311_v25, %v6384_v24  ;;  %vm1235_vm2 = vcmp.lt.s32.totalorder %v6493_v30, 7 }
 0x11b   : > { %9240 = vst [vmem:[#allocation63_spill] sm:$0xff] %v6500_v49  ;;  %9241 = vst [vmem:[#allocation64_spill] sm:$0xff] %v6506_v40  ;;  %v6508_v55 = vmax.f32 %v709_v18, 0.0  ;;  %v1156_v57 = vmul.f32 %v6251_v47, %v6500_v49  ;;  %v783_v27 = vrot.slane %v6500_v49, 7 }
 0x11c   : > { %v6510_v46 = vpop.permute.xlu1 %1297  ;;  %5396 = vset.pattern.permute.xlu0 %v9244_v22  ;;  %9246 = vst [vmem:[#allocation68_spill] sm:$0xff] %v6520_v50 }
 0x11d   : > { %9242 = vst [vmem:[#allocation65_spill] sm:$0xff] %v6508_v55  ;;  %9243 = vst [vmem:[#allocation66_spill] sm:$0xff] %v6510_v46  ;;  %5377 = vset.pattern.permute.xlu1 %v9244_v22  ;;  %v6517_v10 = vpop.permute.xlu0 %1309  ;;  %1625 = vperm.xlu0 %5396, %v5658_v35   ;;  %v1187_v29 = vpack.c.bf16 %v1156_v57, %v1155_v52  ;;  %v8991_v18 = vrot.slane %v6508_v55, 7  ;;  %v6525_v47 = vsel %vm786_vm1, %v782_v0, %v783_v27 }
 0x11e   : > { %9245 = vst [vmem:[#allocation67_spill] sm:$0xff] %v6517_v10  ;;  %1633 = vperm.xlu1 %5377, %v5661_v34   ;;  %9247 = vst [vmem:[#allocation69_spill] sm:$0xff] %v6525_v47  ;;  %v980_v46 = vmul.f32 %v6109_v63, %v6525_v47  ;;  %v8992_v36 = vrot.slane %v6508_v55, 1  ;;  %v8993_v10 = vrot.slane %v6479_v28, 1  ;;  %v1158_v63 = vmul.f32 %v6275_v39, %v6506_v40  ;;  %v5664_v55 = vld [vmem:[%s8971_s1 + $0x30] sm:$0xff] }
 0x11f   : > { %2970 = vmatprep.mubr.bf16.mxu1 %v1187_v29  ;;  %v6540_v57 = vsel %vm786_vm1, %v8991_v18, %v782_v0  ;;  %v602_v0 = vadd.f32 %v6301_v4, %v6384_v24  ;;  %v1157_v39 = vmul.f32 %v6264_v51, %v6520_v50  ;;  %v753_v29 = vrot.slane %v6506_v40, 7  ;;  %v6567_v18 = vld [vmem:[%s8971_s1 + $0x28] sm:$0xff] }
 0x120   : > { %v6534_v52 = vpop.permute.xlu1 %1305  ;;  %9248 = vst [vmem:[#allocation70_spill] sm:$0xff] %v6540_v57  ;;  %v979_v34 = vmul.f32 %v6097_v59, %v6540_v57  ;;  %v6554_v25 = vsel %vm1235_vm2, %v8992_v36, %v8993_v10  ;;  %v752_v59 = vrot.slane %v6520_v50, 7  ;;  %v6570_v4 = vmax.f32 %v605_v41, 0.0 }
 0x121   : > { %v6544_v35 = vpop.permute.xlu0 %1317  ;;  %9250 = vst [vmem:[#allocation72_spill] sm:$0xff] %v6554_v25  ;;  %1629 = vperm.xlu0 %5396, %v6474_v42   ;;  %v1188_v57 = vpack.c.bf16 %v1158_v63, %v1157_v39  ;;  %v5491_v25 = vld [vmem:[%s8973_s3 + $0x138] sm:$0xff]   ;;  %v6586_v41 = vmax.f32 %v602_v0, 0.0  ;;  %v613_v63 = vadd.f32 %v6384_v24, %v6338_v14 }
 0x122   : > { %9249 = vst [vmem:[#allocation71_spill] sm:$0xff] %v6544_v35  ;;  %5379 = vset.pattern.permute.xlu1 %v9223_v32  ;;  %v1011_v36 = vpack.c.bf16 %v980_v46, %v979_v34  ;;  %9251 = vst [vmem:[#allocation73_spill] sm:$0xff] %v6570_v4  ;;  %v6576_v51 = vsel %vm786_vm1, %v783_v27, %v752_v59  ;;  %v5492_v46 = vld [vmem:[%s8973_s3 + $0x170] sm:$0xff]   ;;  %v6591_v27 = vsel %vm786_vm1, %v752_v59, %v753_v29  ;;  %v6601_v34 = vld [vmem:[%s8971_s1 + $0x20] sm:$0xff] }
 0x123   : > { %1817 = vperm.xlu1 %5379, %v6567_v18   ;;  %9252 = vst [vmem:[#allocation74_spill] sm:$0xff] %v6576_v51  ;;  %9254 = vst [vmem:[#allocation76_spill] sm:$0xff] %v6586_v41  ;;  %v1160_v0 = vmul.f32 %v6284_v15, %v6570_v4  ;;  %v982_v14 = vmul.f32 %v6107_v62, %v6591_v27  ;;  %v610_v59 = vadd.f32 %v6384_v24, %v6328_v11  ;;  %v5494_v62 = vld [vmem:[%s8973_s3 + $0x168] sm:$0xff]  }
 0x124   : > { %v6572_v10 = vpop.permute.xlu1 %1313  ;;  %2971 = vmatmul.mubr.bf16.vlgmr.msra.gmra.mxu1 %v1011_v36  ;;  %9255 = vst [vmem:[#allocation77_spill] sm:$0xff] %v6591_v27  ;;  %v981_v36 = vmul.f32 %v6095_v58, %v6576_v51  ;;  %9256 = vst [vmem:[#allocation78_spill] sm:$0xff] %v6601_v34  ;;  %v5493_v58 = vld [vmem:[%s8973_s3 + $0x130] sm:$0xff]   ;;  %v1159_v15 = vmul.f32 %v6282_v44, %v6586_v41  ;;  %v5495_v44 = vld [vmem:[%s8973_s3 + $0x128] sm:$0xff]  }
 0x125   : > { %v6581_v47 = vpop.permute.xlu0 %1325  ;;  %1641 = vperm.xlu0 %5396, %v6567_v18   ;;  %2978 = vmatprep.mubr.bf16.mxu1 %v1188_v57 }
 0x126   : > { %9253 = vst [vmem:[#allocation75_spill] sm:$0xff] %v6581_v47  ;;  %5019 = vmatpush3.bf16.msra.mxu1 %v5491_v25  ;;  %v754_v25 = vrot.slane %v6586_v41, 7  ;;  %v755_v47 = vrot.slane %v6570_v4, 7 }
 0x127   : > { %5380 = vset.pattern.permute.xlu1 %v9244_v22  ;;  %5020 = vmatprep.subr.bf16.mxu1 %v5492_v46  ;;  %v6627_v46 = vmax.f32 %v613_v63, 0.0  ;;  %v5496_v63 = vld [vmem:[%s8973_s3 + $0x160] sm:$0xff]  }
 0x128   : > { %1637 = vperm.xlu1 %5380, %v6601_v34   ;;  %v6604_v57 = vpop.permute.xlu1 %1321  ;;  %v1189_v34 = vpack.c.bf16 %v1160_v0, %v1159_v15  ;;  %v6654_v0 = vsel %vm786_vm1, %v754_v25, %v755_v47 }
 0x129   : > { %9257 = vst [vmem:[#allocation79_spill] sm:$0xff] %v6604_v57  ;;  %v6611_v39 = vpop.permute.xlu0 %1333  ;;  %1645 = vperm.xlu0 %5396, %v5664_v55   ;;  %9259 = vst [vmem:[#allocation81_spill] sm:$0xff] %v6627_v46  ;;  %v6634_v57 = vsel %vm786_vm1, %v753_v29, %v754_v25  ;;  %v6649_v29 = vld [vmem:[%s8971_s1 + $0x40] sm:$0xff] }
 0x12a   : > { %9258 = vst [vmem:[#allocation80_spill] sm:$0xff] %v6611_v39  ;;  %v1012_v39 = vpack.c.bf16 %v982_v14, %v981_v36  ;;  %9261 = vst [vmem:[#allocation83_spill] sm:$0xff] %v6634_v57  ;;  %5021 = vmatpush3.bf16.msra.mxu1 %v5493_v58  ;;  %v6644_v14 = vmax.f32 %v610_v59, 0.0  ;;  %v621_v58 = vadd.f32 %v6331_v60, %v6384_v24  ;;  %v5497_v25 = vld [vmem:[%s8973_s3 + $0x120] sm:$0xff]  }
 0x12b   : > { %9264 = vst [vmem:[#allocation86_spill] sm:$0xff] %v6654_v0  ;;  %5022 = vmatprep.subr.bf16.mxu1 %v5494_v62  ;;  %v1162_v59 = vmul.f32 %v6298_v48, %v6627_v46  ;;  %v984_v48 = vmul.f32 %v6119_v8, %v6654_v0  ;;  %v618_v62 = vadd.f32 %v6321_v3, %v6384_v24 }
 0x12c   : > { %5381 = vset.pattern.permute.xlu1 %v9223_v32  ;;  %v6630_v11 = vpop.permute.xlu1 %1329  ;;  %2979 = vmatmul.mubr.bf16.gmra.mxu1 %v1012_v39  ;;  %9263 = vst [vmem:[#allocation85_spill] sm:$0xff] %v6644_v14  ;;  %v756_v15 = vrot.slane %v6644_v14, 7  ;;  %v6692_v8 = vmax.f32 %v621_v58, 0.0 }
 0x12d   : > { %9260 = vst [vmem:[#allocation82_spill] sm:$0xff] %v6630_v11  ;;  %1821 = vperm.xlu1 %5381, %v5664_v55   ;;  %v6639_v36 = vpop.permute.xlu0 %1341  ;;  %1653 = vperm.xlu0 %5396, %v6649_v29   ;;  %v983_v55 = vmul.f32 %v6121_v9, %v6634_v57  ;;  %v6672_v9 = vld [vmem:[%s8971_s1 + $0x38] sm:$0xff]  ;;  %v6713_v58 = vmax.f32 %v618_v62, 0.0  ;;  %v5501_v62 = vld [vmem:[%s8973_s3 + $0x110] sm:$0xff]  }
 0x12e   : > { %9262 = vst [vmem:[#allocation84_spill] sm:$0xff] %v6639_v36  ;;  %2986 = vmatprep.mubr.bf16.mxu1 %v1189_v34  ;;  %v757_v34 = vrot.slane %v6627_v46, 7  ;;  %5023 = vmatpush3.bf16.msra.mxu1 %v5495_v44  ;;  %v6684_v44 = vld [vmem:[%s8971_s1 + $0x50] sm:$0xff]  ;;  %v1161_v36 = vmul.f32 %v6295_v7, %v6644_v14  ;;  %9267 = vst [vmem:[#allocation89_spill] sm:$0xff] %v6692_v8  ;;  %v6702_v35 = vsel %vm786_vm1, %v755_v47, %v756_v15  ;;  %v5499_v7 = vld [vmem:[%s8973_s3 + $0x118] sm:$0xff]  }
 0x12f   : > { %5024 = vmatprep.subr.bf16.mxu1 %v5496_v63  ;;  %9270 = vst [vmem:[#allocation92_spill] sm:$0xff] %v6702_v35  ;;  %9272 = vst [vmem:[#allocation94_spill] sm:$0xff] %v6713_v58  ;;  %v6718_v47 = vld [vmem:[%s8971_s1 + $0x60] sm:$0xff] }
 0x130   : > { %v6660_v39 = vpop.permute.xlu1 %1337  ;;  %v1190_v3 = vpack.c.bf16 %v1162_v59, %v1161_v36  ;;  %v6698_v11 = vsel %vm786_vm1, %v756_v15, %v757_v34  ;;  %v5500_v36 = vld [vmem:[%s8973_s3 + $0x150] sm:$0xff]   ;;  %v629_v15 = vadd.f32 %v6384_v24, %v6358_v20 }
 0x131   : > { %9265 = vst [vmem:[#allocation87_spill] sm:$0xff] %v6660_v39  ;;  %1825 = vperm.xlu1 %5381, %v6672_v9   ;;  %v6675_v60 = vpop.permute.xlu0 %1349  ;;  %1661 = vperm.xlu0 %5396, %v6684_v44   ;;  %v1013_v39 = vpack.c.bf16 %v984_v48, %v983_v55  ;;  %9269 = vst [vmem:[#allocation91_spill] sm:$0xff] %v6698_v11  ;;  %v986_v59 = vmul.f32 %v6131_v19, %v6698_v11  ;;  %v5502_v19 = vld [vmem:[%s8973_s3 + $0x148] sm:$0xff]   ;;  %v6745_v20 = vld [vmem:[%s8971_s1 + $0x70] sm:$0xff] }
 0x132   : > { %9266 = vst [vmem:[#allocation88_spill] sm:$0xff] %v6675_v60  ;;  %v5498_v60 = vld [vmem:[%s8973_s3 + $0x158] sm:$0xff]   ;;  %5025 = vmatpush3.bf16.msra.mxu1 %v5497_v25  ;;  %v1164_v48 = vmul.f32 %v6306_v12, %v6692_v8  ;;  %v1163_v12 = vmul.f32 %v6303_v37, %v6713_v58  ;;  %v5503_v37 = vld [vmem:[%s8973_s3 + $0x108] sm:$0xff]  }
 0x133   : > { %5026 = vmatprep.subr.bf16.mxu1 %v5498_v60  ;;  %v758_v60 = vrot.slane %v6713_v58, 7 }
 0x134   : > { %v6694_v63 = vpop.permute.xlu1 %1345  ;;  %2987 = vmatmul.mubr.bf16.gmra.mxu1 %v1013_v39  ;;  %v985_v39 = vmul.f32 %v6133_v21, %v6702_v35  ;;  %v626_v21 = vadd.f32 %v6384_v24, %v6348_v17 }
 0x135   : > { %9268 = vst [vmem:[#allocation90_spill] sm:$0xff] %v6694_v63  ;;  %5382 = vset.pattern.permute.xlu1 %v9244_v22  ;;  %v6708_v55 = vpop.permute.xlu0 %1357  ;;  %1669 = vperm.xlu0 %5396, %v6718_v47  }
 0x136   : > { %9271 = vst [vmem:[#allocation93_spill] sm:$0xff] %v6708_v55  ;;  %2994 = vmatprep.mubr.bf16.mxu1 %v1190_v3  ;;  %1649 = vperm.xlu1 %5382, %v6672_v9   ;;  %v1191_v55 = vpack.c.bf16 %v1164_v48, %v1163_v12 }
 0x137   : > { %5027 = vmatpush3.bf16.msra.mxu1 %v5499_v7  ;;  %v759_v7 = vrot.slane %v6692_v8, 7 }
 0x138   : > { %v6728_v25 = vpop.permute.xlu1 %1353  ;;  %5028 = vmatprep.subr.bf16.mxu1 %v5500_v36  ;;  %v1014_v36 = vpack.c.bf16 %v986_v59, %v985_v39  ;;  %v5504_v39 = vld [vmem:[%s8973_s3 + $0x140] sm:$0xff]   ;;  %v6770_v59 = vmax.f32 %v626_v21, 0.0 }
 0x139   : > { %9273 = vst [vmem:[#allocation95_spill] sm:$0xff] %v6728_v25  ;;  %v6735_v3 = vpop.permute.xlu0 %1365  ;;  %1677 = vperm.xlu0 %5396, %v6745_v20   ;;  %v6760_v25 = vsel %vm786_vm1, %v757_v34, %v758_v60  ;;  %v6775_v34 = vld [vmem:[%s8971_s1 + $0x88] sm:$0xff] }
 0x13a   : > { %9274 = vst [vmem:[#allocation96_spill] sm:$0xff] %v6735_v3  ;;  %5383 = vset.pattern.permute.xlu1 %v9223_v32  ;;  %v6753_v3 = vmax.f32 %v629_v15, 0.0  ;;  %9277 = vst [vmem:[#allocation99_spill] sm:$0xff] %v6760_v25  ;;  %v6780_v15 = vsel %vm786_vm1, %v758_v60, %v759_v7  ;;  %v987_v48 = vmul.f32 %v6145_v33, %v6760_v25  ;;  %v760_v12 = vrot.slane %v6770_v59, 7  ;;  %v5505_v60 = vld [vmem:[%s8973_s3 + $0x100] sm:$0xff]  }
 0x13b   : > { %1829 = vperm.xlu1 %5383, %v6649_v29   ;;  %5029 = vmatpush3.bf16.msra.mxu1 %v5501_v62  ;;  %9279 = vst [vmem:[#allocation101_spill] sm:$0xff] %v6770_v59  ;;  %9280 = vst [vmem:[#allocation102_spill] sm:$0xff] %v6780_v15  ;;  %v5671_v62 = vld [vmem:[%s8971_s1 + $0x48] sm:$0xff]  ;;  %v637_v33 = vadd.f32 %v6351_v54, %v6384_v24 }
 0x13c   : > { %9275 = vst [vmem:[#allocation97_spill] sm:$0xff] %v6753_v3  ;;  %v6756_v17 = vpop.permute.xlu1 %1361  ;;  %2995 = vmatmul.mubr.bf16.gmra.mxu1 %v1014_v36  ;;  %5030 = vmatprep.subr.bf16.mxu1 %v5502_v19  ;;  %v1166_v21 = vmul.f32 %v6316_v1, %v6753_v3  ;;  %v5672_v1 = vld [vmem:[%s8971_s1 + $0xa0] sm:$0xff] }
 0x13d   : > { %9276 = vst [vmem:[#allocation98_spill] sm:$0xff] %v6756_v17  ;;  %v6765_v63 = vpop.permute.xlu0 %1373  ;;  %1689 = vperm.xlu0 %5396, %v6775_v34   ;;  %3002 = vmatprep.mubr.bf16.mxu1 %v1191_v55  ;;  %v761_v55 = vrot.slane %v6753_v3, 7 }
 0x13e   : > { %9278 = vst [vmem:[#allocation100_spill] sm:$0xff] %v6765_v63  ;;  %v988_v63 = vmul.f32 %v6143_v31, %v6780_v15 }
 0x13f   : > { %1833 = vperm.xlu1 %5383, %v5671_v62   ;;  %5031 = vmatpush3.bf16.msra.mxu1 %v5503_v37  ;;  %v1165_v37 = vmul.f32 %v6313_v2, %v6770_v59  ;;  %v6814_v31 = vsel %vm786_vm1, %v760_v12, %v761_v55  ;;  %v6827_v2 = vld [vmem:[%s8971_s1 + $0xb8] sm:$0xff] }
 0x140   : > { %v6787_v19 = vpop.permute.xlu1 %1369  ;;  %5032 = vmatprep.subr.bf16.mxu1 %v5504_v39  ;;  %v1015_v17 = vpack.c.bf16 %v988_v63, %v987_v48  ;;  %9284 = vst [vmem:[#allocation106_spill] sm:$0xff] %v6814_v31  ;;  %v6818_v39 = vsel %vm786_vm1, %v759_v7, %v760_v12  ;;  %9288 = vst [vmem:[#allocation110_spill] sm:$0xff] %v6827_v2  ;;  %v645_v7 = vadd.f32 %v6384_v24, %v6378_v26  ;;  %v5674_v26 = vld [vmem:[%s8971_s1 + $0xd0] sm:$0xff] }
 0x141   : > { %9281 = vst [vmem:[#allocation103_spill] sm:$0xff] %v6787_v19  ;;  %v6798_v36 = vpop.permute.xlu0 %1381  ;;  %1701 = vperm.xlu0 %5396, %v5672_v1   ;;  %v634_v19 = vadd.f32 %v6341_v56, %v6384_v24  ;;  %9285 = vst [vmem:[#allocation107_spill] sm:$0xff] %v6818_v39  ;;  %v6820_v1 = vmax.f32 %v637_v33, 0.0  ;;  %v989_v48 = vmul.f32 %v6157_v45, %v6818_v39 }
 0x142   : > { %9282 = vst [vmem:[#allocation104_spill] sm:$0xff] %v6798_v36  ;;  %v1192_v36 = vpack.c.bf16 %v1166_v21, %v1165_v37  ;;  %v9291_v21 = vmov 3   ;;  %v6852_v33 = vmax.f32 %v645_v7, 0.0  ;;  %v653_v7 = vadd.f32 %v6371_v16, %v6384_v24 }
 0x143   : > { %5384 = vset.pattern.permute.xlu1 %v9244_v22  ;;  %5033 = vmatpush3.bf16.msra.mxu1 %v5505_v60  ;;  %9286 = vst [vmem:[#allocation108_spill] sm:$0xff] %v6820_v1  ;;  %v6830_v63 = vmax.f32 %v634_v19, 0.0  ;;  %v1168_v12 = vmul.f32 %v6326_v5, %v6820_v1  ;;  %v642_v19 = vadd.f32 %v6384_v24, %v6368_v23  ;;  %v763_v60 = vrot.slane %v6820_v1, 7 }
 0x144   : > { %v6810_v54 = vpop.permute.xlu1 %1377  ;;  %1657 = vperm.xlu1 %5384, %v5671_v62   ;;  %3003 = vmatmul.mubr.bf16.gmra.mxu1 %v1015_v17  ;;  %v990_v17 = vmul.f32 %v6155_v43, %v6814_v31  ;;  %9293 = vst [vmem:[#allocation114_spill] sm:$0xff] %v6852_v33  ;;  %v1234_v23 = vrot.slane %v6500_v49, 1 }
 0x145   : > { %9283 = vst [vmem:[#allocation105_spill] sm:$0xff] %v6810_v54  ;;  %v6822_v56 = vpop.permute.xlu0 %1389  ;;  %1713 = vperm.xlu0 %5396, %v6827_v2   ;;  %3010 = vmatprep.mubr.bf16.mxu1 %v1192_v36  ;;  %9289 = vst [vmem:[#allocation111_spill] sm:$0xff] %v6830_v63  ;;  %v762_v43 = vrot.slane %v6830_v63, 7  ;;  %v1167_v5 = vmul.f32 %v6323_v6, %v6830_v63  ;;  %v6872_v6 = vld [vmem:[%s8971_s1 + $0xe8] sm:$0xff] }
 0x146   : > { %9287 = vst [vmem:[#allocation109_spill] sm:$0xff] %v6822_v56  ;;  %v1016_v36 = vpack.c.bf16 %v990_v17, %v989_v48  ;;  %v1203_v48 = vrot.slane %v6520_v50, 1  ;;  %9297 = vst [vmem:[#allocation118_spill] sm:$0xff] %v6872_v6 }
 0x147   : > { %v6861_v56 = vsel %vm786_vm1, %v761_v55, %v762_v43  ;;  %v6879_v17 = vsel %vm786_vm1, %v762_v43, %v763_v60 }
 0x148   : > { %v6838_v62 = vpop.permute.xlu1 %1385  ;;  %5385 = vset.pattern.permute.xlu1 %v9291_v21  ;;  %9295 = vst [vmem:[#allocation116_spill] sm:$0xff] %v6861_v56  ;;  %9299 = vst [vmem:[#allocation120_spill] sm:$0xff] %v6879_v17  ;;  %v991_v16 = vmul.f32 %v6169_v53, %v6861_v56  ;;  %v650_v53 = vadd.f32 %v6361_v13, %v6384_v24  ;;  %v6918_v13 = vld [vmem:[%s8971_s1 + $0x80] sm:$0xff] }
 0x149   : > { %9290 = vst [vmem:[#allocation112_spill] sm:$0xff] %v6838_v62  ;;  %1549 = vperm.xlu1 %5385, %v5674_v26   ;;  %1725 = vperm.xlu0 %5396, %v5674_v26   ;;  %v6848_v45 = vpop.permute.xlu0 %1797  ;;  %v1193_v26 = vpack.c.bf16 %v1168_v12, %v1167_v5  ;;  %v6863_v62 = vmax.f32 %v642_v19, 0.0  ;;  %v1170_v12 = vmul.f32 %v6336_v61, %v6852_v33  ;;  %v9300_v19 = vrot.slane %v6479_v28, 1  ;;  %v9303_v61 = vld [vmem:[#allocation4_spill] sm:$0xff] }
 0x14a   : > { %9292 = vst [vmem:[#allocation113_spill] sm:$0xff] %v6848_v45  ;;  %v6894_v5 = vsel %vm1235_vm2, %v1234_v23, %v1203_v48  ;;  %v6902_v28 = vmax.f32 %v653_v7, 0.0  ;;  %9307 = vst [vmem:[#allocation123_spill] sm:$0xff] %v6918_v13 }
 0x14b   : > { %9296 = vst [vmem:[#allocation117_spill] sm:$0xff] %v6863_v62  ;;  %9302 = vst [vmem:[#allocation122_spill] sm:$0xff] %v6894_v5  ;;  %v764_v43 = vrot.slane %v6863_v62, 7 }
 0x14c   : > { %v6856_v37 = vpop.permute.xlu1 %1393  ;;  %3011 = vmatmul.mubr.bf16.gmra.mxu1 %v1016_v36  ;;  %v6890_v36 = vsel %vm1235_vm2, %v9300_v19, %v1234_v23  ;;  %9304 = vst [vmem:[#allocation4_spill] sm:$0xff] %v6902_v28  ;;  %v9305_v23 = vld [vmem:[#allocation23_spill] sm:$0xff] }
 0x14d   : > { %9294 = vst [vmem:[#allocation115_spill] sm:$0xff] %v6856_v37  ;;  %5386 = vset.pattern.permute.xlu1 %v9223_v32  ;;  %1737 = vperm.xlu0 %5396, %v6872_v6   ;;  %v6875_v55 = vpop.permute.xlu0 %1813  ;;  %9301 = vst [vmem:[#allocation121_spill] sm:$0xff] %v6890_v36  ;;  %v992_v37 = vmul.f32 %v9303_v61, %v6879_v17  ;;  %v1169_v54 = vmul.f32 %v9305_v23, %v6863_v62  ;;  %v9308_v23 = vld [vmem:[#allocation49_spill] sm:$0xff] }
 0x14e   : > { %9298 = vst [vmem:[#allocation119_spill] sm:$0xff] %v6875_v55  ;;  %3018 = vmatprep.mubr.bf16.mxu1 %v1193_v26  ;;  %1837 = vperm.xlu1 %5386, %v6684_v44   ;;  %v765_v26 = vrot.slane %v6852_v33, 7  ;;  %v6912_v55 = vld [vmem:[%s8971_s1 + $0x58] sm:$0xff]  ;;  %v1396_v61 = vmul.f32 %v6442_v38, %v6890_v36  ;;  %v1397_v6 = vmul.f32 %v9308_v23, %v6894_v5 }
 0x14f   : > { %9306 = vst [vmem:[#allocation23_spill] sm:$0xff] %v6912_v55  ;;  %v1017_v7 = vpack.c.bf16 %v992_v37, %v991_v16  ;;  %v1194_v50 = vpack.c.bf16 %v1170_v12, %v1169_v54  ;;  %v6932_v45 = vsel %vm786_vm1, %v763_v60, %v764_v43  ;;  %v1204_v37 = vrot.slane %v6506_v40, 1  ;;  %v9312_v16 = vld [vmem:[#allocation39_spill] sm:$0xff]  ;;  %v9313_v12 = vld [vmem:[#allocation25_spill] sm:$0xff] }
 0x150   : > { %v6928_v2 = vsel %vm786_vm1, %v764_v43, %v765_v26  ;;  %9310 = vst [vmem:[#allocation124_spill] sm:$0xff] %v6932_v45  ;;  %v661_v23 = vadd.f32 %v6384_v24, %v9312_v16  ;;  %v6946_v60 = vld [vmem:[%s8971_s1 + $0x98] sm:$0xff] }
 0x151   : > { %v1450_v49 = vpop.permute.xlu1 %1449  ;;  %5424 = vset.pattern.permute.xlu0 %v9223_v32  ;;  %9309 = vst [vmem:[#allocation49_spill] sm:$0xff] %v6928_v2  ;;  %9314 = vst [vmem:[#allocation39_spill] sm:$0xff] %v6946_v60 }
 0x152   : > { %v1573_v19 = vmul.f32 %v1450_v49, %v6591_v27  ;;  %1841 = vperm.xlu1 %5386, %v6912_v55   ;;  %1861 = vperm.xlu0 %5424, %v6918_v13   ;;  %v1446_v49 = vpop.permute.xlu0 %1445  ;;  %v6934_v13 = vmax.f32 %v650_v53, 0.0  ;;  %v1428_v53 = vpack.c.bf16 %v1397_v6, %v1396_v61  ;;  %v9319_v61 = vld [vmem:[#allocation24_spill] sm:$0xff] }
 0x153   : > { %v1572_v27 = vmul.f32 %v1446_v49, %v6576_v51  ;;  %v1172_v49 = vmul.f32 %v9313_v12, %v6902_v28  ;;  %v1206_v51 = vrot.slane %v6570_v4, 1  ;;  %v9325_v4 = vld [vmem:[#allocation35_spill] sm:$0xff] }
 0x154   : > { %9311 = vst [vmem:[#allocation125_spill] sm:$0xff] %v6934_v13  ;;  %3019 = vmatmul.mubr.bf16.gmra.mxu1 %v1017_v7  ;;  %v9315_v7 = vld [vmem:[#allocation6_spill] sm:$0xff]  ;;  %v6989_v40 = vmax.f32 %v9325_v4, 0.0  ;;  %v9330_v4 = vrot.slane %v6586_v41, 1 }
 0x155   : > { %v1454_v38 = vpop.permute.xlu1 %1453  ;;  %v1604_v36 = vpack.c.bf16 %v1573_v19, %v1572_v27  ;;  %3026 = vmatprep.mubr.bf16.mxu1 %v1194_v50  ;;  %v993_v27 = vmul.f32 %v9315_v7, %v6932_v45  ;;  %v9316_v19 = vld [vmem:[#allocation5_spill] sm:$0xff]  ;;  %v1171_v7 = vmul.f32 %v9319_v61, %v6934_v13 }
 0x156   : > { %v1574_v54 = vmul.f32 %v1454_v38, %v6634_v57  ;;  %5387 = vset.pattern.permute.xlu1 %v9244_v22  ;;  %1873 = vperm.xlu0 %5424, %v6946_v60   ;;  %v1458_v43 = vpop.permute.xlu0 %1457  ;;  %v994_v50 = vmul.f32 %v9316_v19, %v6928_v2  ;;  %v9317_v38 = vrot.slane %v6586_v41, 1  ;;  %v6966_v19 = vsel %vm1235_vm2, %v1203_v48, %v1204_v37 }
 0x157   : > { %v1575_v12 = vmul.f32 %v1458_v43, %v6654_v0  ;;  %1665 = vperm.xlu1 %5387, %v6912_v55   ;;  %3131 = vmatprep.mubr.bf16.mxu0 %v1604_v36  ;;  %9320 = vst [vmem:[#allocation6_spill] sm:$0xff] %v6966_v19  ;;  %v767_v57 = vrot.slane %v6902_v28, 7  ;;  %v6970_v43 = vmax.f32 %v661_v23, 0.0  ;;  %v9322_v36 = vld [vmem:[#allocation56_spill] sm:$0xff]  ;;  %9326 = vst [vmem:[#allocation35_spill] sm:$0xff] %v6989_v40 }
 0x158   : > { %v6957_v16 = vsel %vm1235_vm2, %v1204_v37, %v9317_v38  ;;  %3132 = vmatmul.mubr.bf16.vlgmr.msra.gmra.mxu0 %v1428_v53  ;;  %v766_v38 = vrot.slane %v6934_v13, 7  ;;  %v6977_v53 = vld [vmem:[%s8971_s1 + $0xb0] sm:$0xff]  ;;  %v1018_v48 = vpack.c.bf16 %v994_v50, %v993_v27  ;;  %v1195_v37 = vpack.c.bf16 %v1172_v49, %v1171_v7  ;;  %v6996_v49 = vld [vmem:[%s8971_s1 + $0xe0] sm:$0xff]  ;;  %v7012_v7 = vld [vmem:[%s8971_s1 + $0xc8] sm:$0xff] }
 0x159   : > { %9318 = vst [vmem:[#allocation25_spill] sm:$0xff] %v6957_v16  ;;  %v1462_v6 = vpop.permute.xlu1 %1461  ;;  %v1605_v5 = vpack.c.bf16 %v1575_v12, %v1574_v54  ;;  %9321 = vst [vmem:[#allocation5_spill] sm:$0xff] %v6970_v43  ;;  %v1399_v0 = vmul.f32 %v9322_v36, %v6957_v16  ;;  %v1207_v54 = vrot.slane %v6644_v14, 1  ;;  %v9336_v14 = vld [vmem:[#allocation7_spill] sm:$0xff]  ;;  %v9341_v16 = vld [vmem:[#allocation60_spill] sm:$0xff] }
 0x15a   : > { %9323 = vst [vmem:[#allocation24_spill] sm:$0xff] %v6977_v53  ;;  %1885 = vperm.xlu0 %5424, %v6977_v53   ;;  %v1466_v61 = vpop.permute.xlu0 %1465  ;;  %v1576_v12 = vmul.f32 %v1462_v6, %v6702_v35  ;;  %v6986_v36 = vsel %vm786_vm1, %v765_v26, %v766_v38  ;;  %v9327_v53 = vld [vmem:[#allocation53_spill] sm:$0xff]  ;;  %v7007_v26 = vsel %vm1235_vm2, %v9330_v4, %v1206_v51  ;;  %9332 = vst [vmem:[#allocation128_spill] sm:$0xff] %v7012_v7 }
 0x15b   : > { %v1577_v23 = vmul.f32 %v1466_v61, %v6698_v11  ;;  %5388 = vset.pattern.permute.xlu1 %v9291_v21  ;;  %3139 = vmatprep.mubr.bf16.mxu0 %v1605_v5  ;;  %9324 = vst [vmem:[#allocation56_spill] sm:$0xff] %v6986_v36  ;;  %v1398_v27 = vmul.f32 %v9327_v53, %v6966_v19  ;;  %9328 = vst [vmem:[#allocation53_spill] sm:$0xff] %v6996_v49  ;;  %v9333_v61 = vld [vmem:[#allocation8_spill] sm:$0xff] }
 0x15c   : > { %1557 = vperm.xlu1 %5388, %v6996_v49   ;;  %3027 = vmatmul.mubr.bf16.gmra.mxu1 %v1018_v48  ;;  %v7001_v5 = vsel %vm786_vm1, %v766_v38, %v767_v57  ;;  %9331 = vst [vmem:[#allocation127_spill] sm:$0xff] %v7007_v26  ;;  %v995_v48 = vmul.f32 %v9333_v61, %v6986_v36  ;;  %v9334_v38 = vld [vmem:[#allocation27_spill] sm:$0xff]  ;;  %v9337_v61 = vld [vmem:[#allocation26_spill] sm:$0xff] }
 0x15d   : > { %v1470_v50 = vpop.permute.xlu1 %1469  ;;  %3034 = vmatprep.mubr.bf16.mxu1 %v1195_v37  ;;  %9329 = vst [vmem:[#allocation126_spill] sm:$0xff] %v7001_v5  ;;  %v1429_v6 = vpack.c.bf16 %v1399_v0, %v1398_v27  ;;  %v1174_v37 = vmul.f32 %v9334_v38, %v6970_v43  ;;  %v7021_v11 = vsel %vm1235_vm2, %v1206_v51, %v1207_v54  ;;  %v768_v0 = vrot.slane %v6989_v40, 7  ;;  %v9338_v38 = vld [vmem:[#allocation37_spill] sm:$0xff] }
 0x15e   : > { %1897 = vperm.xlu0 %5424, %v7012_v7   ;;  %v1474_v53 = vpop.permute.xlu0 %1473  ;;  %9335 = vst [vmem:[#allocation8_spill] sm:$0xff] %v7021_v11  ;;  %v1606_v4 = vpack.c.bf16 %v1577_v23, %v1576_v12  ;;  %v769_v27 = vrot.slane %v6970_v43, 7  ;;  %v996_v41 = vmul.f32 %v9336_v14, %v7001_v5  ;;  %v1173_v7 = vmul.f32 %v9337_v61, %v6989_v40  ;;  %v9340_v23 = vld [vmem:[#allocation55_spill] sm:$0xff] }
 0x15f   : > { %v7031_v60 = vmax.f32 %v9338_v38, 0.0  ;;  %v1208_v51 = vrot.slane %v6627_v46, 1  ;;  %v1209_v12 = vrot.slane %v6713_v58, 1  ;;  %v1401_v19 = vmul.f32 %v9341_v16, %v7021_v11  ;;  %v9344_v16 = vld [vmem:[#allocation33_spill] sm:$0xff] }
 0x160   : > { %5389 = vset.pattern.permute.xlu1 %v9223_v32  ;;  %3140 = vmatmul.mubr.bf16.gmra.mxu0 %v1429_v6  ;;  %v1400_v6 = vmul.f32 %v9340_v23, %v7007_v26  ;;  %v1019_v61 = vpack.c.bf16 %v996_v41, %v995_v48  ;;  %v1196_v43 = vpack.c.bf16 %v1174_v37, %v1173_v7  ;;  %v7054_v23 = vmax.f32 %v9344_v16, 0.0  ;;  %v9346_v41 = vld [vmem:[#allocation47_spill] sm:$0xff]  ;;  %v9350_v16 = vld [vmem:[#allocation9_spill] sm:$0xff] }
 0x161   : > { %v1478_v35 = vpop.permute.xlu1 %1477  ;;  %9339 = vst [vmem:[#allocation27_spill] sm:$0xff] %v7031_v60  ;;  %1845 = vperm.xlu1 %5389, %v6718_v47   ;;  %3147 = vmatprep.mubr.bf16.mxu0 %v1606_v4  ;;  %v1578_v38 = vmul.f32 %v1470_v50, %v6760_v25  ;;  %v1579_v46 = vmul.f32 %v1474_v53, %v6780_v15  ;;  %v7061_v50 = vld [vmem:[%s8971_s1 + $0x68] sm:$0xff]  ;;  %v7071_v48 = vld [vmem:[%s8971_s1 + $0xf8] sm:$0xff]  ;;  %v1210_v25 = vrot.slane %v6692_v8, 1  ;;  %v9057_v26 = vmov 6  }
 0x162   : > { %1909 = vperm.xlu0 %5424, %v6996_v49   ;;  %v1482_v14 = vpop.permute.xlu0 %1481  ;;  %v7045_v58 = vsel %vm786_vm1, %v768_v0, %v769_v27  ;;  %v7049_v47 = vsel %vm786_vm1, %v767_v57, %v768_v0  ;;  %9345 = vst [vmem:[#allocation37_spill] sm:$0xff] %v7054_v23  ;;  %v677_v7 = vadd.f32 %v6384_v24, %v9346_v41  ;;  %9348 = vst [vmem:[#allocation60_spill] sm:$0xff] %v7071_v48  ;;  %v9349_v0 = vld [vmem:[#allocation10_spill] sm:$0xff]  ;;  %v9356_v15 = vld [vmem:[#allocation57_spill] sm:$0xff] }
 0x163   : > { %9342 = vst [vmem:[#allocation7_spill] sm:$0xff] %v7045_v58  ;;  %9343 = vst [vmem:[#allocation26_spill] sm:$0xff] %v7049_v47  ;;  %v7066_v57 = vsel %vm1235_vm2, %v1207_v54, %v1208_v51  ;;  %v1430_v53 = vpack.c.bf16 %v1401_v19, %v1400_v6  ;;  %v7082_v54 = vsel %vm1235_vm2, %v1208_v51, %v1209_v12  ;;  %v9352_v6 = vld [vmem:[#allocation29_spill] sm:$0xff]  ;;  %v9357_v8 = vld [vmem:[#allocation66_spill] sm:$0xff] }
 0x164   : > { %3035 = vmatmul.mubr.bf16.gmra.mxu1 %v1019_v61  ;;  %9347 = vst [vmem:[#allocation55_spill] sm:$0xff] %v7066_v57  ;;  %v997_v61 = vmul.f32 %v9349_v0, %v7049_v47  ;;  %9351 = vst [vmem:[#allocation33_spill] sm:$0xff] %v7082_v54  ;;  %v1607_v19 = vpack.c.bf16 %v1579_v46, %v1578_v38  ;;  %v1176_v41 = vmul.f32 %v9352_v6, %v7031_v60  ;;  %v9353_v0 = vld [vmem:[#allocation28_spill] sm:$0xff] }
 0x165   : > { %v7051_v4 = vpop.permute.xlu1 %1485  ;;  %1849 = vperm.xlu1 %5389, %v7061_v50   ;;  %3042 = vmatprep.mubr.bf16.mxu1 %v1196_v43  ;;  %v998_v43 = vmul.f32 %v9350_v16, %v7045_v58  ;;  %v1175_v51 = vmul.f32 %v9353_v0, %v7054_v23  ;;  %v770_v46 = vrot.slane %v7054_v23, 7  ;;  %v771_v38 = vrot.slane %v7031_v60, 7  ;;  %v9354_v16 = vld [vmem:[#allocation43_spill] sm:$0xff] }
 0x166   : > { %1921 = vperm.xlu0 %5424, %v7071_v48   ;;  %v7074_v37 = vpop.permute.xlu0 %1489  ;;  %v7090_v48 = vmax.f32 %v677_v7, 0.0  ;;  %v7098_v6 = vmax.f32 %v9354_v16, 0.0  ;;  %v1403_v7 = vmul.f32 %v9357_v8, %v7082_v54  ;;  %v1580_v11 = vmul.f32 %v1478_v35, %v6818_v39  ;;  %v9366_v39 = vld [vmem:[#allocation11_spill] sm:$0xff] }
 0x167   : > { %v1020_v0 = vpack.c.bf16 %v998_v43, %v997_v61  ;;  %v1581_v60 = vmul.f32 %v1482_v14, %v6814_v31  ;;  %v1197_v16 = vpack.c.bf16 %v1176_v41, %v1175_v51  ;;  %v9360_v61 = vld [vmem:[#allocation31_spill] sm:$0xff]  ;;  %v7125_v14 = vsel %vm1235_vm2, %v1209_v12, %v1210_v25  ;;  %v9362_v43 = vld [vmem:[#allocation12_spill] sm:$0xff] }
 0x168   : > { %3148 = vmatmul.mubr.bf16.gmra.mxu0 %v1430_v53  ;;  %9355 = vst [vmem:[#allocation47_spill] sm:$0xff] %v7098_v6  ;;  %v1402_v53 = vmul.f32 %v9356_v15, %v7066_v57  ;;  %v7113_v15 = vsel %vm786_vm1, %v769_v27, %v770_v46  ;;  %v1178_v35 = vmul.f32 %v9360_v61, %v7090_v48  ;;  %9361 = vst [vmem:[#allocation29_spill] sm:$0xff] %v7125_v14 }
 0x169   : > { %v7088_v49 = vpop.permute.xlu1 %1493  ;;  %5390 = vset.pattern.permute.xlu1 %v9244_v22  ;;  %3155 = vmatprep.mubr.bf16.mxu0 %v1607_v19  ;;  %9358 = vst [vmem:[#allocation10_spill] sm:$0xff] %v7113_v15  ;;  %v999_v41 = vmul.f32 %v9362_v43, %v7113_v15  ;;  %v772_v51 = vrot.slane %v7098_v6, 7  ;;  %v9363_v12 = vrot.slane %v6770_v59, 1 }
 0x16a   : > { %1673 = vperm.xlu1 %5390, %v7061_v50   ;;  %5428 = vset.pattern.permute.xlu0 %v9057_v26  ;;  %v7106_v19 = vpop.permute.xlu0 %1497  ;;  %v7119_v26 = vsel %vm786_vm1, %v770_v46, %v771_v38  ;;  %v5506_v46 = vld [vmem:[%s8973_s3 + $0x1f8] sm:$0xff]  }
 0x16b   : > { %1981 = vperm.xlu0 %5428, %v6474_v42   ;;  %9359 = vst [vmem:[#allocation9_spill] sm:$0xff] %v7119_v26  ;;  %v1431_v42 = vpack.c.bf16 %v1403_v7, %v1402_v53  ;;  %v1608_v53 = vpack.c.bf16 %v1581_v60, %v1580_v11  ;;  %v5684_v7 = vld [vmem:[%s8971_s1 + $0xf0] sm:$0xff]  ;;  %5130 = vmatprep.subr.bf16.mxu0 %v5506_v46  ;;  %v1212_v11 = vrot.slane %v6753_v3, 1 }
 0x16c   : > { %3043 = vmatmul.mubr.bf16.gmra.mxu1 %v1020_v0  ;;  %v5507_v0 = vld [vmem:[%s8973_s3 + $0x1b8] sm:$0xff]   ;;  %v5508_v46 = vld [vmem:[%s8973_s3 + $0x1f0] sm:$0xff]  }
 0x16d   : > { %v7115_v8 = vpop.permute.xlu1 %1501  ;;  %3050 = vmatprep.mubr.bf16.mxu1 %v1197_v16  ;;  %v9365_v16 = vld [vmem:[#allocation30_spill] sm:$0xff]  ;;  %5131 = vmatpush3.bf16.msra.mxu0 %v5507_v0  ;;  %v9369_v0 = vld [vmem:[#allocation45_spill] sm:$0xff] }
 0x16e   : > { %5391 = vset.pattern.permute.xlu1 %v9291_v21  ;;  %v7128_v27 = vpop.permute.xlu0 %1505  ;;  %v7143_v21 = vsel %vm1235_vm2, %v1210_v25, %v9363_v12  ;;  %v1177_v61 = vmul.f32 %v9365_v16, %v7098_v6  ;;  %v1000_v25 = vmul.f32 %v9366_v39, %v7119_v26  ;;  %v7166_v39 = vsel %vm786_vm1, %v771_v38, %v772_v51 }
 0x16f   : > { %9364 = vst [vmem:[#allocation28_spill] sm:$0xff] %v7143_v21  ;;  %1565 = vperm.xlu1 %5391, %v5684_v7   ;;  %1993 = vperm.xlu0 %5428, %v6567_v18   ;;  %v9367_v18 = vld [vmem:[#allocation62_spill] sm:$0xff]  ;;  %v1405_v16 = vmul.f32 %v6534_v52, %v7143_v21  ;;  %9368 = vst [vmem:[#allocation43_spill] sm:$0xff] %v7166_v39  ;;  %v1582_v52 = vmul.f32 %v7051_v4, %v6861_v56  ;;  %v9370_v38 = vrot.slane %v7090_v48, 7 }
 0x170   : > { %3156 = vmatmul.mubr.bf16.gmra.mxu0 %v1431_v42  ;;  %v1198_v12 = vpack.c.bf16 %v1178_v35, %v1177_v61  ;;  %v1404_v7 = vmul.f32 %v9367_v18, %v7125_v14  ;;  %v1021_v43 = vpack.c.bf16 %v1000_v25, %v999_v41  ;;  %v5509_v35 = vld [vmem:[%s8973_s3 + $0x1b0] sm:$0xff]   ;;  %v1583_v41 = vmul.f32 %v7074_v37, %v6879_v17 }
 0x171   : > { %v7152_v31 = vpop.permute.xlu1 %1509  ;;  %3163 = vmatprep.mubr.bf16.mxu0 %v1608_v53  ;;  %v7175_v53 = vmax.f32 %v9369_v0, 0.0  ;;  %v7187_v61 = vsel %vm786_vm1, %v772_v51, %v9370_v38  ;;  %v9372_v18 = vld [vmem:[#allocation41_spill] sm:$0xff]  ;;  %5132 = vmatprep.subr.bf16.mxu0 %v5508_v46  ;;  %v9373_v37 = vld [vmem:[#allocation54_spill] sm:$0xff] }
 0x172   : > { %v7162_v42 = vpop.permute.xlu0 %1513  ;;  %9371 = vst [vmem:[#allocation57_spill] sm:$0xff] %v7187_v61  ;;  %v7193_v4 = vmax.f32 %v9372_v18, 0.0  ;;  %v693_v0 = vadd.f32 %v6384_v24, %v9373_v37  ;;  %v9374_v17 = vld [vmem:[#allocation14_spill] sm:$0xff]  ;;  %v9375_v38 = vld [vmem:[#allocation13_spill] sm:$0xff]  ;;  %5133 = vmatpush3.bf16.msra.mxu0 %v5509_v35  ;;  %v9376_v24 = vrot.slane %v6770_v59, 1  ;;  %v1609_v46 = vpack.c.bf16 %v1583_v41, %v1582_v52  ;;  %v9382_v41 = vld [vmem:[#allocation32_spill] sm:$0xff] }
 0x173   : > { %5392 = vset.pattern.permute.xlu1 %v9223_v32  ;;  %2005 = vperm.xlu0 %5428, %v6649_v29   ;;  %v1432_v29 = vpack.c.bf16 %v1405_v16, %v1404_v7  ;;  %v1001_v51 = vmul.f32 %v9374_v17, %v7166_v39  ;;  %v1002_v56 = vmul.f32 %v9375_v38, %v7187_v61  ;;  %v9378_v17 = vrot.slane %v6830_v63, 1  ;;  %v9380_v35 = vld [vmem:[#allocation34_spill] sm:$0xff] }
 0x174   : > { %1853 = vperm.xlu1 %5392, %v6745_v20   ;;  %3051 = vmatmul.mubr.bf16.gmra.mxu1 %v1021_v43  ;;  %v5510_v43 = vld [vmem:[%s8973_s3 + $0x1e8] sm:$0xff]   ;;  %v7213_v7 = vsel %vm1235_vm2, %v9376_v24, %v1212_v11  ;;  %v1180_v18 = vmul.f32 %v9380_v35, %v7175_v53  ;;  %v1214_v37 = vrot.slane %v6820_v1, 1  ;;  %v7228_v38 = vld [vmem:[%s8971_s1 + $0x78] sm:$0xff]  ;;  %v774_v52 = vrot.slane %v7193_v4, 7 }
 0x175   : > { %v7190_v25 = vpop.permute.xlu1 %1517  ;;  %3058 = vmatprep.mubr.bf16.mxu1 %v1198_v12  ;;  %v5511_v12 = vld [vmem:[%s8973_s3 + $0x1a8] sm:$0xff]   ;;  %9377 = vst [vmem:[#allocation66_spill] sm:$0xff] %v7213_v7  ;;  %v7219_v16 = vsel %vm1235_vm2, %v1212_v11, %v9378_v17  ;;  %9381 = vst [vmem:[#allocation12_spill] sm:$0xff] %v7228_v38  ;;  %v1179_v17 = vmul.f32 %v9382_v41, %v7193_v4  ;;  %v775_v35 = vrot.slane %v7175_v53, 7  ;;  %5134 = vmatprep.subr.bf16.mxu0 %v5510_v43  ;;  %v9387_v43 = vld [vmem:[#allocation50_spill] sm:$0xff] }
 0x176   : > { %v7197_v60 = vpop.permute.xlu0 %1521  ;;  %9379 = vst [vmem:[#allocation31_spill] sm:$0xff] %v7219_v16  ;;  %v7238_v1 = vmax.f32 %v693_v0, 0.0  ;;  %v1022_v11 = vpack.c.bf16 %v1002_v56, %v1001_v51  ;;  %5135 = vmatpush3.bf16.msra.mxu0 %v5511_v12  ;;  %v1584_v41 = vmul.f32 %v7088_v49, %v6932_v45  ;;  %v1585_v0 = vmul.f32 %v7106_v19, %v6928_v2  ;;  %v5513_v51 = vld [vmem:[%s8973_s3 + $0x1a0] sm:$0xff]  }
 0x177   : > { %2017 = vperm.xlu0 %5428, %v6912_v55   ;;  %v9384_v55 = vld [vmem:[#allocation67_spill] sm:$0xff]  ;;  %v1199_v56 = vpack.c.bf16 %v1180_v18, %v1179_v17  ;;  %v7264_v12 = vmax.f32 %v9387_v43, 0.0  ;;  %v7278_v18 = vsel %vm786_vm1, %v774_v52, %v775_v35  ;;  %v9392_v45 = vld [vmem:[#allocation16_spill] sm:$0xff] }
 0x178   : > { %1857 = vperm.xlu1 %5392, %v7228_v38   ;;  %3164 = vmatmul.mubr.bf16.gmra.mxu0 %v1432_v29  ;;  %9383 = vst [vmem:[#allocation30_spill] sm:$0xff] %v7238_v1  ;;  %v1406_v3 = vmul.f32 %v9384_v55, %v7213_v7  ;;  %v1407_v29 = vmul.f32 %v6572_v10, %v7219_v16  ;;  %v9385_v55 = vrot.slane %v7090_v48, 7  ;;  %9391 = vst [vmem:[#allocation41_spill] sm:$0xff] %v7278_v18  ;;  %v9402_v7 = vld [vmem:[#allocation52_spill] sm:$0xff] }
 0x179   : > { %v7231_v24 = vpop.permute.xlu1 %1525  ;;  %3171 = vmatprep.mubr.bf16.mxu0 %v1609_v46  ;;  %v5512_v46 = vld [vmem:[%s8973_s3 + $0x1e0] sm:$0xff]   ;;  %9388 = vst [vmem:[#allocation62_spill] sm:$0xff] %v7264_v12 }
 0x17a   : > { %v7244_v59 = vpop.permute.xlu0 %1529  ;;  %v7258_v10 = vsel %vm786_vm1, %v9385_v55, %v774_v52  ;;  %v1433_v17 = vpack.c.bf16 %v1407_v29, %v1406_v3  ;;  %5136 = vmatprep.subr.bf16.mxu0 %v5512_v46  ;;  %v1610_v3 = vpack.c.bf16 %v1585_v0, %v1584_v41  ;;  %v9395_v29 = vld [vmem:[#allocation38_spill] sm:$0xff]  ;;  %v9398_v0 = vmov 7  }
 0x17b   : > { %2029 = vperm.xlu0 %5428, %v6745_v20   ;;  %9386 = vst [vmem:[#allocation11_spill] sm:$0xff] %v7258_v10  ;;  %v9389_v20 = vrot.slane %v6830_v63, 1  ;;  %v1003_v2 = vmul.f32 %v9392_v45, %v7258_v10  ;;  %v1182_v43 = vmul.f32 %v9395_v29, %v7238_v1  ;;  %5137 = vmatpush3.bf16.msra.mxu0 %v5513_v51  ;;  %v5515_v45 = vld [vmem:[%s8973_s3 + $0x198] sm:$0xff]  }
 0x17c   : > { %5393 = vset.pattern.permute.xlu1 %v9244_v22  ;;  %3059 = vmatmul.mubr.bf16.gmra.mxu1 %v1022_v11  ;;  %v776_v11 = vrot.slane %v7264_v12, 7  ;;  %v9396_v63 = vld [vmem:[#allocation15_spill] sm:$0xff] }
 0x17d   : > { %v7267_v49 = vpop.permute.xlu1 %1533  ;;  %v7273_v19 = vsel %vm1235_vm2, %v9389_v20, %v1214_v37  ;;  %1681 = vperm.xlu1 %5393, %v7228_v38   ;;  %3066 = vmatprep.mubr.bf16.mxu1 %v1199_v56  ;;  %v5514_v20 = vld [vmem:[%s8973_s3 + $0x1d8] sm:$0xff]   ;;  %v9393_v56 = vrot.slane %v6863_v62, 1  ;;  %v1004_v38 = vmul.f32 %v9396_v63, %v7278_v18 }
 0x17e   : > { %9390 = vst [vmem:[#allocation45_spill] sm:$0xff] %v7273_v19  ;;  %v7280_v55 = vpop.permute.xlu0 %1537  ;;  %5138 = vmatprep.subr.bf16.mxu0 %v5514_v20  ;;  %v9400_v29 = vld [vmem:[#allocation79_spill] sm:$0xff]  ;;  %v9403_v20 = vrot.slane %v7238_v1, 7 }
 0x17f   : > { %v7293_v52 = vsel %vm1235_vm2, %v1214_v37, %v9393_v56  ;;  %2041 = vperm.xlu0 %5428, %v6775_v34   ;;  %v9397_v37 = vld [vmem:[#allocation71_spill] sm:$0xff]  ;;  %v9399_v56 = vld [vmem:[#allocation36_spill] sm:$0xff]  ;;  %5139 = vmatpush3.bf16.msra.mxu0 %v5515_v45  ;;  %v9410_v45 = vmov 6  }
 0x180   : > { %9394 = vst [vmem:[#allocation54_spill] sm:$0xff] %v7293_v52  ;;  %3172 = vmatmul.mubr.bf16.gmra.mxu0 %v1433_v17  ;;  %v1408_v41 = vmul.f32 %v9397_v37, %v7273_v19  ;;  %v1181_v51 = vmul.f32 %v9399_v56, %v7264_v12  ;;  %v1409_v16 = vmul.f32 %v9400_v29, %v7293_v52  ;;  %v5516_v56 = vld [vmem:[%s8973_s3 + $0x1d0] sm:$0xff]   ;;  %v9405_v29 = vld [vmem:[#allocation51_spill] sm:$0xff] }
 0x181   : > { %v7301_v46 = vpop.permute.xlu1 %1541  ;;  %5394 = vset.pattern.permute.xlu1 %v9398_v0  ;;  %3179 = vmatprep.mubr.bf16.mxu0 %v1610_v3  ;;  %v7314_v17 = vsel %vm786_vm1, %v775_v35, %v776_v11  ;;  %v7323_v37 = vsel %vm786_vm1, %v776_v11, %v9403_v20  ;;  %v1023_v3 = vpack.c.bf16 %v1004_v38, %v1003_v2  ;;  %v7329_v52 = vmax.f32 %v9405_v29, 0.0  ;;  %v5517_v2 = vld [vmem:[%s8973_s3 + $0x190] sm:$0xff]   ;;  %v9408_v29 = vld [vmem:[#allocation48_spill] sm:$0xff] }
 0x182   : > { %9401 = vst [vmem:[#allocation14_spill] sm:$0xff] %v7314_v17  ;;  %2149 = vperm.xlu1 %5394, %v9402_v7   ;;  %v7317_v63 = vpop.permute.xlu0 %1545  ;;  %9404 = vst [vmem:[#allocation13_spill] sm:$0xff] %v7323_v37  ;;  %v1586_v35 = vmul.f32 %v7115_v8, %v6986_v36  ;;  %v1587_v7 = vmul.f32 %v7128_v27, %v7001_v5  ;;  %v1200_v19 = vpack.c.bf16 %v1182_v43, %v1181_v51  ;;  %v9407_v20 = vld [vmem:[#allocation78_spill] sm:$0xff] }
 0x183   : > { %9406 = vst [vmem:[#allocation34_spill] sm:$0xff] %v7329_v52  ;;  %5432 = vset.pattern.permute.xlu0 %v9398_v0  ;;  %v1216_v38 = vrot.slane %v6852_v33, 1  ;;  %v1217_v11 = vrot.slane %v6934_v13, 1  ;;  %v7343_v8 = vmax.f32 %v9408_v29, 0.0  ;;  %5140 = vmatprep.subr.bf16.mxu0 %v5516_v56  ;;  %v1434_v43 = vpack.c.bf16 %v1409_v16, %v1408_v41  ;;  %v9412_v5 = vld [vmem:[#allocation18_spill] sm:$0xff]  ;;  %v9413_v13 = vld [vmem:[#allocation17_spill] sm:$0xff] }
 0x184   : > { %2165 = vperm.xlu0 %5432, %v9407_v20   ;;  %3067 = vmatmul.mubr.bf16.gmra.mxu1 %v1023_v3  ;;  %v1005_v36 = vmul.f32 %v9412_v5, %v7314_v17  ;;  %v1006_v33 = vmul.f32 %v9413_v13, %v7323_v37  ;;  %v5518_v3 = vld [vmem:[%s8973_s3 + $0x1c8] sm:$0xff]   ;;  %v1611_v20 = vpack.c.bf16 %v1587_v7, %v1586_v35  ;;  %v9414_v16 = vld [vmem:[#allocation42_spill] sm:$0xff]  ;;  %v9415_v13 = vrot.slane %v6863_v62, 1 }
 0x185   : > { %9409 = vst [vmem:[#allocation32_spill] sm:$0xff] %v7343_v8  ;;  %3074 = vmatprep.mubr.bf16.mxu1 %v1200_v19  ;;  %v5686_v19 = vld [vmem:[%s8971_s1] sm:$0xff]  ;;  %v1184_v41 = vmul.f32 %v9414_v16, %v7329_v52  ;;  %5141 = vmatpush3.bf16.msra.mxu0 %v5517_v2  ;;  %v5519_v5 = vld [vmem:[%s8973_s3 + $0x188] sm:$0xff]   ;;  %v7373_v35 = vsel %vm1235_vm2, %v1216_v38, %v1217_v11  ;;  %v778_v29 = vrot.slane %v7343_v8, 7 }
 0x186   : > { %v7345_v27 = vpop.permute.xlu1 %1801  ;;  %5397 = vset.pattern.permute.xlu1 %v9410_v45  ;;  %v7348_v51 = vpop.permute.xlu0 %1553  ;;  %v7369_v56 = vsel %vm1235_vm2, %v9415_v13, %v1216_v38  ;;  %9417 = vst [vmem:[#allocation16_spill] sm:$0xff] %v7373_v35  ;;  %v9418_v7 = vld [vmem:[#allocation40_spill] sm:$0xff]  ;;  %5142 = vmatprep.subr.bf16.mxu0 %v5518_v3  ;;  %v1024_v62 = vpack.c.bf16 %v1006_v33, %v1005_v36  ;;  %v9420_v3 = vld [vmem:[#allocation82_spill] sm:$0xff]  ;;  %v1219_v36 = vrot.slane %v6989_v40, 1 }
 0x187   : > { %9411 = vst [vmem:[#allocation67_spill] sm:$0xff] %v7348_v51  ;;  %1973 = vperm.xlu1 %5397, %v5686_v19   ;;  %9416 = vst [vmem:[#allocation50_spill] sm:$0xff] %v7369_v56  ;;  %v1183_v2 = vmul.f32 %v9418_v7, %v7343_v8  ;;  %v779_v19 = vrot.slane %v7329_v52, 7  ;;  %v5520_v38 = vld [vmem:[%s8973_s3 + $0x1c0] sm:$0xff]   ;;  %v1411_v7 = vmul.f32 %v9420_v3, %v7373_v35  ;;  %v5687_v52 = vld [vmem:[%s8971_s1 + $0x8] sm:$0xff]  ;;  %v9421_v3 = vrot.slane %v7238_v1, 7 }
 0x188   : > { %2177 = vperm.xlu0 %5432, %v6672_v9   ;;  %3180 = vmatmul.mubr.bf16.gmra.mxu0 %v1434_v43  ;;  %v9419_v9 = vld [vmem:[#allocation75_spill] sm:$0xff]  ;;  %v9433_v40 = vld [vmem:[#allocation80_spill] sm:$0xff] }
 0x189   : > { %3187 = vmatprep.mubr.bf16.mxu0 %v1611_v20  ;;  %v1410_v43 = vmul.f32 %v9419_v9, %v7369_v56  ;;  %v1218_v20 = vrot.slane %v6902_v28, 1  ;;  %v1201_v51 = vpack.c.bf16 %v1184_v41, %v1183_v2  ;;  %5143 = vmatpush3.bf16.msra.mxu0 %v5519_v5  ;;  %v5521_v33 = vld [vmem:[%s8973_s3 + $0x180] sm:$0xff]   ;;  %v1588_v9 = vmul.f32 %v7152_v31, %v7049_v47 }
 0x18a   : > { %v7382_v13 = vpop.permute.xlu0 %1561  ;;  %v1589_v28 = vmul.f32 %v7162_v42, %v7045_v58  ;;  %v9423_v41 = vld [vmem:[#allocation59_spill] sm:$0xff]  ;;  %5144 = vmatprep.subr.bf16.mxu0 %v5520_v38  ;;  %v7415_v31 = vsel %vm786_vm1, %v778_v29, %v779_v19 }
 0x18b   : > { %v7380_v16 = vpop.permute.xlu1 %1621  ;;  %1977 = vperm.xlu1 %5397, %v5687_v52   ;;  %v7408_v52 = vsel %vm786_vm1, %v9421_v3, %v778_v29  ;;  %v7411_v5 = vmax.f32 %v9423_v41, 0.0  ;;  %9425 = vst [vmem:[#allocation71_spill] sm:$0xff] %v7415_v31  ;;  %v7431_v29 = vsel %vm1235_vm2, %v1218_v20, %v1219_v36  ;;  %v9432_v58 = vld [vmem:[#allocation19_spill] sm:$0xff] }
 0x18c   : > { %2189 = vperm.xlu0 %5432, %v6684_v44   ;;  %3075 = vmatmul.mubr.bf16.gmra.mxu1 %v1024_v62  ;;  %9422 = vst [vmem:[#allocation38_spill] sm:$0xff] %v7408_v52  ;;  %v7421_v44 = vsel %vm1235_vm2, %v1217_v11, %v1218_v20  ;;  %v1435_v62 = vpack.c.bf16 %v1411_v7, %v1410_v43  ;;  %9429 = vst [vmem:[#allocation52_spill] sm:$0xff] %v7431_v29  ;;  %v9430_v11 = vld [vmem:[#allocation65_spill] sm:$0xff]  ;;  %v9431_v43 = vld [vmem:[#allocation46_spill] sm:$0xff] }
 0x18d   : > { %9424 = vst [vmem:[#allocation15_spill] sm:$0xff] %v7411_v5  ;;  %3082 = vmatprep.mubr.bf16.mxu1 %v1201_v51  ;;  %9427 = vst [vmem:[#allocation79_spill] sm:$0xff] %v7421_v44  ;;  %v780_v42 = vrot.slane %v7411_v5, 7  ;;  %v9428_v51 = vld [vmem:[#allocation20_spill] sm:$0xff]  ;;  %5145 = vmatpush3.bf16.msra.mxu0 %v5521_v33  ;;  %v1612_v41 = vpack.c.bf16 %v1589_v28, %v1588_v9  ;;  %v1186_v7 = vmul.f32 %v9431_v43, %v9430_v11  ;;  %v9434_v33 = vld [vmem:[#allocation5_spill] sm:$0xff] }
 0x18e   : > { %v7417_v2 = vpop.permute.xlu0 %1569  ;;  %v1007_v38 = vmul.f32 %v9428_v51, %v7408_v52  ;;  %v1008_v47 = vmul.f32 %v9432_v58, %v7415_v31  ;;  %v1412_v51 = vmul.f32 %v9433_v40, %v7421_v44  ;;  %v9435_v20 = vld [vmem:[#allocation44_spill] sm:$0xff] }
 0x18f   : > { %9426 = vst [vmem:[#allocation36_spill] sm:$0xff] %v7417_v2  ;;  %5398 = vset.pattern.permute.xlu1 %v9223_v32  ;;  %v1220_v2 = vrot.slane %v9434_v33, 1  ;;  %v1185_v28 = vmul.f32 %v9435_v20, %v7411_v5  ;;  %v7454_v40 = vsel %vm786_vm1, %v779_v19, %v780_v42  ;;  %v1590_v20 = vmul.f32 %v7190_v25, %v7113_v15  ;;  %v9440_v33 = vld [vmem:[#allocation123_spill] sm:$0xff]  ;;  %v9443_v25 = vld [vmem:[#allocation22_spill] sm:$0xff]  ;;  %v7503_v44 = vld [vmem:[%s8971_s1 + $0xa8] sm:$0xff] }
 0x190   : > { %v7425_v3 = vpop.permute.xlu1 %1805  ;;  %1865 = vperm.xlu1 %5398, %v6775_v34   ;;  %2201 = vperm.xlu0 %5432, %v7061_v50   ;;  %v9436_v34 = vld [vmem:[#allocation87_spill] sm:$0xff]  ;;  %v9437_v50 = vrot.slane %v9430_v11, 7  ;;  %v1025_v58 = vpack.c.bf16 %v1008_v47, %v1007_v38  ;;  %9439 = vst [vmem:[#allocation78_spill] sm:$0xff] %v7454_v40 }
 0x191   : > { %3188 = vmatmul.mubr.bf16.gmra.mxu0 %v1435_v62  ;;  %v1413_v9 = vmul.f32 %v9436_v34, %v7431_v29  ;;  %v1591_v34 = vmul.f32 %v7197_v60, %v7119_v26  ;;  %v1202_v29 = vpack.c.bf16 %v1186_v7, %v1185_v28  ;;  %v7468_v47 = vsel %vm1235_vm2, %v1219_v36, %v1220_v2  ;;  %v9444_v60 = vld [vmem:[#allocation21_spill] sm:$0xff]  ;;  %v9446_v7 = vld [vmem:[#allocation6_spill] sm:$0xff]  ;;  %v9449_v36 = vld [vmem:[#allocation39_spill] sm:$0xff] }
 0x192   : > { %3195 = vmatprep.mubr.bf16.mxu0 %v1612_v41  ;;  %v7450_v62 = vsel %vm786_vm1, %v780_v42, %v9437_v50  ;;  %v1221_v41 = vrot.slane %v7054_v23, 1  ;;  %9442 = vst [vmem:[#allocation18_spill] sm:$0xff] %v7468_v47  ;;  %v1009_v42 = vmul.f32 %v9443_v25, %v7454_v40  ;;  %v9447_v28 = vld [vmem:[#allocation113_spill] sm:$0xff]  ;;  %v9451_v25 = vld [vmem:[#allocation27_spill] sm:$0xff]  ;;  %vm4413_vm1 = vcmask 1048512  }
 0x193   : > { %9438 = vst [vmem:[#allocation51_spill] sm:$0xff] %v7450_v62  ;;  %v7463_v50 = vpop.permute.xlu0 %2153  ;;  %v1436_v19 = vpack.c.bf16 %v1413_v9, %v1412_v51  ;;  %v1010_v38 = vmul.f32 %v9444_v60, %v7450_v62  ;;  %v1613_v26 = vpack.c.bf16 %v1591_v34, %v1590_v20  ;;  %v9450_v20 = vld [vmem:[#allocation84_spill] sm:$0xff]  ;;  %v9452_v60 = vld [vmem:[#allocation90_spill] sm:$0xff] }
 0x194   : > { %v1810_v43 = vpop.permute.xlu1 %1809  ;;  %5399 = vset.pattern.permute.xlu1 %v9244_v22  ;;  %2213 = vperm.xlu0 %5432, %v9440_v33   ;;  %9441 = vst [vmem:[#allocation48_spill] sm:$0xff] %v7463_v50  ;;  %v7476_v15 = vsel %vm1235_vm2, %v1220_v2, %v1221_v41  ;;  %v7487_v2 = vld [vmem:[%s8971_s1 + $0x10] sm:$0xff]  ;;  %v1414_v34 = vmul.f32 %v9450_v20, %v7468_v47 }
 0x195   : > { %3083 = vmatmul.mubr.bf16.gmra.mxu1 %v1025_v58  ;;  %1685 = vperm.xlu1 %5399, %v9440_v33   ;;  %9445 = vst [vmem:[#allocation17_spill] sm:$0xff] %v7476_v15  ;;  %v1924_v58 = vmul.f32 %v9447_v28, %v9446_v7  ;;  %v1415_v28 = vmul.f32 %v9452_v60, %v7476_v15  ;;  %v1223_v7 = vrot.slane %v7098_v6, 1  ;;  %v9458_v6 = vld [vmem:[#allocation68_spill] sm:$0xff] }
 0x196   : > { %3090 = vmatprep.mubr.bf16.mxu1 %v1202_v29  ;;  %v9448_v29 = vld [vmem:[#allocation25_spill] sm:$0xff] }
 0x197   : > { %v1925_v23 = vmul.f32 %v7345_v27, %v9448_v29  ;;  %v1222_v27 = vrot.slane %v9451_v25, 1  ;;  %v1593_v29 = vmul.f32 %v7244_v59, %v7187_v61  ;;  %v1748_v25 = vmul.f32 %v7380_v16, %v9458_v6  ;;  %v9462_v6 = vld [vmem:[#allocation128_spill] sm:$0xff] }
 0x198   : > { %2225 = vperm.xlu0 %5432, %v9449_v36   ;;  %v1626_v9 = vpop.permute.xlu0 %1625  ;;  %v1594_v16 = vmul.f32 %v7267_v49, %v7258_v10  ;;  %v1596_v10 = vmul.f32 %v7301_v46, %v7314_v17  ;;  %v9474_v46 = vrot.slane %v7264_v12, 1 }
 0x199   : > { %v1634_v51 = vpop.permute.xlu1 %1633  ;;  %3196 = vmatmul.mubr.bf16.gmra.mxu0 %v1436_v19  ;;  %5400 = vset.pattern.permute.xlu1 %v9398_v0  ;;  %v1026_v19 = vpack.c.bf16 %v1010_v38, %v1009_v42  ;;  %v1956_v50 = vpack.c.bf16 %v1925_v23, %v1924_v58  ;;  %v5690_v42 = vld [vmem:[%s8971_s1 + $0x18] sm:$0xff]  ;;  %v9453_v38 = vld [vmem:[#allocation64_spill] sm:$0xff]  ;;  %v7512_v59 = vsel %vm1235_vm2, %v1221_v41, %v1222_v27 }
 0x19a   : > { %3203 = vmatprep.mubr.bf16.mxu0 %v1613_v26  ;;  %2157 = vperm.xlu1 %5400, %v7487_v2   ;;  %v1592_v26 = vmul.f32 %v7231_v24, %v7166_v39  ;;  %v1437_v24 = vpack.c.bf16 %v1415_v28, %v1414_v34  ;;  %v1749_v60 = vmul.f32 %v1626_v9, %v9453_v38  ;;  %v9457_v39 = vld [vmem:[#allocation110_spill] sm:$0xff]  ;;  %v1225_v9 = vrot.slane %v7193_v4, 1  ;;  %v9459_v34 = vld [vmem:[#allocation127_spill] sm:$0xff] }
 0x19b   : > { %9454 = vst [vmem:[#allocation42_spill] sm:$0xff] %v7512_v59  ;;  %v7516_v23 = vsel %vm1235_vm2, %v1222_v27, %v1223_v7  ;;  %v1926_v41 = vmul.f32 %v7425_v3, %v9459_v34  ;;  %v1595_v3 = vmul.f32 %v7280_v55, %v7278_v18 }
 0x19c   : > { %2233 = vperm.xlu0 %5432, %v7503_v44   ;;  %9455 = vst [vmem:[#allocation40_spill] sm:$0xff] %v7516_v23  ;;  %v1614_v58 = vpack.c.bf16 %v1593_v29, %v1592_v26  ;;  %v9460_v29 = vld [vmem:[#allocation88_spill] sm:$0xff]  ;;  %v1780_v38 = vpack.c.bf16 %v1749_v60, %v1748_v25 }
 0x19d   : > { %3091 = vmatmul.mubr.bf16.gmra.mxu1 %v1026_v19  ;;  %v9456_v19 = vld [vmem:[#allocation8_spill] sm:$0xff]  ;;  %v1416_v28 = vmul.f32 %v9460_v29, %v7512_v59 }
 0x19e   : > { %v1818_v20 = vpop.permute.xlu1 %1817  ;;  %3292 = vmatprep.mubr.bf16.mxu1 %v1956_v50  ;;  %2161 = vperm.xlu1 %5400, %v5690_v42   ;;  %v1927_v61 = vmul.f32 %v1810_v43, %v9456_v19  ;;  %v1630_v50 = vpop.permute.xlu0 %1629  ;;  %v1224_v43 = vrot.slane %v7090_v48, 1 }
 0x1a0   : > { %2241 = vperm.xlu0 %5432, %v9457_v39   ;;  %v9461_v39 = vld [vmem:[#allocation95_spill] sm:$0xff]  ;;  %v7538_v29 = vsel %vm1235_vm2, %v1223_v7, %v1224_v43  ;;  %v7542_v25 = vsel %vm1235_vm2, %v1224_v43, %v1225_v9  ;;  %v5691_v7 = vld [vmem:[%s8971_s1 + $0x90] sm:$0xff] }
 0x1a1   : > { %3204 = vmatmul.mubr.bf16.gmra.mxu0 %v1437_v24  ;;  %v1417_v26 = vmul.f32 %v9461_v39, %v7516_v23  ;;  %v1957_v24 = vpack.c.bf16 %v1927_v61, %v1926_v41  ;;  %9463 = vst [vmem:[#allocation75_spill] sm:$0xff] %v7538_v29  ;;  %9464 = vst [vmem:[#allocation82_spill] sm:$0xff] %v7542_v25  ;;  %v9466_v61 = vld [vmem:[#allocation119_spill] sm:$0xff]  ;;  %v9468_v39 = vld [vmem:[#allocation93_spill] sm:$0xff] }
 0x1a2   : > { %3211 = vmatprep.mubr.bf16.mxu0 %v1614_v58  ;;  %5401 = vset.pattern.permute.xlu1 %v9410_v45  ;;  %v1642_v58 = vpop.permute.xlu0 %1641  ;;  %v1928_v60 = vmul.f32 %v9466_v61, %v7066_v57  ;;  %v7555_v41 = vld [vmem:[%s8971_s1 + $0xd8] sm:$0xff] }
 0x1a3   : > { %v1638_v27 = vpop.permute.xlu1 %1637  ;;  %1985 = vperm.xlu1 %5401, %v5690_v42   ;;  %v1438_v19 = vpack.c.bf16 %v1417_v26, %v1416_v28  ;;  %v9465_v42 = vld [vmem:[#allocation76_spill] sm:$0xff]  ;;  %v1226_v26 = vrot.slane %v7175_v53, 1 }
 0x1a4   : > { %2249 = vperm.xlu0 %5432, %v9462_v6   ;;  %v1750_v49 = vmul.f32 %v1630_v50, %v9465_v42  ;;  %v1615_v6 = vpack.c.bf16 %v1595_v3, %v1594_v16  ;;  %v9467_v50 = vld [vmem:[#allocation73_spill] sm:$0xff]  ;;  %v9469_v16 = vld [vmem:[#allocation98_spill] sm:$0xff] }
 0x1a5   : > { %3293 = vmatmul.mubr.bf16.vlgmr.msra.gmra.mxu1 %v1780_v38  ;;  %v1929_v38 = vmul.f32 %v1818_v20, %v7082_v54  ;;  %v1751_v28 = vmul.f32 %v1634_v51, %v9467_v50  ;;  %v1418_v20 = vmul.f32 %v9468_v39, %v7538_v29  ;;  %v1419_v3 = vmul.f32 %v9469_v16, %v7542_v25  ;;  %v9471_v16 = vld [vmem:[#allocation81_spill] sm:$0xff] }
 0x1a6   : > { %3300 = vmatprep.mubr.bf16.mxu1 %v1957_v24  ;;  %v1646_v43 = vpop.permute.xlu0 %1645  ;;  %v1597_v51 = vmul.f32 %v7317_v63, %v7323_v37  ;;  %v7575_v18 = vsel %vm1235_vm2, %v1225_v9, %v1226_v26  ;;  %v7581_v63 = vsel %vm1235_vm2, %v1226_v26, %v9474_v46  ;;  %v9477_v9 = vld [vmem:[#allocation96_spill] sm:$0xff] }
 0x1a7   : > { %5402 = vset.pattern.permute.xlu1 %v9223_v32  ;;  %v1781_v24 = vpack.c.bf16 %v1751_v28, %v1750_v49  ;;  %v1439_v39 = vpack.c.bf16 %v1419_v3, %v1418_v20  ;;  %v1753_v49 = vmul.f32 %v1642_v58, %v9471_v16  ;;  %v9472_v28 = vld [vmem:[#allocation85_spill] sm:$0xff]  ;;  %9473 = vst [vmem:[#allocation59_spill] sm:$0xff] %v7575_v18  ;;  %9475 = vst [vmem:[#allocation20_spill] sm:$0xff] %v7581_v63  ;;  %v9478_v3 = vld [vmem:[#allocation103_spill] sm:$0xff] }
 0x1a8   : > { %v1822_v55 = vpop.permute.xlu1 %1821  ;;  %1869 = vperm.xlu1 %5402, %v5691_v7   ;;  %2257 = vperm.xlu0 %5432, %v7555_v41   ;;  %v1752_v54 = vmul.f32 %v1638_v27, %v9472_v28  ;;  %v1420_v20 = vmul.f32 %v9477_v9, %v7575_v18  ;;  %v1421_v26 = vmul.f32 %v9478_v3, %v7581_v63 }
 0x1a9   : > { %3212 = vmatmul.mubr.bf16.gmra.mxu0 %v1438_v19  ;;  %v1958_v19 = vpack.c.bf16 %v1929_v38, %v1928_v60  ;;  %v1616_v60 = vpack.c.bf16 %v1597_v51, %v1596_v10  ;;  %v1930_v58 = vmul.f32 %v1822_v55, %v7125_v14  ;;  %v9114_v51 = vmov 8  }
 0x1aa   : > { %3219 = vmatprep.mubr.bf16.mxu0 %v1615_v6  ;;  %v9470_v6 = vld [vmem:[#allocation118_spill] sm:$0xff]  ;;  %v1654_v38 = vpop.permute.xlu0 %1653 }
 0x1ac   : > { %v1826_v61 = vpop.permute.xlu1 %1825  ;;  %5403 = vset.pattern.permute.xlu1 %v9244_v22  ;;  %2265 = vperm.xlu0 %5432, %v9470_v6   ;;  %v1440_v6 = vpack.c.bf16 %v1421_v26, %v1420_v20 }
 0x1ad   : > { %3301 = vmatmul.mubr.bf16.gmra.mxu1 %v1781_v24  ;;  %1693 = vperm.xlu1 %5403, %v5691_v7   ;;  %v1931_v7 = vmul.f32 %v1826_v61, %v7143_v21  ;;  %v9476_v24 = vld [vmem:[#allocation60_spill] sm:$0xff] }
 0x1ae   : > { %3308 = vmatprep.mubr.bf16.mxu1 %v1958_v19  ;;  %v1782_v19 = vpack.c.bf16 %v1753_v49, %v1752_v54  ;;  %v7593_v61 = vpop.permute.xlu0 %1661  ;;  %v5693_v54 = vld [vmem:[%s8971_s1 + $0x28] sm:$0xff]  ;;  %v5694_v49 = vld [vmem:[%s8971_s1 + $0x20] sm:$0xff] }
 0x1af   : > { %v1959_v10 = vpack.c.bf16 %v1931_v7, %v1930_v58  ;;  %v9481_v58 = vld [vmem:[#allocation66_spill] sm:$0xff] }
 0x1b0   : > { %2273 = vperm.xlu0 %5432, %v9476_v24  }
 0x1b1   : > { %3220 = vmatmul.mubr.bf16.gmra.mxu0 %v1439_v39  ;;  %1697 = vperm.xlu1 %5403, %v9449_v36   ;;  %v1650_v27 = vpop.permute.xlu1 %1649  ;;  %v9479_v39 = vld [vmem:[#allocation94_spill] sm:$0xff] }
 0x1b2   : > { %3227 = vmatprep.mubr.bf16.mxu0 %v1616_v60  ;;  %v1754_v46 = vmul.f32 %v1646_v43, %v9479_v39  ;;  %v9480_v60 = vld [vmem:[#allocation89_spill] sm:$0xff]  ;;  %v9482_v43 = vld [vmem:[#allocation31_spill] sm:$0xff] }
 0x1b3   : > { %v1755_v9 = vmul.f32 %v1650_v27, %v9480_v60  ;;  %v7607_v27 = vpop.permute.xlu0 %1669 }
 0x1b4   : > { %5453 = vset.pattern.permute.xlu0 %v9114_v51  ;;  %v9488_v51 = vld [vmem:[#allocation67_spill] sm:$0xff] }
 0x1b5   : > { %3309 = vmatmul.mubr.bf16.gmra.mxu1 %v1782_v19  ;;  %5404 = vset.pattern.permute.xlu1 %v9398_v0  ;;  %v1228_v19 = vrot.slane %v7238_v1, 1  ;;  %v1599_v37 = vmul.f32 %v9488_v51, %v7415_v31 }
 0x1b6   : > { %2333 = vperm.xlu0 %5453, %v7487_v2   ;;  %3316 = vmatprep.mubr.bf16.mxu1 %v1959_v10  ;;  %v1830_v55 = vpop.permute.xlu1 %1829  ;;  %v1783_v2 = vpack.c.bf16 %v1755_v9, %v1754_v46  ;;  %v1229_v10 = vrot.slane %v7343_v8, 1  ;;  %v5695_v46 = vld [vmem:[%s8971_s1 + $0x38] sm:$0xff]  ;;  %v9484_v9 = vld [vmem:[#allocation97_spill] sm:$0xff] }
 0x1b7   : > { %2169 = vperm.xlu1 %5404, %v5693_v54   ;;  %v1932_v3 = vmul.f32 %v1830_v55, %v9481_v58 }
 0x1b9   : > { %3228 = vmatmul.mubr.bf16.gmra.mxu0 %v1440_v6  ;;  %v9483_v6 = vld [vmem:[#allocation101_spill] sm:$0xff] }
 0x1ba   : > { %2341 = vperm.xlu0 %5453, %v5694_v49   ;;  %v1834_v7 = vpop.permute.xlu1 %1833  ;;  %v1756_v54 = vmul.f32 %v1654_v38, %v9483_v6 }
 0x1bb   : > { %5405 = vset.pattern.permute.xlu1 %v9410_v45  ;;  %v1933_v20 = vmul.f32 %v1834_v7, %v9482_v43 }
 0x1bc   : > { %1989 = vperm.xlu1 %5405, %v5694_v49   ;;  %v5696_v49 = vld [vmem:[%s8971_s1 + $0xa0] sm:$0xff] }
 0x1bd   : > { %v1960_v26 = vpack.c.bf16 %v1933_v20, %v1932_v3  ;;  %3317 = vmatmul.mubr.bf16.gmra.mxu1 %v1783_v2  ;;  %v9485_v2 = vrot.slane %v7264_v12, 1  ;;  %v7628_v3 = vsel %vm1235_vm2, %v1228_v19, %v1229_v10  ;;  %v7630_v20 = vpop.permute.xlu0 %1677 }
 0x1be   : > { %2353 = vperm.xlu0 %5453, %v5695_v46   ;;  %9487 = vst [vmem:[#allocation19_spill] sm:$0xff] %v7628_v3 }
 0x1bf   : > { %v1658_v55 = vpop.permute.xlu1 %1657  ;;  %3324 = vmatprep.mubr.bf16.mxu1 %v1960_v26  ;;  %v7624_v38 = vsel %vm1235_vm2, %v9485_v2, %v1228_v19  ;;  %v9489_v2 = vld [vmem:[#allocation100_spill] sm:$0xff]  ;;  %v9490_v19 = vld [vmem:[#allocation105_spill] sm:$0xff] }
 0x1c0   : > { %5406 = vset.pattern.permute.xlu1 %v9223_v32  ;;  %v1757_v7 = vmul.f32 %v1658_v55, %v9484_v9  ;;  %9486 = vst [vmem:[#allocation46_spill] sm:$0xff] %v7624_v38  ;;  %v7635_v55 = vld [vmem:[%s8971_s1 + $0x40] sm:$0xff]  ;;  %v1422_v58 = vmul.f32 %v9489_v2, %v7624_v38  ;;  %v1423_v43 = vmul.f32 %v9490_v19, %v7628_v3 }
 0x1c1   : > { %1877 = vperm.xlu1 %5406, %v5696_v49   ;;  %v7647_v14 = vpop.permute.xlu0 %1689  ;;  %v7654_v2 = vld [vmem:[%s8971_s1 + $0x60] sm:$0xff] }
 0x1c2   : > { %v1784_v26 = vpack.c.bf16 %v1757_v7, %v1756_v54  ;;  %2357 = vperm.xlu0 %5453, %v7635_v55   ;;  %v9491_v7 = vld [vmem:[#allocation23_spill] sm:$0xff]  ;;  %v1441_v57 = vpack.c.bf16 %v1423_v43, %v1422_v58  ;;  %v9493_v58 = vld [vmem:[#allocation54_spill] sm:$0xff]  ;;  %v9534_v3 = vld [vmem:[#allocation92_spill] sm:$0xff] }
 0x1c4   : > { %v1550_v17 = vpop.permute.xlu1 %1549 }
 0x1c5   : > { %1881 = vperm.xlu1 %5406, %v7503_v44   ;;  %v1598_v54 = vmul.f32 %v1550_v17, %v7408_v52  ;;  %3325 = vmatmul.mubr.bf16.gmra.mxu1 %v1784_v26  ;;  %v7657_v26 = vpop.permute.xlu0 %1701  ;;  %v9497_v52 = vld [vmem:[#allocation111_spill] sm:$0xff] }
 0x1c6   : > { %2369 = vperm.xlu0 %5453, %v9491_v7   ;;  %v1231_v7 = vrot.slane %v7411_v5, 1 }
 0x1c7   : > { %v1617_v21 = vpack.c.bf16 %v1599_v37, %v1598_v54  ;;  %v9492_v37 = vld [vmem:[#allocation45_spill] sm:$0xff]  ;;  %v9496_v54 = vld [vmem:[#allocation34_spill] sm:$0xff] }
 0x1c9   : > { %5407 = vset.pattern.permute.xlu1 %v9244_v22  ;;  %v1838_v51 = vpop.permute.xlu1 %1837  ;;  %3235 = vmatprep.mubr.bf16.mxu0 %v1617_v21  ;;  %v9494_v21 = vld [vmem:[#allocation12_spill] sm:$0xff] }
 0x1ca   : > { %1705 = vperm.xlu1 %5407, %v7503_v44   ;;  %2373 = vperm.xlu0 %5453, %v7654_v2   ;;  %v1934_v19 = vmul.f32 %v1838_v51, %v9492_v37  ;;  %v7666_v44 = vld [vmem:[%s8971_s1 + $0x30] sm:$0xff]  ;;  %v1758_v51 = vmul.f32 %v7593_v61, %v9497_v52 }
 0x1cb   : > { %3236 = vmatmul.mubr.bf16.gmra.mxu0 %v1441_v57  ;;  %9495 = vst [vmem:[#allocation80_spill] sm:$0xff] %v7666_v44  ;;  %v1230_v57 = vrot.slane %v9496_v54, 1 }
 0x1cd   : > { %v1842_v17 = vpop.permute.xlu1 %1841  ;;  %v7678_v37 = vsel %vm1235_vm2, %v1229_v10, %v1230_v57  ;;  %v7682_v34 = vsel %vm1235_vm2, %v1230_v57, %v1231_v7  ;;  %v9502_v10 = vld [vmem:[#allocation112_spill] sm:$0xff] }
 0x1ce   : > { %5408 = vset.pattern.permute.xlu1 %v9398_v0  ;;  %v1935_v43 = vmul.f32 %v1842_v17, %v9493_v58  ;;  %2385 = vperm.xlu0 %5453, %v9494_v21   ;;  %v9498_v21 = vld [vmem:[#allocation108_spill] sm:$0xff]  ;;  %9499 = vst [vmem:[#allocation44_spill] sm:$0xff] %v7678_v37  ;;  %9500 = vst [vmem:[#allocation87_spill] sm:$0xff] %v7682_v34 }
 0x1cf   : > { %2173 = vperm.xlu1 %5408, %v7666_v44  }
 0x1d0   : > { %v1961_v31 = vpack.c.bf16 %v1935_v43, %v1934_v19  ;;  %v7684_v19 = vpop.permute.xlu0 %1713 }
 0x1d2   : > { %2389 = vperm.xlu0 %5453, %v9440_v33   ;;  %v1666_v17 = vpop.permute.xlu1 %1665  ;;  %3332 = vmatprep.mubr.bf16.mxu1 %v1961_v31  ;;  %v1601_v31 = vmul.f32 %v7382_v13, %v7450_v62  ;;  %v9501_v33 = vld [vmem:[#allocation104_spill] sm:$0xff] }
 0x1d3   : > { %5409 = vset.pattern.permute.xlu1 %v9410_v45  ;;  %v1759_v58 = vmul.f32 %v1666_v17, %v9498_v21  ;;  %v1424_v43 = vmul.f32 %v9501_v33, %v7678_v37  ;;  %v1425_v17 = vmul.f32 %v9502_v10, %v7682_v34  ;;  %v9506_v33 = vld [vmem:[#allocation117_spill] sm:$0xff]  ;;  %v9511_v62 = vld [vmem:[#allocation36_spill] sm:$0xff] }
 0x1d4   : > { %1997 = vperm.xlu1 %5409, %v7666_v44   ;;  %v7695_v54 = vpop.permute.xlu0 %1725 }
 0x1d5   : > { %v1785_v61 = vpack.c.bf16 %v1759_v58, %v1758_v51  ;;  %9503 = vst [vmem:[#allocation123_spill] sm:$0xff] %v7695_v54  ;;  %v1442_v58 = vpack.c.bf16 %v1425_v17, %v1424_v43  ;;  %v1760_v43 = vmul.f32 %v7607_v27, %v9506_v33  ;;  %v9515_v54 = vld [vmem:[#allocation53_spill] sm:$0xff] }
 0x1d6   : > { %2401 = vperm.xlu0 %5453, %v9449_v36   ;;  %v5700_v36 = vld [vmem:[%s8971_s1 + $0xb8] sm:$0xff] }
 0x1d7   : > { %v1558_v5 = vpop.permute.xlu1 %1557  ;;  %3333 = vmatmul.mubr.bf16.gmra.mxu1 %v1785_v61  ;;  %v9505_v61 = vld [vmem:[#allocation24_spill] sm:$0xff] }
 0x1d8   : > { %2001 = vperm.xlu1 %5409, %v5695_v46   ;;  %v1600_v57 = vmul.f32 %v1558_v5, %v7454_v40  ;;  %v7701_v51 = vpop.permute.xlu0 %1737 }
 0x1d9   : > { %9504 = vst [vmem:[#allocation22_spill] sm:$0xff] %v7701_v51  ;;  %v9514_v51 = vld [vmem:[#allocation115_spill] sm:$0xff] }
 0x1da   : > { %v1618_v8 = vpack.c.bf16 %v1601_v31, %v1600_v57  ;;  %2405 = vperm.xlu0 %5453, %v5696_v49  }
 0x1dc   : > { %5410 = vset.pattern.permute.xlu1 %v9223_v32  ;;  %v1846_v13 = vpop.permute.xlu1 %1845  ;;  %3243 = vmatprep.mubr.bf16.mxu0 %v1618_v8  ;;  %v5701_v8 = vld [vmem:[%s8971_s1 + $0xc0] sm:$0xff]  ;;  %v7712_v57 = vpop.permute.xlu0 %1861 }
 0x1dd   : > { %1889 = vperm.xlu1 %5410, %v5700_v36   ;;  %3244 = vmatmul.mubr.bf16.gmra.mxu0 %v1442_v58  ;;  %v1936_v5 = vmul.f32 %v1846_v13, %v7369_v56  ;;  %v9507_v58 = vld [vmem:[#allocation114_spill] sm:$0xff] }
 0x1de   : > { %2417 = vperm.xlu0 %5453, %v5700_v36  }
 0x1e0   : > { %v1850_v46 = vpop.permute.xlu1 %1849 }
 0x1e1   : > { %5411 = vset.pattern.permute.xlu1 %v9244_v22  ;;  %v1937_v49 = vmul.f32 %v1850_v46, %v7373_v35  ;;  %v9508_v46 = vrot.slane %v9430_v11, 1  ;;  %v9513_v35 = vld [vmem:[#allocation72_spill] sm:$0xff] }
 0x1e2   : > { %1709 = vperm.xlu1 %5411, %v9505_v61   ;;  %2421 = vperm.xlu0 %5453, %v5701_v8   ;;  %v1427_v11 = vmul.f32 %v9514_v51, %v9513_v35 }
 0x1e3   : > { %v1962_v31 = vpack.c.bf16 %v1937_v49, %v1936_v5  ;;  %v7721_v5 = vsel %vm1235_vm2, %v1231_v7, %v9508_v46 }
 0x1e4   : > { %v4810_v10 = vpop.f32.mrf.mxu1  ;;  %9509 = vst [vmem:[#allocation21_spill] sm:$0xff] %v7721_v5 }
 0x1e5   : > { %v1674_v17 = vpop.permute.xlu1 %1673  ;;  %3340 = vmatprep.mubr.bf16.mxu1 %v1962_v31  ;;  %v9510_v31 = vld [vmem:[#allocation69_spill] sm:$0xff] }
 0x1e6   : > { %5412 = vset.pattern.permute.xlu1 %v9398_v0  ;;  %v1761_v13 = vmul.f32 %v1674_v17, %v9507_v58  ;;  %2433 = vperm.xlu0 %5453, %v7555_v41   ;;  %v4811_v36 = vpop.f32.mrf.mxu1  ;;  %v1603_v40 = vmul.f32 %v9511_v62, %v9510_v31  ;;  %v9512_v17 = vld [vmem:[#allocation109_spill] sm:$0xff]  ;;  %v9518_v31 = vmov 0  }
 0x1e7   : > { %2181 = vperm.xlu1 %5412, %v7635_v55   ;;  %v7724_v27 = vadd.f32 %v4811_v36, %v4810_v10  ;;  %v1426_v56 = vmul.f32 %v9512_v17, %v7721_v5  ;;  %v7738_v55 = vld [vmem:[%s8971_s1 + $0x48] sm:$0xff] }
 0x1e8   : > { %v1786_v49 = vpack.c.bf16 %v1761_v13, %v1760_v43  ;;  %v7726_v61 = vpop.f32.mrf.mxu1  ;;  %9516 = vst [vmem:[#allocation113_spill] sm:$0xff] %v7738_v55  ;;  %v9517_v43 = vld [vmem:[#allocation70_spill] sm:$0xff]  ;;  %v7744_v13 = vpop.permute.xlu0 %1873 }
 0x1e9   : > { %v1443_v51 = vpack.c.bf16 %v1427_v11, %v1426_v56  ;;  %v9519_v11 = vld [vmem:[#allocation79_spill] sm:$0xff] }
 0x1ea   : > { %2437 = vperm.xlu0 %5453, %v9515_v54   ;;  %v1566_v7 = vpop.permute.xlu1 %1565  ;;  %3341 = vmatmul.mubr.bf16.gmra.mxu1 %v1786_v49  ;;  %v7742_v62 = vpop.f32.mrf.mxu1 }
 0x1eb   : > { %2185 = vperm.xlu1 %5412, %v7738_v55   ;;  %v1602_v10 = vmul.f32 %v1566_v7, %v9517_v43  ;;  %v9521_v43 = vld [vmem:[#allocation125_spill] sm:$0xff] }
 0x1ec   : > { %v4816_v46 = vpop.f32.mrf.mxu1  ;;  %v7753_v30 = vpop.permute.xlu0 %1885 }
 0x1ed   : > { %v1619_v36 = vpack.c.bf16 %v1603_v40, %v1602_v10  ;;  %v9520_v10 = vld [vmem:[#allocation52_spill] sm:$0xff] }
 0x1ee   : > { %2449 = vperm.xlu0 %5453, %v9476_v24   ;;  %v4817_v54 = vpop.f32.mrf.mxu1 }
 0x1ef   : > { %5413 = vset.pattern.permute.xlu1 %v9410_v45  ;;  %v1854_v49 = vpop.permute.xlu1 %1853  ;;  %3251 = vmatprep.mubr.bf16.mxu0 %v1619_v36  ;;  %v7748_v17 = vadd.f32 %v4817_v54, %v4816_v46 }
 0x1f0   : > { %2009 = vperm.xlu1 %5413, %v7738_v55   ;;  %3252 = vmatmul.mubr.bf16.gmra.mxu0 %v1443_v51  ;;  %v7751_v7 = vpop.f32.mrf.mxu1  ;;  %v1938_v24 = vmul.f32 %v1854_v49, %v9519_v11  ;;  %v1762_v51 = vmul.f32 %v7630_v20, %v9521_v43  ;;  %v7763_v5 = vpop.permute.xlu0 %1897  ;;  %v9523_v49 = vld [vmem:[#allocation4_spill] sm:$0xff] }
 0x1f1   : > { %9522 = vst [vmem:[#allocation39_spill] sm:$0xff] %v7763_v5  ;;  %v9524_v20 = vld [vmem:[#allocation48_spill] sm:$0xff] }
 0x1f2   : > { %5457 = vset.pattern.permute.xlu0 %v9518_v31  ;;  %v7756_v40 = vpop.f32.mrf.mxu1  ;;  %v2277_v43 = vmul.f32 %v9524_v20, %v9467_v50  ;;  %v5704_v20 = vld [vmem:[%s8971_s1 + $0x58] sm:$0xff] }
 0x1f3   : > { %v1858_v56 = vpop.permute.xlu1 %1857 }
 0x1f4   : > { %5414 = vset.pattern.permute.xlu1 %v9223_v32  ;;  %v1939_v36 = vmul.f32 %v1858_v56, %v9520_v10  ;;  %v4822_v46 = vpop.f32.mrf.mxu1 }
 0x1f5   : > { %1893 = vperm.xlu1 %5414, %v5701_v8  }
 0x1f6   : > { %v1963_v54 = vpack.c.bf16 %v1939_v36, %v1938_v24  ;;  %v4823_v35 = vpop.f32.mrf.mxu1 }
 0x1f7   : > { %v7765_v34 = vadd.f32 %v4823_v35, %v4822_v46  ;;  %v7775_v35 = vpop.permute.xlu0 %1909  ;;  %v5703_v46 = vld [vmem:[%s8971_s1 + $0xc8] sm:$0xff] }
 0x1f8   : > { %v1682_v31 = vpop.permute.xlu1 %1681  ;;  %3348 = vmatprep.mubr.bf16.mxu1 %v1963_v54  ;;  %v7769_v37 = vpop.f32.mrf.mxu1  ;;  %9525 = vst [vmem:[#allocation84_spill] sm:$0xff] %v7775_v35 }
 0x1f9   : > { %5415 = vset.pattern.permute.xlu1 %v9244_v22  ;;  %v1763_v11 = vmul.f32 %v1682_v31, %v9523_v49 }
 0x1fa   : > { %1717 = vperm.xlu1 %5415, %v5701_v8   ;;  %v7771_v10 = vpop.f32.mrf.mxu1 }
 0x1fb   : > { %v1787_v56 = vpack.c.bf16 %v1763_v11, %v1762_v51 }
 0x1fc   : > { %v4828_v24 = vpop.f32.mrf.mxu1 }
 0x1fd   : > { %v2150_v36 = vpop.permute.xlu1 %2149  ;;  %3349 = vmatmul.mubr.bf16.gmra.mxu1 %v1787_v56 }
 0x1fe   : > { %1721 = vperm.xlu1 %5415, %v5703_v46   ;;  %v2276_v31 = vmul.f32 %v2150_v36, %v9465_v42  ;;  %v4829_v54 = vpop.f32.mrf.mxu1  ;;  %v7791_v46 = vpop.permute.xlu0 %1921 }
 0x1ff   : > { %v7781_v11 = vadd.f32 %v4829_v54, %v4828_v24  ;;  %9526 = vst [vmem:[#allocation90_spill] sm:$0xff] %v7791_v46 }
 0x200   : > { %v2308_v8 = vpack.c.bf16 %v2277_v43, %v2276_v31  ;;  %v7783_v51 = vpop.f32.mrf.mxu1  ;;  %v9527_v43 = vld [vmem:[#allocation83_spill] sm:$0xff]  ;;  %v9528_v31 = vld [vmem:[#allocation86_spill] sm:$0xff] }
 0x202   : > { %5416 = vset.pattern.permute.xlu1 %v9398_v0  ;;  %v1974_v56 = vpop.permute.xlu1 %1973  ;;  %3453 = vmatprep.mubr.bf16.mxu0 %v2308_v8  ;;  %v7789_v50 = vpop.f32.mrf.mxu1  ;;  %v7801_v8 = vld [vmem:[%s8971_s1 + $0x50] sm:$0xff] }
 0x203   : > { %2193 = vperm.xlu1 %5416, %v5704_v20   ;;  %v2100_v24 = vmul.f32 %v1974_v56, %v9527_v43  ;;  %9529 = vst [vmem:[#allocation110_spill] sm:$0xff] %v7801_v8  ;;  %v1982_v55 = vpop.permute.xlu0 %1981 }
 0x204   : > { %v4834_v36 = vpop.f32.mrf.mxu1 }
 0x206   : > { %v1978_v42 = vpop.permute.xlu1 %1977  ;;  %v4835_v35 = vpop.f32.mrf.mxu1 }
 0x207   : > { %5417 = vset.pattern.permute.xlu1 %v9410_v45  ;;  %v2101_v54 = vmul.f32 %v1978_v42, %v9528_v31  ;;  %v7796_v49 = vadd.f32 %v4835_v35, %v4834_v36  ;;  %v1940_v42 = vmul.f32 %v7712_v57, %v7468_v47  ;;  %v5706_v36 = vld [vmem:[%s8971_s1 + $0xd0] sm:$0xff]  ;;  %v7819_v57 = vpop.permute.xlu0 %1993 }
 0x208   : > { %2013 = vperm.xlu1 %5417, %v7801_v8   ;;  %v7804_v46 = vpop.f32.mrf.mxu1 }
 0x209   : > { %v2132_v20 = vpack.c.bf16 %v2101_v54, %v2100_v24 }
 0x20a   : > { %v7806_v58 = vpop.f32.mrf.mxu1 }
 0x20b   : > { %v1866_v56 = vpop.permute.xlu1 %1865  ;;  %3454 = vmatmul.mubr.bf16.vlgmr.msra.gmra.mxu0 %v2132_v20  ;;  %v9530_v20 = vld [vmem:[#allocation5_spill] sm:$0xff] }
 0x20c   : > { %5418 = vset.pattern.permute.xlu1 %v9223_v32  ;;  %v1941_v35 = vmul.f32 %v1866_v56, %v7476_v15  ;;  %v4840_v43 = vpop.f32.mrf.mxu1  ;;  %v1765_v33 = vmul.f32 %v7647_v14, %v9530_v20  ;;  %v9531_v56 = vld [vmem:[#allocation35_spill] sm:$0xff] }
 0x20d   : > { %1901 = vperm.xlu1 %5418, %v5706_v36  }
 0x20e   : > { %v1964_v24 = vpack.c.bf16 %v1941_v35, %v1940_v42  ;;  %v4841_v31 = vpop.f32.mrf.mxu1 }
 0x20f   : > { %v7815_v54 = vadd.f32 %v4841_v31, %v4840_v43  ;;  %v7829_v43 = vpop.permute.xlu0 %2005  ;;  %v4815_v31 = vadd.f32 %v7742_v62, %v7726_v61 }
 0x210   : > { %v1686_v8 = vpop.permute.xlu1 %1685  ;;  %3356 = vmatprep.mubr.bf16.mxu1 %v1964_v24  ;;  %v7823_v15 = vpop.f32.mrf.mxu1  ;;  %9532 = vst [vmem:[#allocation88_spill] sm:$0xff] %v7829_v43  ;;  %v7834_v24 = vld [vmem:[%s8974_s4] ss:$0 sm:$0xff] }
 0x211   : > { %1905 = vperm.xlu1 %5418, %v7555_v41   ;;  %v1764_v47 = vmul.f32 %v1686_v8, %v9531_v56  ;;  %v2976_v38 = vadd.f32 %v4815_v31, %v7834_v24 }
 0x212   : > { %v7825_v36 = vpop.f32.mrf.mxu1 }
 0x213   : > { %v1788_v1 = vpack.c.bf16 %v1765_v33, %v1764_v47  ;;  %v2973_v33 = vadd.f32 %v7724_v27, %v7834_v24  ;;  %v7851_v61 = vpop.permute.xlu0 %2017 }
 0x214   : > { %v4846_v42 = vpop.f32.mrf.mxu1  ;;  %9533 = vst [vmem:[#allocation95_spill] sm:$0xff] %v7851_v61 }
 0x215   : > { %5419 = vset.pattern.permute.xlu1 %v9244_v22  ;;  %v2158_v35 = vpop.permute.xlu1 %2157  ;;  %3357 = vmatmul.mubr.bf16.gmra.mxu1 %v1788_v1 }
 0x216   : > { %1729 = vperm.xlu1 %5419, %v7555_v41   ;;  %v4847_v14 = vpop.f32.mrf.mxu1  ;;  %v2278_v20 = vmul.f32 %v2158_v35, %v9472_v28 }
 0x217   : > { %v7836_v8 = vadd.f32 %v4847_v14, %v4846_v42 }
 0x218   : > { %v4922_v47 = vpop.f32.mrf.mxu0  ;;  %v7842_v1 = vpop.f32.mrf.mxu1 }
 0x219   : > { %v2162_v41 = vpop.permute.xlu1 %2161 }
 0x21a   : > { %5420 = vset.pattern.permute.xlu1 %v9398_v0  ;;  %v2279_v56 = vmul.f32 %v2162_v41, %v9471_v16  ;;  %v4923_v12 = vpop.f32.mrf.mxu0  ;;  %v7848_v42 = vpop.f32.mrf.mxu1  ;;  %v2102_v41 = vmul.f32 %v1982_v55, %v9534_v3  ;;  %v9535_v16 = vld [vmem:[#allocation91_spill] sm:$0xff]  ;;  %v2981_v3 = vadd.f32 %v7748_v17, %v7834_v24 }
 0x21b   : > { %2197 = vperm.xlu1 %5420, %v7654_v2   ;;  %v4924_v14 = vadd.f32 %v4923_v12, %v4922_v47 }
 0x21c   : > { %v2309_v44 = vpack.c.bf16 %v2279_v56, %v2278_v20  ;;  %v4925_v27 = vpop.f32.mrf.mxu0  ;;  %v4852_v5 = vpop.f32.mrf.mxu1 }
 0x21d   : > { %v7853_v62 = vadd.f32 %v4924_v14, %v2973_v33 }
 0x21e   : > { %v1986_v35 = vpop.permute.xlu1 %1985  ;;  %v4926_v28 = vpop.f32.mrf.mxu0  ;;  %3461 = vmatprep.mubr.bf16.mxu0 %v2309_v44  ;;  %v4821_v44 = vadd.f32 %v7756_v40, %v7751_v7 }
 0x21f   : > { %5421 = vset.pattern.permute.xlu1 %v9410_v45  ;;  %v2103_v43 = vmul.f32 %v1986_v35, %v9535_v16  ;;  %v4853_v21 = vpop.f32.mrf.mxu1  ;;  %v4927_v12 = vadd.f32 %v4926_v28, %v4925_v27 }
 0x220   : > { %v7858_v20 = vadd.f32 %v4853_v21, %v4852_v5  ;;  %2021 = vperm.xlu1 %5421, %v7654_v2   ;;  %v4928_v56 = vpop.f32.mrf.mxu0  ;;  %v1943_v2 = vmul.f32 %v7744_v13, %v7516_v23  ;;  %v7873_v5 = vpop.permute.xlu0 %2029  ;;  %v2984_v35 = vadd.f32 %v4821_v44, %v7834_v24 }
 0x221   : > { %v2133_v47 = vpack.c.bf16 %v2103_v43, %v2102_v41  ;;  %v7861_v33 = vadd.f32 %v4927_v12, %v2976_v38  ;;  %v7863_v31 = vpop.f32.mrf.mxu1  ;;  %9536 = vst [vmem:[#allocation128_spill] sm:$0xff] %v7873_v5  ;;  %v7878_v38 = vld [vmem:[%s8971_s1 + $0x68] sm:$0xff]  ;;  %v5522_v12 = vld [vmem:[%s8973_s3 + $0x238] sm:$0xff]  }
 0x222   : > { %v4929_v14 = vpop.f32.mrf.mxu0  ;;  %9537 = vst [vmem:[#allocation119_spill] sm:$0xff] %v7878_v38  ;;  %5300 = vmatprep.subr.bf16.mxu1 %v5522_v12  ;;  %v9543_v5 = vld [vmem:[#allocation102_spill] sm:$0xff] }
 0x223   : > { %v7869_v16 = vpop.f32.mrf.mxu1  ;;  %v4930_v28 = vadd.f32 %v4929_v14, %v4928_v56  ;;  %v1870_v21 = vpop.permute.xlu1 %1869  ;;  %3462 = vmatmul.mubr.bf16.gmra.mxu0 %v2133_v47  ;;  %5301 = vmatpush3.bf16.msra.mxu1 %v5522_v12 }
 0x224   : > { %2025 = vperm.xlu1 %5421, %v7878_v38   ;;  %v1942_v55 = vmul.f32 %v1870_v21, %v7512_v59  ;;  %v4931_v17 = vpop.f32.mrf.mxu0  ;;  %v7898_v21 = vpop.permute.xlu0 %2041 }
 0x225   : > { %v7882_v7 = vadd.f32 %v4930_v28, %v2981_v3  ;;  %v4858_v40 = vpop.f32.mrf.mxu1  ;;  %v5708_v3 = vld [vmem:[%s8971_s1 + $0xe8] sm:$0xff]  ;;  %9538 = vst [vmem:[#allocation93_spill] sm:$0xff] %v7898_v21  ;;  %v7914_v21 = vld [vmem:[%s8971_s1 + $0xe0] sm:$0xff] }
 0x226   : > { %v1965_v43 = vpack.c.bf16 %v1943_v2, %v1942_v55  ;;  %v4932_v27 = vpop.f32.mrf.mxu0  ;;  %9541 = vst [vmem:[#allocation98_spill] sm:$0xff] %v7914_v21 }
 0x227   : > { %v4859_v13 = vpop.f32.mrf.mxu1  ;;  %v4933_v41 = vadd.f32 %v4932_v27, %v4931_v17  ;;  %v2989_v17 = vadd.f32 %v7765_v34, %v7834_v24 }
 0x228   : > { %v7888_v56 = vadd.f32 %v4859_v13, %v4858_v40  ;;  %5422 = vset.pattern.permute.xlu1 %v9223_v32  ;;  %v1694_v47 = vpop.permute.xlu1 %1693  ;;  %3364 = vmatprep.mubr.bf16.mxu1 %v1965_v43  ;;  %v4934_v28 = vpop.f32.mrf.mxu0  ;;  %v4827_v40 = vadd.f32 %v7771_v10, %v7769_v37 }
 0x229   : > { %v7891_v14 = vadd.f32 %v4933_v41, %v2984_v35  ;;  %1913 = vperm.xlu1 %5422, %v5708_v3   ;;  %v7896_v44 = vpop.f32.mrf.mxu1  ;;  %v9539_v35 = vld [vmem:[#allocation37_spill] sm:$0xff]  ;;  %v9540_v41 = vld [vmem:[#allocation27_spill] sm:$0xff] }
 0x22a   : > { %v4935_v55 = vpop.f32.mrf.mxu0  ;;  %v1766_v13 = vmul.f32 %v1694_v47, %v9539_v35  ;;  %v2992_v47 = vadd.f32 %v4827_v40, %v7834_v24  ;;  %v7930_v40 = vld [vmem:[%s8971_s1 + $0x70] sm:$0xff] }
 0x22b   : > { %v7900_v2 = vpop.f32.mrf.mxu1  ;;  %v4936_v43 = vadd.f32 %v4935_v55, %v4934_v28  ;;  %v2166_v28 = vpop.permute.xlu0 %2165  ;;  %9542 = vst [vmem:[#allocation118_spill] sm:$0xff] %v7930_v40 }
 0x22c   : > { %v1698_v27 = vpop.permute.xlu1 %1697  ;;  %v4937_v59 = vpop.f32.mrf.mxu0 }
 0x22d   : > { %5423 = vset.pattern.permute.xlu1 %v9244_v22  ;;  %v1767_v3 = vmul.f32 %v1698_v27, %v9540_v41  ;;  %v4864_v23 = vpop.f32.mrf.mxu1  ;;  %v7909_v12 = vadd.f32 %v4936_v43, %v2989_v17 }
 0x22e   : > { %1733 = vperm.xlu1 %5423, %v7914_v21   ;;  %v4938_v10 = vpop.f32.mrf.mxu0  ;;  %v2280_v21 = vmul.f32 %v2166_v28, %v9479_v39 }
 0x22f   : > { %v1789_v34 = vpack.c.bf16 %v1767_v3, %v1766_v13  ;;  %v4865_v37 = vpop.f32.mrf.mxu1  ;;  %v4939_v27 = vadd.f32 %v4938_v10, %v4937_v59  ;;  %v2997_v3 = vadd.f32 %v7781_v11, %v7834_v24 }
 0x230   : > { %v7918_v55 = vadd.f32 %v4865_v37, %v4864_v23  ;;  %v4940_v43 = vpop.f32.mrf.mxu0 }
 0x231   : > { %v7920_v41 = vpop.f32.mrf.mxu1  ;;  %3365 = vmatmul.mubr.bf16.gmra.mxu1 %v1789_v34  ;;  %v7922_v17 = vadd.f32 %v4939_v27, %v2992_v47  ;;  %v4833_v34 = vadd.f32 %v7789_v50, %v7783_v51  ;;  %v2105_v50 = vmul.f32 %v7819_v57, %v9543_v5  ;;  %v9544_v51 = vld [vmem:[#allocation99_spill] sm:$0xff]  ;;  %v3005_v5 = vadd.f32 %v7796_v49, %v7834_v24 }
 0x232   : > { %5425 = vset.pattern.permute.xlu1 %v9398_v0  ;;  %v2170_v35 = vpop.permute.xlu1 %2169  ;;  %v4941_v23 = vpop.f32.mrf.mxu0 }
 0x233   : > { %v2281_v13 = vmul.f32 %v2170_v35, %v9480_v60  ;;  %2205 = vperm.xlu1 %5425, %v7930_v40   ;;  %v7933_v59 = vpop.f32.mrf.mxu1  ;;  %v4942_v10 = vadd.f32 %v4941_v23, %v4940_v43  ;;  %v5523_v35 = vld [vmem:[%s8973_s3 + $0x230] sm:$0xff]   ;;  %v5711_v60 = vld [vmem:[%s8971_s1 + $0x78] sm:$0xff]  ;;  %v3000_v23 = vadd.f32 %v4833_v34, %v7834_v24  ;;  %v4839_v34 = vadd.f32 %v7806_v58, %v7804_v46 }
 0x234   : > { %v4943_v28 = vpop.f32.mrf.mxu0  ;;  %5302 = vmatprep.subr.bf16.mxu1 %v5523_v35  ;;  %v7975_v58 = vld [vmem:[%s8971_s1 + $0xf0] sm:$0xff] }
 0x235   : > { %v2310_v37 = vpack.c.bf16 %v2281_v13, %v2280_v21  ;;  %v4870_v47 = vpop.f32.mrf.mxu1  ;;  %v7942_v27 = vadd.f32 %v4942_v10, %v2997_v3  ;;  %5303 = vmatpush3.bf16.msra.mxu1 %v5523_v35 }
 0x236   : > { %v4944_v13 = vpop.f32.mrf.mxu0 }
 0x237   : > { %2209 = vperm.xlu1 %5425, %v5711_v60   ;;  %v1990_v39 = vpop.permute.xlu1 %1989  ;;  %v4871_v11 = vpop.f32.mrf.mxu1  ;;  %3469 = vmatprep.mubr.bf16.mxu0 %v2310_v37  ;;  %v4945_v3 = vadd.f32 %v4944_v13, %v4943_v28 }
 0x238   : > { %v2104_v21 = vmul.f32 %v1990_v39, %v9544_v51  ;;  %v7950_v43 = vadd.f32 %v4871_v11, %v4870_v47  ;;  %v4946_v38 = vpop.f32.mrf.mxu0 }
 0x239   : > { %v7953_v10 = vpop.f32.mrf.mxu1  ;;  %v7955_v61 = vadd.f32 %v4945_v3, %v3000_v23 }
 0x23a   : > { %v2134_v40 = vpack.c.bf16 %v2105_v50, %v2104_v21  ;;  %v4947_v57 = vpop.f32.mrf.mxu0 }
 0x23b   : > { %5426 = vset.pattern.permute.xlu1 %v9410_v45  ;;  %v7958_v37 = vpop.f32.mrf.mxu1  ;;  %v4948_v47 = vadd.f32 %v4947_v57, %v4946_v38 }
 0x23c   : > { %2033 = vperm.xlu1 %5426, %v5711_v60   ;;  %v1878_v39 = vpop.permute.xlu1 %1877  ;;  %3470 = vmatmul.mubr.bf16.gmra.mxu0 %v2134_v40  ;;  %v4949_v28 = vpop.f32.mrf.mxu0  ;;  %v3008_v40 = vadd.f32 %v4839_v34, %v7834_v24  ;;  %v4845_v34 = vadd.f32 %v7825_v36, %v7823_v15 }
 0x23d   : > { %v4876_v35 = vpop.f32.mrf.mxu1  ;;  %v7964_v11 = vadd.f32 %v4948_v47, %v3005_v5  ;;  %v1944_v13 = vmul.f32 %v1878_v39, %v7538_v29  ;;  %v3013_v39 = vadd.f32 %v7815_v54, %v7834_v24  ;;  %v2178_v15 = vpop.permute.xlu0 %2177 }
 0x23e   : > { %v4950_v21 = vpop.f32.mrf.mxu0  ;;  %v3016_v36 = vadd.f32 %v4845_v34, %v7834_v24 }
 0x23f   : > { %v4877_v50 = vpop.f32.mrf.mxu1  ;;  %v4951_v49 = vadd.f32 %v4950_v21, %v4949_v28  ;;  %v9545_v28 = vld [vmem:[#allocation47_spill] sm:$0xff] }
 0x240   : > { %v7966_v51 = vadd.f32 %v4877_v50, %v4876_v35  ;;  %5427 = vset.pattern.permute.xlu1 %v9223_v32  ;;  %v1882_v60 = vpop.permute.xlu1 %1881  ;;  %v4952_v38 = vpop.f32.mrf.mxu0  ;;  %v1768_v50 = vmul.f32 %v7657_v26, %v9545_v28 }
 0x241   : > { %v1945_v23 = vmul.f32 %v1882_v60, %v7542_v25  ;;  %1917 = vperm.xlu1 %5427, %v7975_v58   ;;  %v7978_v46 = vpop.f32.mrf.mxu1  ;;  %v7980_v3 = vadd.f32 %v4951_v49, %v3008_v40 }
 0x242   : > { %v4953_v5 = vpop.f32.mrf.mxu0 }
 0x243   : > { %v1966_v32 = vpack.c.bf16 %v1945_v23, %v1944_v13  ;;  %v7982_v57 = vpop.f32.mrf.mxu1  ;;  %v4954_v47 = vadd.f32 %v4953_v5, %v4952_v38 }
 0x244   : > { %v4955_v40 = vpop.f32.mrf.mxu0 }
 0x245   : > { %5429 = vset.pattern.permute.xlu1 %v9244_v22  ;;  %v1706_v35 = vpop.permute.xlu1 %1705  ;;  %3372 = vmatprep.mubr.bf16.mxu1 %v1966_v32  ;;  %v4882_v60 = vpop.f32.mrf.mxu1  ;;  %v7993_v13 = vadd.f32 %v4954_v47, %v3013_v39  ;;  %v5524_v22 = vld [vmem:[%s8973_s3 + $0x228] sm:$0xff]   ;;  %v8004_v39 = vld [vmem:[%s8971_s1 + $0xf8] sm:$0xff] }
 0x246   : > { %v1769_v21 = vmul.f32 %v1706_v35, %v7090_v48  ;;  %1741 = vperm.xlu1 %5429, %v7975_v58   ;;  %v4956_v23 = vpop.f32.mrf.mxu0  ;;  %9546 = vst [vmem:[#allocation60_spill] sm:$0xff] %v8004_v39  ;;  %5304 = vmatprep.subr.bf16.mxu1 %v5524_v22 }
 0x247   : > { %v4883_v49 = vpop.f32.mrf.mxu1  ;;  %v4957_v26 = vadd.f32 %v4956_v23, %v4955_v40  ;;  %5305 = vmatpush3.bf16.msra.mxu1 %v5524_v22  ;;  %v3021_v40 = vadd.f32 %v7836_v8, %v7834_v24  ;;  %v8026_v8 = vld [vmem:[%s8971_s1 + $0x88] sm:$0xff] }
 0x248   : > { %v1790_v54 = vpack.c.bf16 %v1769_v21, %v1768_v50  ;;  %v7999_v38 = vadd.f32 %v4883_v49, %v4882_v60  ;;  %v4958_v5 = vpop.f32.mrf.mxu0  ;;  %v2283_v50 = vmul.f32 %v2178_v15, %v9484_v9  ;;  %v4851_v49 = vadd.f32 %v7848_v42, %v7842_v1 }
 0x249   : > { %v4885_v32 = vpop.f32.mrf.mxu1  ;;  %v8007_v47 = vadd.f32 %v4957_v26, %v3016_v36  ;;  %v5525_v36 = vld [vmem:[%s8973_s3 + $0x220] sm:$0xff]  }
 0x24a   : > { %1745 = vperm.xlu1 %5429, %v8004_v39   ;;  %3373 = vmatmul.mubr.bf16.gmra.mxu1 %v1790_v54  ;;  %v2174_v35 = vpop.permute.xlu1 %2173  ;;  %v4959_v60 = vpop.f32.mrf.mxu0 }
 0x24b   : > { %v2282_v34 = vmul.f32 %v2174_v35, %v9483_v6  ;;  %v4886_v21 = vpop.f32.mrf.mxu1  ;;  %v4960_v54 = vadd.f32 %v4959_v60, %v4958_v5  ;;  %5306 = vmatprep.subr.bf16.mxu1 %v5525_v36  ;;  %v5526_v60 = vld [vmem:[%s8973_s3 + $0x218] sm:$0xff]  }
 0x24c   : > { %v8015_v23 = vadd.f32 %v4886_v21, %v4885_v32  ;;  %v4961_v9 = vpop.f32.mrf.mxu0  ;;  %5307 = vmatpush3.bf16.msra.mxu1 %v5525_v36  ;;  %v3024_v32 = vadd.f32 %v4851_v49, %v7834_v24  ;;  %v9547_v6 = vld [vmem:[#allocation107_spill] sm:$0xff] }
 0x24d   : > { %v2311_v26 = vpack.c.bf16 %v2283_v50, %v2282_v34  ;;  %v4888_v15 = vpop.f32.mrf.mxu1  ;;  %v8021_v35 = vadd.f32 %v4960_v54, %v3021_v40  ;;  %5308 = vmatprep.subr.bf16.mxu1 %v5526_v60 }
 0x24e   : > { %5430 = vset.pattern.permute.xlu1 %v9398_v0  ;;  %v4962_v22 = vpop.f32.mrf.mxu0 }
 0x24f   : > { %2217 = vperm.xlu1 %5430, %v8026_v8   ;;  %v1998_v1 = vpop.permute.xlu1 %1997  ;;  %v4889_v42 = vpop.f32.mrf.mxu1  ;;  %3477 = vmatprep.mubr.bf16.mxu0 %v2311_v26  ;;  %v4963_v50 = vadd.f32 %v4962_v22, %v4961_v9  ;;  %v9548_v26 = vld [vmem:[#allocation106_spill] sm:$0xff]  ;;  %v5715_v9 = vld [vmem:[%s8971_s1 + $0x80] sm:$0xff] }
 0x250   : > { %v8030_v5 = vadd.f32 %v4889_v42, %v4888_v15  ;;  %v2106_v29 = vmul.f32 %v1998_v1, %v9547_v6  ;;  %v3029_v15 = vadd.f32 %v7858_v20, %v7834_v24  ;;  %v4857_v42 = vadd.f32 %v7869_v16, %v7863_v31  ;;  %5309 = vmatpush3.bf16.msra.mxu1 %v5526_v60  ;;  %v5527_v6 = vld [vmem:[%s8973_s3 + $0x210] sm:$0xff]  }
 0x251   : > { %v4891_v34 = vpop.f32.mrf.mxu1  ;;  %v4964_v21 = vpop.f32.mrf.mxu0  ;;  %v8035_v40 = vadd.f32 %v4963_v50, %v3024_v32  ;;  %5310 = vmatprep.subr.bf16.mxu1 %v5527_v6  ;;  %v9549_v20 = vmov 8  }
 0x253   : > { %5431 = vset.pattern.permute.xlu1 %v9410_v45  ;;  %v2002_v54 = vpop.permute.xlu1 %2001  ;;  %v4892_v25 = vpop.f32.mrf.mxu1 }
 0x254   : > { %v2107_v36 = vmul.f32 %v2002_v54, %v9548_v26  ;;  %v4965_v49 = vpop.f32.mrf.mxu0  ;;  %2037 = vperm.xlu1 %5431, %v5715_v9   ;;  %v8047_v22 = vadd.f32 %v4892_v25, %v4891_v34  ;;  %v3032_v25 = vadd.f32 %v4857_v42, %v7834_v24  ;;  %5311 = vmatpush3.bf16.msra.mxu1 %v5527_v6 }
 0x255   : > { %v4966_v32 = vadd.f32 %v4965_v49, %v4964_v21  ;;  %v4894_v50 = vpop.f32.mrf.mxu1  ;;  %v1946_v21 = vmul.f32 %v7753_v30, %v7575_v18  ;;  %v3037_v42 = vadd.f32 %v7888_v56, %v7834_v24  ;;  %v4863_v6 = vadd.f32 %v7900_v2, %v7896_v44  ;;  %v5529_v2 = vld [vmem:[%s8973_s3 + $0x200] sm:$0xff]  }
 0x256   : > { %v2135_v1 = vpack.c.bf16 %v2107_v36, %v2106_v29  ;;  %v4967_v54 = vpop.f32.mrf.mxu0  ;;  %v5716_v29 = vld [vmem:[%s8971_s1] sm:$0xff] }
 0x257   : > { %v8052_v26 = vadd.f32 %v4966_v32, %v3029_v15  ;;  %v4895_v9 = vpop.f32.mrf.mxu1 }
 0x258   : > { %v4968_v39 = vpop.f32.mrf.mxu0  ;;  %5433 = vset.pattern.permute.xlu1 %v9549_v20  ;;  %3478 = vmatmul.mubr.bf16.gmra.mxu0 %v2135_v1  ;;  %v8056_v31 = vadd.f32 %v4895_v9, %v4894_v50  ;;  %v1890_v34 = vpop.permute.xlu1 %1889  ;;  %v5717_v9 = vld [vmem:[%s8971_s1 + $0x8] sm:$0xff] }
 0x259   : > { %v4969_v16 = vadd.f32 %v4968_v39, %v4967_v54  ;;  %2325 = vperm.xlu1 %5433, %v5716_v29   ;;  %v1947_v60 = vmul.f32 %v1890_v34, %v7581_v63  ;;  %v4897_v36 = vpop.f32.mrf.mxu1  ;;  %v5528_v39 = vld [vmem:[%s8973_s3 + $0x208] sm:$0xff]  }
 0x25a   : > { %v4970_v49 = vpop.f32.mrf.mxu0  ;;  %5312 = vmatprep.subr.bf16.mxu1 %v5528_v39 }
 0x25b   : > { %v8064_v15 = vadd.f32 %v4969_v16, %v3032_v25  ;;  %v1967_v32 = vpack.c.bf16 %v1947_v60, %v1946_v21  ;;  %v4898_v1 = vpop.f32.mrf.mxu1  ;;  %v1771_v16 = vmul.f32 %v7684_v19, %v7175_v53  ;;  %5313 = vmatpush3.bf16.msra.mxu1 %v5528_v39 }
 0x25c   : > { %v4971_v50 = vpop.f32.mrf.mxu0  ;;  %v8073_v30 = vadd.f32 %v4898_v1, %v4897_v36  ;;  %5314 = vmatprep.subr.bf16.mxu1 %v5529_v2 }
 0x25d   : > { %v4972_v54 = vadd.f32 %v4971_v50, %v4970_v49  ;;  %2329 = vperm.xlu1 %5433, %v5717_v9   ;;  %v1710_v25 = vpop.permute.xlu1 %1709  ;;  %v4900_v34 = vpop.f32.mrf.mxu1  ;;  %3380 = vmatprep.mubr.bf16.mxu1 %v1967_v32  ;;  %v3040_v49 = vadd.f32 %v4863_v6, %v7834_v24  ;;  %v5718_v50 = vld [vmem:[%s8971_s1 + $0x18] sm:$0xff]  ;;  %v3045_v6 = vadd.f32 %v7918_v55, %v7834_v24 }
 0x25e   : > { %v1770_v56 = vmul.f32 %v1710_v25, %v7193_v4  ;;  %v4973_v29 = vpop.f32.mrf.mxu0 }
 0x25f   : > { %v8081_v44 = vadd.f32 %v4972_v54, %v3037_v42  ;;  %v4901_v60 = vpop.f32.mrf.mxu1  ;;  %5315 = vmatpush3.bf16.msra.mxu1 %v5529_v2 }
 0x260   : > { %v1791_v21 = vpack.c.bf16 %v1771_v16, %v1770_v56  ;;  %v4974_v36 = vpop.f32.mrf.mxu0  ;;  %v8087_v1 = vadd.f32 %v4901_v60, %v4900_v34  ;;  %v4869_v16 = vadd.f32 %v7933_v59, %v7920_v41  ;;  %v9550_v41 = vld [vmem:[#allocation108_spill] sm:$0xff] }
 0x261   : > { %v4975_v19 = vadd.f32 %v4974_v36, %v4973_v29  ;;  %2337 = vperm.xlu1 %5433, %v5718_v50   ;;  %v4903_v39 = vpop.f32.mrf.mxu1 }
 0x262   : > { %v4976_v42 = vpop.f32.mrf.mxu0  ;;  %3381 = vmatmul.mubr.bf16.gmra.mxu1 %v1791_v21  ;;  %v2182_v54 = vpop.permute.xlu1 %2181  ;;  %v8104_v21 = vld [vmem:[%s8971_s1 + $0x90] sm:$0xff]  ;;  %v3048_v50 = vadd.f32 %v4869_v16, %v7834_v24 }
 0x263   : > { %v8092_v32 = vadd.f32 %v4975_v19, %v3040_v49  ;;  %v4904_v9 = vpop.f32.mrf.mxu1  ;;  %v2284_v36 = vmul.f32 %v2182_v54, %v9497_v52  ;;  %v9554_v52 = vld [vmem:[#allocation120_spill] sm:$0xff] }
 0x264   : > { %v4977_v25 = vpop.f32.mrf.mxu0  ;;  %v8098_v56 = vadd.f32 %v4904_v9, %v4903_v39 }
 0x265   : > { %v4978_v34 = vadd.f32 %v4977_v25, %v4976_v42  ;;  %5434 = vset.pattern.permute.xlu1 %v9398_v0  ;;  %v5034_v60 = vpop.f32.mrf.mxu1 }
 0x266   : > { %v4979_v29 = vpop.f32.mrf.mxu0  ;;  %2221 = vperm.xlu1 %5434, %v8104_v21   ;;  %v2186_v55 = vpop.permute.xlu1 %2185 }
 0x267   : > { %v8107_v2 = vadd.f32 %v4978_v34, %v3045_v6  ;;  %v2285_v59 = vmul.f32 %v2186_v55, %v9550_v41  ;;  %v5035_v19 = vpop.f32.mrf.mxu1  ;;  %v9552_v34 = vld [vmem:[#allocation116_spill] sm:$0xff] }
 0x268   : > { %v4980_v49 = vpop.f32.mrf.mxu0  ;;  %v5036_v42 = vadd.f32 %v5035_v19, %v5034_v60  ;;  %v9553_v55 = vld [vmem:[#allocation88_spill] sm:$0xff] }
 0x269   : > { %v4981_v39 = vadd.f32 %v4980_v49, %v4979_v29  ;;  %v2312_v9 = vpack.c.bf16 %v2285_v59, %v2284_v36  ;;  %v5037_v63 = vpop.f32.mrf.mxu1  ;;  %v2108_v41 = vmul.f32 %v9553_v55, %v9552_v34  ;;  %v3053_v36 = vadd.f32 %v7950_v43, %v7834_v24 }
 0x26a   : > { %v4982_v25 = vpop.f32.mrf.mxu0  ;;  %5435 = vset.pattern.permute.xlu1 %v9410_v45  ;;  %v8116_v6 = vadd.f32 %v5036_v42, %v7853_v62  ;;  %v4875_v59 = vadd.f32 %v7958_v37, %v7953_v10 }
 0x26b   : > { %v8113_v18 = vadd.f32 %v4981_v39, %v3048_v50  ;;  %2045 = vperm.xlu1 %5435, %v8104_v21   ;;  %v2010_v54 = vpop.permute.xlu1 %2009  ;;  %v5038_v60 = vpop.f32.mrf.mxu1  ;;  %3485 = vmatprep.mubr.bf16.mxu0 %v2312_v9 }
 0x26c   : > { %9551 = vst [vmem:[#allocation96_spill] sm:$0xff] %v8116_v6  ;;  %v2109_v16 = vmul.f32 %v2010_v54, %v9554_v52  ;;  %v4983_v29 = vpop.f32.mrf.mxu0  ;;  %v5039_v62 = vadd.f32 %v5038_v60, %v5037_v63  ;;  %v5720_v52 = vld [vmem:[%s8971_s1 + $0x98] sm:$0xff]  ;;  %v3056_v10 = vadd.f32 %v4875_v59, %v7834_v24 }
 0x26d   : > { %v4984_v49 = vadd.f32 %v4983_v29, %v4982_v25  ;;  %v5040_v39 = vpop.f32.mrf.mxu1  ;;  %v9556_v25 = vld [vmem:[#allocation19_spill] sm:$0xff] }
 0x26e   : > { %v2136_v19 = vpack.c.bf16 %v2109_v16, %v2108_v41  ;;  %v4985_v50 = vpop.f32.mrf.mxu0  ;;  %v8129_v34 = vadd.f32 %v5039_v62, %v7861_v33  ;;  %v9557_v54 = vld [vmem:[#allocation39_spill] sm:$0xff]  ;;  %v9558_v16 = vld [vmem:[#allocation46_spill] sm:$0xff] }
 0x26f   : > { %v8126_v42 = vadd.f32 %v4984_v49, %v3053_v36  ;;  %2049 = vperm.xlu1 %5435, %v5720_v52   ;;  %v5041_v43 = vpop.f32.mrf.mxu1  ;;  %v1949_v55 = vmul.f32 %v9557_v54, %v9556_v25  ;;  %v4881_v52 = vadd.f32 %v7982_v57, %v7978_v46  ;;  %v9562_v57 = vld [vmem:[#allocation62_spill] sm:$0xff] }
 0x270   : > { %9555 = vst [vmem:[#allocation103_spill] sm:$0xff] %v8129_v34  ;;  %v4986_v9 = vpop.f32.mrf.mxu0  ;;  %3486 = vmatmul.mubr.bf16.gmra.mxu0 %v2136_v19  ;;  %v5042_v63 = vadd.f32 %v5041_v43, %v5040_v39  ;;  %v1894_v41 = vpop.permute.xlu1 %1893  ;;  %v3061_v39 = vadd.f32 %v7966_v51, %v7834_v24 }
 0x271   : > { %v4987_v37 = vadd.f32 %v4986_v9, %v4985_v50  ;;  %v1948_v29 = vmul.f32 %v1894_v41, %v9558_v16  ;;  %v5043_v60 = vpop.f32.mrf.mxu1  ;;  %v5721_v50 = vld [vmem:[%s8971_s1 + $0x28] sm:$0xff]  ;;  %v3064_v51 = vadd.f32 %v4881_v52, %v7834_v24  ;;  %v2190_v52 = vpop.permute.xlu0 %2189 }
 0x272   : > { %v4988_v33 = vpop.f32.mrf.mxu0  ;;  %v8141_v49 = vadd.f32 %v5042_v63, %v7882_v7 }
 0x273   : > { %v8138_v36 = vadd.f32 %v4987_v37, %v3056_v10  ;;  %5436 = vset.pattern.permute.xlu1 %v9549_v20  ;;  %v1968_v62 = vpack.c.bf16 %v1949_v55, %v1948_v29  ;;  %v5044_v59 = vpop.f32.mrf.mxu1  ;;  %v9561_v29 = vld [vmem:[#allocation80_spill] sm:$0xff] }
 0x274   : > { %9559 = vst [vmem:[#allocation67_spill] sm:$0xff] %v8141_v49  ;;  %v4989_v19 = vpop.f32.mrf.mxu0  ;;  %2345 = vperm.xlu1 %5436, %v5721_v50   ;;  %v5045_v43 = vadd.f32 %v5044_v59, %v5043_v60  ;;  %v9563_v60 = vld [vmem:[#allocation30_spill] sm:$0xff] }
 0x275   : > { %v4990_v9 = vadd.f32 %v4989_v19, %v4988_v33  ;;  %v1718_v7 = vpop.permute.xlu1 %1717  ;;  %v5046_v37 = vpop.f32.mrf.mxu1  ;;  %3388 = vmatprep.mubr.bf16.mxu1 %v1968_v62 }
 0x276   : > { %v4991_v10 = vpop.f32.mrf.mxu0  ;;  %v8154_v41 = vadd.f32 %v5045_v43, %v7891_v14  ;;  %v1772_v33 = vmul.f32 %v1718_v7, %v9562_v57 }
 0x277   : > { %v8151_v63 = vadd.f32 %v4990_v9, %v3061_v39  ;;  %v5047_v55 = vpop.f32.mrf.mxu1 }
 0x278   : > { %9560 = vst [vmem:[#allocation100_spill] sm:$0xff] %v8154_v41  ;;  %v4992_v54 = vpop.f32.mrf.mxu0  ;;  %2349 = vperm.xlu1 %5436, %v9561_v29   ;;  %v5048_v34 = vadd.f32 %v5047_v55, %v5046_v37 }
 0x279   : > { %v4993_v50 = vadd.f32 %v4992_v54, %v4991_v10  ;;  %v1722_v46 = vpop.permute.xlu1 %1721  ;;  %v5049_v62 = vpop.f32.mrf.mxu1  ;;  %v3069_v10 = vadd.f32 %v7999_v38, %v7834_v24  ;;  %v5722_v54 = vld [vmem:[%s8971_s1 + $0xa0] sm:$0xff] }
 0x27a   : > { %v1773_v19 = vmul.f32 %v1722_v46, %v9563_v60  ;;  %v4994_v59 = vpop.f32.mrf.mxu0  ;;  %v8163_v14 = vadd.f32 %v5048_v34, %v7909_v12 }
 0x27b   : > { %v8160_v39 = vadd.f32 %v4993_v50, %v3064_v51  ;;  %v5050_v41 = vpop.f32.mrf.mxu1  ;;  %v9566_v50 = vld [vmem:[#allocation117_spill] sm:$0xff] }
 0x27c   : > { %9564 = vst [vmem:[#allocation105_spill] sm:$0xff] %v8163_v14  ;;  %v1792_v9 = vpack.c.bf16 %v1773_v19, %v1772_v33  ;;  %v4995_v43 = vpop.f32.mrf.mxu0  ;;  %5437 = vset.pattern.permute.xlu1 %v9398_v0  ;;  %v5051_v7 = vadd.f32 %v5050_v41, %v5049_v62  ;;  %v2286_v46 = vmul.f32 %v2190_v52, %v9566_v50  ;;  %v9567_v33 = vld [vmem:[#allocation114_spill] sm:$0xff] }
 0x27d   : > { %v4996_v37 = vadd.f32 %v4995_v43, %v4994_v59  ;;  %2229 = vperm.xlu1 %5437, %v5722_v54   ;;  %v5052_v29 = vpop.f32.mrf.mxu1  ;;  %v3072_v59 = vadd.f32 %v8015_v23, %v7834_v24 }
 0x27e   : > { %v4997_v55 = vpop.f32.mrf.mxu0  ;;  %3389 = vmatmul.mubr.bf16.gmra.mxu1 %v1792_v9  ;;  %v8174_v34 = vadd.f32 %v5051_v7, %v7922_v17  ;;  %v2194_v51 = vpop.permute.xlu1 %2193  ;;  %v9569_v7 = vld [vmem:[#allocation49_spill] sm:$0xff] }
 0x27f   : > { %v8171_v12 = vadd.f32 %v4996_v37, %v3069_v10  ;;  %v2287_v38 = vmul.f32 %v2194_v51, %v9567_v33  ;;  %v5053_v41 = vpop.f32.mrf.mxu1  ;;  %v9570_v51 = vld [vmem:[#allocation95_spill] sm:$0xff]  ;;  %v9571_v33 = vld [vmem:[#allocation124_spill] sm:$0xff] }
 0x280   : > { %9565 = vst [vmem:[#allocation23_spill] sm:$0xff] %v8174_v34  ;;  %v4998_v19 = vpop.f32.mrf.mxu0  ;;  %v5054_v43 = vadd.f32 %v5053_v41, %v5052_v29  ;;  %v2111_v50 = vmul.f32 %v9570_v51, %v9569_v7  ;;  %v3077_v7 = vadd.f32 %v8030_v5, %v7834_v24  ;;  %v9581_v5 = vld [vmem:[#allocation34_spill] sm:$0xff] }
 0x281   : > { %v4999_v62 = vadd.f32 %v4998_v19, %v4997_v55  ;;  %5438 = vset.pattern.permute.xlu1 %v9410_v45  ;;  %v2313_v9 = vpack.c.bf16 %v2287_v38, %v2286_v46  ;;  %v5055_v10 = vpop.f32.mrf.mxu1 }
 0x282   : > { %2053 = vperm.xlu1 %5438, %v5722_v54   ;;  %v8184_v17 = vadd.f32 %v5054_v43, %v7942_v27  ;;  %v8192_v54 = vld [vmem:[%s8971_s1 + $0xa8] sm:$0xff] }
 0x283   : > { %v8181_v37 = vadd.f32 %v4999_v62, %v3072_v59  ;;  %v2014_v52 = vpop.permute.xlu1 %2013  ;;  %v5056_v14 = vpop.f32.mrf.mxu1  ;;  %3493 = vmatprep.mubr.bf16.mxu0 %v2313_v9  ;;  %v9575_v62 = vld [vmem:[#allocation44_spill] sm:$0xff] }
 0x284   : > { %9568 = vst [vmem:[#allocation12_spill] sm:$0xff] %v8184_v17  ;;  %v2110_v34 = vmul.f32 %v2014_v52, %v9571_v33  ;;  %v5057_v23 = vadd.f32 %v5056_v14, %v5055_v10  ;;  %v9601_v17 = vld [vmem:[#allocation5_spill] sm:$0xff] }
 0x285   : > { %v5058_v29 = vpop.f32.mrf.mxu1 }
 0x286   : > { %v2137_v55 = vpack.c.bf16 %v2111_v50, %v2110_v34  ;;  %2057 = vperm.xlu1 %5438, %v8192_v54   ;;  %v8196_v27 = vadd.f32 %v5057_v23, %v7955_v61  ;;  %v9574_v34 = vld [vmem:[#allocation113_spill] sm:$0xff]  ;;  %v9576_v61 = vld [vmem:[#allocation87_spill] sm:$0xff] }
 0x287   : > { %v5059_v46 = vpop.f32.mrf.mxu1 }
 0x288   : > { %9572 = vst [vmem:[#allocation104_spill] sm:$0xff] %v8196_v27  ;;  %v1902_v38 = vpop.permute.xlu1 %1901  ;;  %3494 = vmatmul.mubr.bf16.gmra.mxu0 %v2137_v55  ;;  %v5060_v19 = vadd.f32 %v5059_v46, %v5058_v29  ;;  %v9578_v55 = vld [vmem:[#allocation110_spill] sm:$0xff]  ;;  %v3093_v27 = vadd.f32 %v8087_v1, %v7834_v24 }
 0x289   : > { %v5061_v33 = vpop.f32.mrf.mxu1  ;;  %v1950_v43 = vmul.f32 %v1902_v38, %v9575_v62  ;;  %v9579_v38 = vld [vmem:[#allocation32_spill] sm:$0xff] }
 0x28a   : > { %5439 = vset.pattern.permute.xlu1 %v9549_v20  ;;  %v8200_v14 = vadd.f32 %v5060_v19, %v7964_v11 }
 0x28b   : > { %2361 = vperm.xlu1 %5439, %v9574_v34   ;;  %v5000_v50 = vpop.f32.mrf.mxu0  ;;  %v5062_v41 = vpop.f32.mrf.mxu1 }
 0x28c   : > { %9573 = vst [vmem:[#allocation112_spill] sm:$0xff] %v8200_v14  ;;  %v1906_v59 = vpop.permute.xlu1 %1905  ;;  %v5063_v9 = vadd.f32 %v5062_v41, %v5061_v33  ;;  %v9580_v33 = vld [vmem:[#allocation123_spill] sm:$0xff] }
 0x28d   : > { %v1951_v10 = vmul.f32 %v1906_v59, %v9576_v61  ;;  %v5001_v52 = vpop.f32.mrf.mxu0  ;;  %v1774_v41 = vmul.f32 %v9580_v33, %v9579_v38  ;;  %v3080_v59 = vadd.f32 %v8047_v22, %v7834_v24 }
 0x28e   : > { %v5002_v51 = vadd.f32 %v5001_v52, %v5000_v50  ;;  %v8208_v23 = vadd.f32 %v5063_v9, %v7980_v3  ;;  %v2202_v3 = vpop.permute.xlu0 %2201 }
 0x28f   : > { %v1969_v11 = vpack.c.bf16 %v1951_v10, %v1950_v43  ;;  %2365 = vperm.xlu1 %5439, %v9578_v55   ;;  %v5003_v29 = vpop.f32.mrf.mxu0  ;;  %v8224_v10 = vld [vmem:[%s8971_s1 + $0xb0] sm:$0xff] }
 0x290   : > { %9577 = vst [vmem:[#allocation24_spill] sm:$0xff] %v8208_v23  ;;  %v8211_v46 = vadd.f32 %v5002_v51, %v3077_v7  ;;  %v9582_v51 = vld [vmem:[#allocation4_spill] sm:$0xff] }
 0x291   : > { %v1730_v19 = vpop.permute.xlu1 %1729  ;;  %v5004_v34 = vpop.f32.mrf.mxu0  ;;  %3396 = vmatprep.mubr.bf16.mxu1 %v1969_v11  ;;  %v2289_v22 = vmul.f32 %v2202_v3, %v9582_v51  ;;  %v9583_v11 = vld [vmem:[#allocation125_spill] sm:$0xff] }
 0x292   : > { %v1775_v50 = vmul.f32 %v1730_v19, %v9581_v5  ;;  %v5005_v52 = vadd.f32 %v5004_v34, %v5003_v29 }
 0x293   : > { %5440 = vset.pattern.permute.xlu1 %v9398_v0 }
 0x294   : > { %v1793_v43 = vpack.c.bf16 %v1775_v50, %v1774_v41  ;;  %v8219_v9 = vadd.f32 %v5005_v52, %v3080_v59  ;;  %2237 = vperm.xlu1 %5440, %v8224_v10   ;;  %v5725_v52 = vld [vmem:[%s8971_s1 + $0xb8] sm:$0xff] }
 0x296   : > { %v2198_v7 = vpop.permute.xlu1 %2197  ;;  %3397 = vmatmul.mubr.bf16.gmra.mxu1 %v1793_v43 }
 0x297   : > { %v2288_v55 = vmul.f32 %v2198_v7, %v9583_v11  ;;  %v5064_v29 = vpop.f32.mrf.mxu1 }
 0x298   : > { %5441 = vset.pattern.permute.xlu1 %v9410_v45 }
 0x299   : > { %v2314_v19 = vpack.c.bf16 %v2289_v22, %v2288_v55  ;;  %2061 = vperm.xlu1 %5441, %v8224_v10   ;;  %v5065_v34 = vpop.f32.mrf.mxu1  ;;  %v3085_v22 = vadd.f32 %v8056_v31, %v7834_v24  ;;  %v3088_v31 = vadd.f32 %v8073_v30, %v7834_v24 }
 0x29a   : > { %v5066_v33 = vadd.f32 %v5065_v34, %v5064_v29  ;;  %v9585_v29 = vld [vmem:[#allocation56_spill] sm:$0xff] }
 0x29b   : > { %v2022_v41 = vpop.permute.xlu1 %2021  ;;  %3501 = vmatprep.mubr.bf16.mxu0 %v2314_v19  ;;  %v5067_v59 = vpop.f32.mrf.mxu1 }
 0x29c   : > { %v8232_v50 = vadd.f32 %v5066_v33, %v7993_v13  ;;  %v2112_v34 = vmul.f32 %v2022_v41, %v9585_v29  ;;  %v9587_v13 = vld [vmem:[#allocation126_spill] sm:$0xff] }
 0x29d   : > { %2065 = vperm.xlu1 %5441, %v5725_v52   ;;  %v5006_v3 = vpop.f32.mrf.mxu0  ;;  %v5068_v43 = vpop.f32.mrf.mxu1 }
 0x29e   : > { %9584 = vst [vmem:[#allocation36_spill] sm:$0xff] %v8232_v50  ;;  %v5069_v7 = vadd.f32 %v5068_v43, %v5067_v59  ;;  %v9589_v59 = vld [vmem:[#allocation119_spill] sm:$0xff] }
 0x29f   : > { %v2026_v55 = vpop.permute.xlu1 %2025  ;;  %v5007_v51 = vpop.f32.mrf.mxu0 }
 0x2a0   : > { %v8241_v19 = vadd.f32 %v5069_v7, %v8007_v47  ;;  %v2113_v33 = vmul.f32 %v2026_v55, %v9587_v13  ;;  %v5008_v11 = vadd.f32 %v5007_v51, %v5006_v3  ;;  %v9590_v47 = vld [vmem:[#allocation21_spill] sm:$0xff]  ;;  %v9591_v7 = vld [vmem:[#allocation84_spill] sm:$0xff]  ;;  %v9594_v13 = vld [vmem:[#allocation118_spill] sm:$0xff] }
 0x2a1   : > { %5442 = vset.pattern.permute.xlu1 %v9549_v20  ;;  %v5009_v50 = vpop.f32.mrf.mxu0  ;;  %v1952_v29 = vmul.f32 %v9591_v7, %v9590_v47  ;;  %v9592_v55 = vld [vmem:[#allocation72_spill] sm:$0xff] }
 0x2a2   : > { %9586 = vst [vmem:[#allocation109_spill] sm:$0xff] %v8241_v19  ;;  %v2138_v52 = vpack.c.bf16 %v2113_v33, %v2112_v34  ;;  %v8245_v14 = vadd.f32 %v5008_v11, %v3085_v22  ;;  %2377 = vperm.xlu1 %5442, %v9589_v59   ;;  %v8256_v22 = vpop.permute.xlu0 %2213  ;;  %v9595_v33 = vld [vmem:[#allocation65_spill] sm:$0xff]  ;;  %v9596_v59 = vld [vmem:[#allocation22_spill] sm:$0xff]  ;;  %v9597_v19 = vld [vmem:[#allocation15_spill] sm:$0xff] }
 0x2a3   : > { %v5010_v43 = vpop.f32.mrf.mxu0  ;;  %v1777_v30 = vmul.f32 %v9596_v59, %v9595_v33 }
 0x2a4   : > { %9588 = vst [vmem:[#allocation115_spill] sm:$0xff] %v8245_v14  ;;  %v1914_v23 = vpop.permute.xlu1 %1913  ;;  %v5011_v41 = vadd.f32 %v5010_v43, %v5009_v50  ;;  %3502 = vmatmul.mubr.bf16.gmra.mxu0 %v2138_v52 }
 0x2a5   : > { %v1953_v51 = vmul.f32 %v1914_v23, %v9592_v55  ;;  %v5726_v23 = vld [vmem:[%s8971_s1 + $0xc0] sm:$0xff] }
 0x2a6   : > { %v8253_v3 = vadd.f32 %v5011_v41, %v3088_v31  ;;  %2381 = vperm.xlu1 %5442, %v9594_v13  }
 0x2a7   : > { %v1970_v11 = vpack.c.bf16 %v1953_v51, %v1952_v29  ;;  %v8265_v51 = vpop.permute.xlu0 %2225 }
 0x2a8   : > { %9593 = vst [vmem:[#allocation53_spill] sm:$0xff] %v8253_v3  ;;  %v9623_v3 = vld [vmem:[#allocation33_spill] sm:$0xff] }
 0x2a9   : > { %v1734_v34 = vpop.permute.xlu1 %1733  ;;  %3404 = vmatprep.mubr.bf16.mxu1 %v1970_v11 }
 0x2aa   : > { %v1776_v50 = vmul.f32 %v1734_v34, %v9597_v19  ;;  %5443 = vset.pattern.permute.xlu1 %v9398_v0  ;;  %v5070_v52 = vpop.f32.mrf.mxu1 }
 0x2ab   : > { %2245 = vperm.xlu1 %5443, %v5726_v23  }
 0x2ac   : > { %v1794_v43 = vpack.c.bf16 %v1777_v30, %v1776_v50  ;;  %v5071_v31 = vpop.f32.mrf.mxu1 }
 0x2ad   : > { %v5072_v41 = vadd.f32 %v5071_v31, %v5070_v52  ;;  %v9599_v52 = vld [vmem:[#allocation35_spill] sm:$0xff] }
 0x2ae   : > { %v2206_v7 = vpop.permute.xlu1 %2205  ;;  %3405 = vmatmul.mubr.bf16.gmra.mxu1 %v1794_v43  ;;  %v5073_v29 = vpop.f32.mrf.mxu1 }
 0x2af   : > { %v8268_v13 = vadd.f32 %v5072_v41, %v8021_v35  ;;  %5444 = vset.pattern.permute.xlu1 %v9410_v45  ;;  %v2290_v31 = vmul.f32 %v2206_v7, %v9599_v52 }
 0x2b0   : > { %2069 = vperm.xlu1 %5444, %v5726_v23   ;;  %v5012_v11 = vpop.f32.mrf.mxu0  ;;  %v5074_v34 = vpop.f32.mrf.mxu1  ;;  %v8281_v23 = vld [vmem:[%s8971_s1 + $0xc8] sm:$0xff] }
 0x2b1   : > { %9598 = vst [vmem:[#allocation48_spill] sm:$0xff] %v8268_v13  ;;  %v5075_v59 = vadd.f32 %v5074_v34, %v5073_v29  ;;  %v8286_v34 = vpop.permute.xlu0 %2233  ;;  %v9605_v13 = vld [vmem:[#allocation7_spill] sm:$0xff] }
 0x2b2   : > { %v2210_v30 = vpop.permute.xlu1 %2209  ;;  %v5013_v50 = vpop.f32.mrf.mxu0 }
 0x2b3   : > { %v8275_v43 = vadd.f32 %v5075_v59, %v8035_v40  ;;  %v2291_v6 = vmul.f32 %v2210_v30, %v9601_v17  ;;  %v5014_v35 = vadd.f32 %v5013_v50, %v5012_v11  ;;  %v3096_v40 = vadd.f32 %v8098_v56, %v7834_v24  ;;  %v9603_v11 = vld [vmem:[#allocation26_spill] sm:$0xff]  ;;  %v9604_v50 = vld [vmem:[#allocation128_spill] sm:$0xff] }
 0x2b4   : > { %2073 = vperm.xlu1 %5444, %v8281_v23   ;;  %v5015_v41 = vpop.f32.mrf.mxu0  ;;  %v2114_v17 = vmul.f32 %v9604_v50, %v9603_v11  ;;  %v9607_v24 = vld [vmem:[#allocation122_spill] sm:$0xff] }
 0x2b5   : > { %9600 = vst [vmem:[#allocation83_spill] sm:$0xff] %v8275_v43  ;;  %v2315_v29 = vpack.c.bf16 %v2291_v6, %v2290_v31  ;;  %v8284_v1 = vadd.f32 %v5014_v35, %v3093_v27  ;;  %v8297_v27 = vpop.permute.xlu0 %2241  ;;  %v9608_v56 = vld [vmem:[#allocation90_spill] sm:$0xff] }
 0x2b6   : > { %v5016_v7 = vpop.f32.mrf.mxu0  ;;  %v1955_v35 = vmul.f32 %v9608_v56, %v9607_v24  ;;  %v9622_v24 = vld [vmem:[#allocation55_spill] sm:$0xff] }
 0x2b7   : > { %9602 = vst [vmem:[#allocation86_spill] sm:$0xff] %v8284_v1  ;;  %v2034_v59 = vpop.permute.xlu1 %2033  ;;  %v5017_v30 = vadd.f32 %v5016_v7, %v5015_v41  ;;  %3509 = vmatprep.mubr.bf16.mxu0 %v2315_v29  ;;  %v9609_v41 = vld [vmem:[#allocation121_spill] sm:$0xff] }
 0x2b8   : > { %v2115_v52 = vmul.f32 %v2034_v59, %v9605_v13  ;;  %5445 = vset.pattern.permute.xlu1 %v9549_v20 }
 0x2b9   : > { %v8294_v43 = vadd.f32 %v5017_v30, %v3096_v40  ;;  %2393 = vperm.xlu1 %5445, %v8026_v8   ;;  %v8312_v30 = vld [vmem:[%s8971_s1 + $0xd0] sm:$0xff] }
 0x2ba   : > { %v2139_v6 = vpack.c.bf16 %v2115_v52, %v2114_v17  ;;  %v8304_v17 = vpop.permute.xlu0 %2249 }
 0x2bb   : > { %9606 = vst [vmem:[#allocation92_spill] sm:$0xff] %v8294_v43 }
 0x2bc   : > { %v1918_v31 = vpop.permute.xlu1 %1917  ;;  %3510 = vmatmul.mubr.bf16.gmra.mxu0 %v2139_v6 }
 0x2bd   : > { %v1954_v29 = vmul.f32 %v1918_v31, %v9609_v41  ;;  %2397 = vperm.xlu1 %5445, %v8104_v21   ;;  %v5076_v7 = vpop.f32.mrf.mxu1  ;;  %v9611_v31 = vld [vmem:[#allocation58_spill] sm:$0xff] }
 0x2bf   : > { %v1971_v13 = vpack.c.bf16 %v1955_v35, %v1954_v29  ;;  %v5077_v59 = vpop.f32.mrf.mxu1  ;;  %v9613_v29 = vld [vmem:[#allocation63_spill] sm:$0xff] }
 0x2c0   : > { %v5078_v11 = vadd.f32 %v5077_v59, %v5076_v7 }
 0x2c1   : > { %5446 = vset.pattern.permute.xlu1 %v9398_v0  ;;  %v1742_v40 = vpop.permute.xlu1 %1741  ;;  %3412 = vmatprep.mubr.bf16.mxu1 %v1971_v13  ;;  %v5079_v8 = vpop.f32.mrf.mxu1 }
 0x2c2   : > { %v8307_v52 = vadd.f32 %v5078_v11, %v8052_v26  ;;  %2253 = vperm.xlu1 %5446, %v8312_v30   ;;  %v1778_v56 = vmul.f32 %v1742_v40, %v9611_v31  ;;  %v8322_v26 = vpop.permute.xlu0 %2257  ;;  %v9614_v11 = vld [vmem:[#allocation37_spill] sm:$0xff] }
 0x2c3   : > { %v5080_v21 = vpop.f32.mrf.mxu1 }
 0x2c4   : > { %9610 = vst [vmem:[#allocation91_spill] sm:$0xff] %v8307_v52  ;;  %v5081_v50 = vadd.f32 %v5080_v21, %v5079_v8  ;;  %v2292_v8 = vmul.f32 %v8256_v22, %v9614_v11  ;;  %v9615_v21 = vld [vmem:[#allocation27_spill] sm:$0xff] }
 0x2c5   : > { %v1746_v6 = vpop.permute.xlu1 %1745  ;;  %v9619_v11 = vld [vmem:[#allocation127_spill] sm:$0xff] }
 0x2c6   : > { %v8317_v35 = vadd.f32 %v5081_v50, %v8064_v15  ;;  %v1779_v7 = vmul.f32 %v1746_v6, %v9613_v29  ;;  %5447 = vset.pattern.permute.xlu1 %v9410_v45  ;;  %v5729_v15 = vld [vmem:[%s8971_s1 + $0xd8] sm:$0xff]  ;;  %v8330_v50 = vpop.permute.xlu0 %2265 }
 0x2c7   : > { %2077 = vperm.xlu1 %5447, %v8312_v30  }
 0x2c8   : > { %9612 = vst [vmem:[#allocation102_spill] sm:$0xff] %v8317_v35  ;;  %v1795_v13 = vpack.c.bf16 %v1779_v7, %v1778_v56  ;;  %v9616_v56 = vld [vmem:[#allocation9_spill] sm:$0xff]  ;;  %v9618_v35 = vld [vmem:[#allocation10_spill] sm:$0xff] }
 0x2c9   : > { %v9617_v7 = vld [vmem:[#allocation93_spill] sm:$0xff] }
 0x2ca   : > { %v2218_v59 = vpop.permute.xlu1 %2217  ;;  %3413 = vmatmul.mubr.bf16.gmra.mxu1 %v1795_v13  ;;  %v2117_v13 = vmul.f32 %v9617_v7, %v9616_v56  ;;  %v9620_v56 = vld [vmem:[#allocation8_spill] sm:$0xff] }
 0x2cb   : > { %v2293_v52 = vmul.f32 %v2218_v59, %v9615_v21  ;;  %2081 = vperm.xlu1 %5447, %v5729_v15   ;;  %v8337_v59 = vpop.permute.xlu0 %2273 }
 0x2cd   : > { %v2316_v40 = vpack.c.bf16 %v2293_v52, %v2292_v8 }
 0x2cf   : > { %5448 = vset.pattern.permute.xlu1 %v9549_v20  ;;  %v2038_v6 = vpop.permute.xlu1 %2037  ;;  %3517 = vmatprep.mubr.bf16.mxu0 %v2316_v40 }
 0x2d0   : > { %v2116_v49 = vmul.f32 %v2038_v6, %v9618_v35  ;;  %2409 = vperm.xlu1 %5448, %v8192_v54   ;;  %v9621_v35 = vld [vmem:[#allocation98_spill] sm:$0xff] }
 0x2d2   : > { %v2140_v22 = vpack.c.bf16 %v2117_v13, %v2116_v49  ;;  %v2334_v49 = vpop.permute.xlu0 %2333 }
 0x2d3   : > { %v2454_v41 = vmul.f32 %v2334_v49, %v9622_v24 }
 0x2d4   : > { %2413 = vperm.xlu1 %5448, %v8224_v10   ;;  %v2326_v15 = vpop.permute.xlu1 %2325  ;;  %3518 = vmatmul.mubr.bf16.gmra.mxu0 %v2140_v22 }
 0x2d5   : > { %v5082_v52 = vpop.f32.mrf.mxu1  ;;  %v2452_v43 = vmul.f32 %v2326_v15, %v9619_v11 }
 0x2d7   : > { %v5083_v8 = vpop.f32.mrf.mxu1 }
 0x2d8   : > { %5449 = vset.pattern.permute.xlu1 %v9398_v0  ;;  %v2330_v21 = vpop.permute.xlu1 %2329  ;;  %v5084_v40 = vadd.f32 %v5083_v8, %v5082_v52  ;;  %v9625_v8 = vld [vmem:[#allocation57_spill] sm:$0xff] }
 0x2d9   : > { %v2453_v7 = vmul.f32 %v2330_v21, %v9620_v56  ;;  %2261 = vperm.xlu1 %5449, %v9621_v35   ;;  %v5085_v54 = vpop.f32.mrf.mxu1 }
 0x2da   : > { %v8345_v6 = vadd.f32 %v5084_v40, %v8081_v44  ;;  %v2295_v44 = vmul.f32 %v8265_v51, %v7090_v48 }
 0x2db   : > { %v2484_v10 = vpack.c.bf16 %v2453_v7, %v2452_v43  ;;  %v5086_v13 = vpop.f32.mrf.mxu1  ;;  %v9626_v7 = vld [vmem:[#allocation29_spill] sm:$0xff] }
 0x2dc   : > { %v2338_v22 = vpop.permute.xlu1 %2337  ;;  %v5087_v1 = vadd.f32 %v5086_v13, %v5085_v54  ;;  %v9627_v54 = vld [vmem:[#allocation28_spill] sm:$0xff] }
 0x2dd   : > { %v2455_v14 = vmul.f32 %v2338_v22, %v9623_v3  ;;  %5450 = vset.pattern.permute.xlu1 %v9410_v45  ;;  %5316 = vmatprep.mubr.bf16.mxu1 %v2484_v10  ;;  %v5730_v3 = vld [vmem:[%s8971_s1 + $0xe8] sm:$0xff] }
 0x2de   : > { %v8351_v11 = vadd.f32 %v5087_v1, %v8092_v32  ;;  %2085 = vperm.xlu1 %5450, %v9621_v35   ;;  %v2342_v1 = vpop.permute.xlu0 %2341 }
 0x2df   : > { %v2485_v21 = vpack.c.bf16 %v2455_v14, %v2454_v41  ;;  %v9624_v41 = vld [vmem:[#allocation43_spill] sm:$0xff]  ;;  %v2456_v35 = vmul.f32 %v2342_v1, %v9626_v7 }
 0x2e1   : > { %v2222_v15 = vpop.permute.xlu1 %2221  ;;  %5317 = vmatmul.mubr.bf16.vlgmr.msra.gmra.mxu1 %v2485_v21 }
 0x2e2   : > { %v2294_v43 = vmul.f32 %v2222_v15, %v9545_v28  ;;  %2089 = vperm.xlu1 %5450, %v5730_v3   ;;  %v9628_v15 = vld [vmem:[#allocation31_spill] sm:$0xff] }
 0x2e4   : > { %v2317_v24 = vpack.c.bf16 %v2295_v44, %v2294_v43  ;;  %v9629_v43 = vld [vmem:[#allocation66_spill] sm:$0xff] }
 0x2e6   : > { %5451 = vset.pattern.permute.xlu1 %v9549_v20  ;;  %v2046_v32 = vpop.permute.xlu1 %2045  ;;  %3525 = vmatprep.mubr.bf16.mxu0 %v2317_v24 }
 0x2e7   : > { %2425 = vperm.xlu1 %5451, %v8281_v23   ;;  %v2118_v52 = vmul.f32 %v2046_v32, %v9624_v41  ;;  %v2354_v23 = vpop.permute.xlu0 %2353 }
 0x2e8   : > { %v2459_v44 = vmul.f32 %v2354_v23, %v9628_v15  ;;  %v9632_v23 = vld [vmem:[#allocation41_spill] sm:$0xff] }
 0x2ea   : > { %v2050_v14 = vpop.permute.xlu1 %2049 }
 0x2eb   : > { %v2119_v51 = vmul.f32 %v2050_v14, %v9625_v8  ;;  %2429 = vperm.xlu1 %5451, %v8312_v30   ;;  %v2297_v8 = vmul.f32 %v8286_v34, %v7175_v53 }
 0x2ed   : > { %v2141_v40 = vpack.c.bf16 %v2119_v51, %v2118_v52 }
 0x2ef   : > { %5452 = vset.pattern.permute.xlu1 %v9398_v0  ;;  %v2346_v56 = vpop.permute.xlu1 %2345  ;;  %3526 = vmatmul.mubr.bf16.gmra.mxu0 %v2141_v40  ;;  %v9630_v40 = vld [vmem:[#allocation60_spill] sm:$0xff] }
 0x2f0   : > { %v2457_v49 = vmul.f32 %v2346_v56, %v9627_v54  ;;  %2269 = vperm.xlu1 %5452, %v7975_v58   ;;  %v9631_v54 = vld [vmem:[#allocation11_spill] sm:$0xff] }
 0x2f1   : > { %v5088_v10 = vpop.f32.mrf.mxu1 }
 0x2f2   : > { %v2486_v13 = vpack.c.bf16 %v2457_v49, %v2456_v35  ;;  %v2358_v35 = vpop.permute.xlu0 %2357 }
 0x2f3   : > { %v2350_v22 = vpop.permute.xlu1 %2349  ;;  %v5089_v21 = vpop.f32.mrf.mxu1 }
 0x2f4   : > { %v2458_v30 = vmul.f32 %v2350_v22, %v9629_v43  ;;  %5454 = vset.pattern.permute.xlu1 %v9410_v45  ;;  %v5090_v0 = vadd.f32 %v5089_v21, %v5088_v10  ;;  %5320 = vmatprep.mubr.bf16.mxu1 %v2486_v13  ;;  %v3974_v13 = vld [vmem:[#allocation3] sm:$0x1]  ;;  %v9634_v21 = vld [vmem:[#allocation45_spill] sm:$0xff] }
 0x2f5   : > { %2093 = vperm.xlu1 %5454, %v7975_v58   ;;  %v5091_v24 = vpop.f32.mrf.mxu1  ;;  %v2460_v15 = vmul.f32 %v2358_v35, %v9634_v21 }
 0x2f6   : > { %v2487_v32 = vpack.c.bf16 %v2459_v44, %v2458_v30  ;;  %v8374_v14 = vadd.f32 %v5090_v0, %v8107_v2 }
 0x2f7   : > { %v5092_v1 = vpop.f32.mrf.mxu1 }
 0x2f8   : > { %v2230_v41 = vpop.permute.xlu1 %2229  ;;  %v5093_v52 = vadd.f32 %v5092_v1, %v5091_v24  ;;  %5321 = vmatmul.mubr.bf16.gmra.mxu1 %v2487_v32  ;;  %v9636_v24 = vld [vmem:[#allocation16_spill] sm:$0xff]  ;;  %v9637_v1 = vld [vmem:[#allocation50_spill] sm:$0xff] }
 0x2f9   : > { %v2296_v51 = vmul.f32 %v2230_v41, %v7193_v4  ;;  %2097 = vperm.xlu1 %5454, %v9630_v40  }
 0x2fa   : > { %v8381_v45 = vadd.f32 %v5093_v52, %v8113_v18  ;;  %v9633_v18 = vmov 0  }
 0x2fb   : > { %v2318_v56 = vpack.c.bf16 %v2297_v8, %v2296_v51 }
 0x2fd   : > { %5455 = vset.pattern.permute.xlu1 %v9549_v20  ;;  %v2054_v7 = vpop.permute.xlu1 %2053  ;;  %3533 = vmatprep.mubr.bf16.mxu0 %v2318_v56  ;;  %v9635_v20 = vld [vmem:[#allocation54_spill] sm:$0xff] }
 0x2fe   : > { %2441 = vperm.xlu1 %5455, %v5730_v3   ;;  %v2120_v49 = vmul.f32 %v2054_v7, %v9631_v54  ;;  %v2370_v3 = vpop.permute.xlu0 %2369  ;;  %v2299_v7 = vmul.f32 %v8297_v27, %v9563_v60  ;;  %v9640_v27 = vld [vmem:[#allocation79_spill] sm:$0xff] }
 0x2ff   : > { %v2463_v32 = vmul.f32 %v2370_v3, %v9636_v24  ;;  %v9641_v3 = vld [vmem:[#allocation52_spill] sm:$0xff] }
 0x301   : > { %v2058_v2 = vpop.permute.xlu1 %2057 }
 0x302   : > { %v2121_v10 = vmul.f32 %v2058_v2, %v9632_v23  ;;  %2445 = vperm.xlu1 %5455, %v7975_v58  }
 0x304   : > { %v2142_v34 = vpack.c.bf16 %v2121_v10, %v2120_v49 }
 0x306   : > { %v2362_v22 = vpop.permute.xlu1 %2361  ;;  %3534 = vmatmul.mubr.bf16.gmra.mxu0 %v2142_v34  ;;  %5456 = vset.pattern.permute.xlu1 %v9633_v18  ;;  %v9639_v18 = vld [vmem:[#allocation13_spill] sm:$0xff] }
 0x307   : > { %v2461_v44 = vmul.f32 %v2362_v22, %v9635_v20  ;;  %3977 = vperm.xlu1 %5456, %v3974_v13   ;;  %v2374_v13 = vpop.permute.xlu0 %2373  ;;  %v9638_v22 = vld [vmem:[#allocation14_spill] sm:$0xff] }
 0x309   : > { %v2488_v43 = vpack.c.bf16 %v2461_v44, %v2460_v15  ;;  %v2464_v44 = vmul.f32 %v2374_v13, %v9640_v27 }
 0x30a   : > { %v2366_v30 = vpop.permute.xlu1 %2365  ;;  %v5094_v0 = vpop.f32.mrf.mxu1 }
 0x30b   : > { %v2462_v41 = vmul.f32 %v2366_v30, %v9637_v1  ;;  %5324 = vmatprep.mubr.bf16.mxu1 %v2488_v43  ;;  %v2386_v30 = vpop.permute.xlu0 %2385  ;;  %v9643_v1 = vld [vmem:[#allocation18_spill] sm:$0xff] }
 0x30c   : > { %v5095_v58 = vpop.f32.mrf.mxu1 }
 0x30d   : > { %v2489_v52 = vpack.c.bf16 %v2463_v32, %v2462_v41  ;;  %v5096_v8 = vadd.f32 %v5095_v58, %v5094_v0 }
 0x30e   : > { %v5097_v51 = vpop.f32.mrf.mxu1 }
 0x30f   : > { %v8393_v40 = vadd.f32 %v5096_v8, %v8126_v42  ;;  %v2238_v56 = vpop.permute.xlu1 %2237  ;;  %5325 = vmatmul.mubr.bf16.gmra.mxu1 %v2489_v52 }
 0x310   : > { %v2298_v2 = vmul.f32 %v2238_v56, %v9562_v57  ;;  %v5098_v35 = vpop.f32.mrf.mxu1 }
 0x311   : > { %v5099_v54 = vadd.f32 %v5098_v35, %v5097_v51 }
 0x312   : > { %v2319_v49 = vpack.c.bf16 %v2299_v7, %v2298_v2  ;;  %v2301_v2 = vmul.f32 %v8304_v17, %v9581_v5 }
 0x313   : > { %v8399_v23 = vadd.f32 %v5099_v54, %v8138_v36  ;;  %v9642_v36 = vld [vmem:[#allocation17_spill] sm:$0xff] }
 0x314   : > { %v2062_v10 = vpop.permute.xlu1 %2061  ;;  %3541 = vmatprep.mubr.bf16.mxu0 %v2319_v49  ;;  %v2467_v32 = vmul.f32 %v2386_v30, %v9642_v36 }
 0x315   : > { %v2122_v42 = vmul.f32 %v2062_v10, %v9638_v22 }
 0x318   : > { %v2066_v34 = vpop.permute.xlu1 %2065 }
 0x319   : > { %v2123_v21 = vmul.f32 %v2066_v34, %v9639_v18  ;;  %v2390_v18 = vpop.permute.xlu0 %2389 }
 0x31b   : > { %v2143_v15 = vpack.c.bf16 %v2123_v21, %v2122_v42  ;;  %v9644_v21 = vld [vmem:[#allocation38_spill] sm:$0xff] }
 0x31d   : > { %v2378_v20 = vpop.permute.xlu1 %2377  ;;  %3542 = vmatmul.mubr.bf16.gmra.mxu0 %v2143_v15 }
 0x31e   : > { %v2465_v43 = vmul.f32 %v2378_v20, %v9641_v3  ;;  %v9645_v20 = vld [vmem:[#allocation71_spill] sm:$0xff] }
 0x320   : > { %v2490_v0 = vpack.c.bf16 %v2465_v43, %v2464_v44  ;;  %v9647_v43 = vld [vmem:[#allocation40_spill] sm:$0xff] }
 0x321   : > { %v2382_v24 = vpop.permute.xlu1 %2381 }
 0x322   : > { %v2466_v41 = vmul.f32 %v2382_v24, %v9643_v1  ;;  %v5100_v58 = vpop.f32.mrf.mxu1  ;;  %5328 = vmatprep.mubr.bf16.mxu1 %v2490_v0  ;;  %v2402_v0 = vpop.permute.xlu0 %2401  ;;  %v9649_v1 = vld [vmem:[#allocation75_spill] sm:$0xff] }
 0x324   : > { %v2491_v52 = vpack.c.bf16 %v2467_v32, %v2466_v41  ;;  %v5101_v8 = vpop.f32.mrf.mxu1 }
 0x325   : > { %v5102_v51 = vadd.f32 %v5101_v8, %v5100_v58  ;;  %v2303_v8 = vmul.f32 %v8322_v26, %v9595_v33  ;;  %v4236_v33 = vld [vmem:[%s8977_s7 + $0xe0] sm:$0xff] }
 0x326   : > { %v2246_v56 = vpop.permute.xlu1 %2245  ;;  %v5103_v7 = vpop.f32.mrf.mxu1  ;;  %5329 = vmatmul.mubr.bf16.gmra.mxu1 %v2491_v52 }
 0x327   : > { %v8410_v35 = vadd.f32 %v5102_v51, %v8151_v63  ;;  %v2300_v54 = vmul.f32 %v2246_v56, %v9579_v38  ;;  %v9646_v63 = vld [vmem:[#allocation42_spill] sm:$0xff] }
 0x328   : > { %v5104_v49 = vpop.f32.mrf.mxu1  ;;  %v2468_v3 = vmul.f32 %v2390_v18, %v9646_v63 }
 0x329   : > { %v2320_v10 = vpack.c.bf16 %v2301_v2, %v2300_v54  ;;  %v5105_v34 = vadd.f32 %v5104_v49, %v5103_v7 }
 0x32b   : > { %v8414_v13 = vadd.f32 %v5105_v34, %v8160_v39  ;;  %v2070_v22 = vpop.permute.xlu1 %2069  ;;  %3549 = vmatprep.mubr.bf16.mxu0 %v2320_v10  ;;  %v9648_v39 = vld [vmem:[#allocation82_spill] sm:$0xff] }
 0x32c   : > { %v2124_v15 = vmul.f32 %v2070_v22, %v9644_v21  ;;  %v2471_v32 = vmul.f32 %v2402_v0, %v9648_v39  ;;  %v2406_v21 = vpop.permute.xlu0 %2405 }
 0x32f   : > { %v2074_v42 = vpop.permute.xlu1 %2073 }
 0x330   : > { %v2125_v27 = vmul.f32 %v2074_v42, %v9645_v20 }
 0x332   : > { %v2144_v17 = vpack.c.bf16 %v2125_v27, %v2124_v15  ;;  %v9650_v15 = vld [vmem:[#allocation78_spill] sm:$0xff]  ;;  %v9652_v27 = vld [vmem:[#allocation51_spill] sm:$0xff] }
 0x334   : > { %v2394_v44 = vpop.permute.xlu1 %2393  ;;  %3550 = vmatmul.mubr.bf16.gmra.mxu0 %v2144_v17 }
 0x335   : > { %v2469_v30 = vmul.f32 %v2394_v44, %v9647_v43 }
 0x337   : > { %v2492_v24 = vpack.c.bf16 %v2469_v30, %v2468_v3  ;;  %v9653_v3 = vld [vmem:[#allocation59_spill] sm:$0xff]  ;;  %v9654_v30 = vld [vmem:[#allocation20_spill] sm:$0xff] }
 0x338   : > { %v2398_v36 = vpop.permute.xlu1 %2397  ;;  %v2472_v43 = vmul.f32 %v2406_v21, %v9653_v3 }
 0x339   : > { %v2470_v41 = vmul.f32 %v2398_v36, %v9649_v1  ;;  %5332 = vmatprep.mubr.bf16.mxu1 %v2492_v24 }
 0x33b   : > { %v2493_v58 = vpack.c.bf16 %v2471_v32, %v2470_v41  ;;  %v2305_v41 = vmul.f32 %v8330_v50, %v9613_v29 }
 0x33d   : > { %v2254_v52 = vpop.permute.xlu1 %2253  ;;  %5333 = vmatmul.mubr.bf16.gmra.mxu1 %v2493_v58 }
 0x33e   : > { %v2302_v51 = vmul.f32 %v2254_v52, %v9597_v19  ;;  %v5106_v56 = vpop.f32.mrf.mxu1  ;;  %v4235_v19 = vld [vmem:[%s8977_s7 + $0xd8] sm:$0xff] }
 0x340   : > { %v2321_v7 = vpack.c.bf16 %v2303_v8, %v2302_v51  ;;  %v5107_v2 = vpop.f32.mrf.mxu1 }
 0x341   : > { %v5108_v54 = vadd.f32 %v5107_v2, %v5106_v56 }
 0x342   : > { %v2078_v49 = vpop.permute.xlu1 %2077  ;;  %v5109_v10 = vpop.f32.mrf.mxu1  ;;  %3557 = vmatprep.mubr.bf16.mxu0 %v2321_v7 }
 0x343   : > { %v8426_v34 = vadd.f32 %v5108_v54, %v8171_v12  ;;  %v2126_v20 = vmul.f32 %v2078_v49, %v9650_v15  ;;  %v2418_v12 = vpop.permute.xlu0 %2417 }
 0x344   : > { %v5110_v22 = vpop.f32.mrf.mxu1  ;;  %v2475_v39 = vmul.f32 %v2418_v12, %v9556_v25 }
 0x345   : > { %v5111_v42 = vadd.f32 %v5110_v22, %v5109_v10  ;;  %v9655_v22 = vld [vmem:[#allocation70_spill] sm:$0xff] }
 0x346   : > { %v2082_v18 = vpop.permute.xlu1 %2081 }
 0x347   : > { %v8430_v26 = vadd.f32 %v5111_v42, %v8181_v37  ;;  %v2127_v17 = vmul.f32 %v2082_v18, %v9652_v27  ;;  %v2422_v10 = vpop.permute.xlu0 %2421  ;;  %v9656_v18 = vld [vmem:[#allocation69_spill] sm:$0xff] }
 0x348   : > { %v2476_v27 = vmul.f32 %v2422_v10, %v9575_v62  ;;  %v9658_v62 = vld [vmem:[#allocation68_spill] sm:$0xff] }
 0x349   : > { %9651 = vst [vmem:[#allocation99_spill] sm:$0xff] %v8430_v26  ;;  %v2145_v44 = vpack.c.bf16 %v2127_v17, %v2126_v20 }
 0x34b   : > { %v2410_v63 = vpop.permute.xlu1 %2409  ;;  %3558 = vmatmul.mubr.bf16.gmra.mxu0 %v2145_v44  ;;  %v8450_v44 = vpop.f32.mrf.mxu0 }
 0x34c   : > { %v2473_v0 = vmul.f32 %v2410_v63, %v9654_v30 }
 0x34e   : > { %v2494_v24 = vpack.c.bf16 %v2473_v0, %v2472_v43  ;;  %v5147_v0 = vpop.f32.mrf.mxu0 }
 0x34f   : > { %v2414_v36 = vpop.permute.xlu1 %2413 }
 0x350   : > { %v2474_v32 = vmul.f32 %v2414_v36, %v9558_v16  ;;  %5336 = vmatprep.mubr.bf16.mxu1 %v2494_v24  ;;  %v9657_v24 = vld [vmem:[#allocation64_spill] sm:$0xff] }
 0x351   : > { %v2307_v36 = vmul.f32 %v8337_v59, %v9657_v24 }
 0x352   : > { %v2495_v1 = vpack.c.bf16 %v2475_v39, %v2474_v32 }
 0x354   : > { %v2262_v37 = vpop.permute.xlu1 %2261  ;;  %5337 = vmatmul.mubr.bf16.gmra.mxu1 %v2495_v1 }
 0x355   : > { %v2304_v58 = vmul.f32 %v2262_v37, %v9611_v31 }
 0x356   : > { %v5112_v52 = vpop.f32.mrf.mxu1 }
 0x357   : > { %v2322_v8 = vpack.c.bf16 %v2305_v41, %v2304_v58 }
 0x358   : > { %v5113_v51 = vpop.f32.mrf.mxu1 }
 0x359   : > { %v5114_v56 = vadd.f32 %v5113_v51, %v5112_v52  ;;  %v2086_v7 = vpop.permute.xlu1 %2085  ;;  %3565 = vmatprep.mubr.bf16.mxu0 %v2322_v8  ;;  %v9659_v8 = vld [vmem:[#allocation115_spill] sm:$0xff] }
 0x35a   : > { %v5115_v2 = vpop.f32.mrf.mxu1  ;;  %v2128_v42 = vmul.f32 %v2086_v7, %v9655_v22 }
 0x35b   : > { %v8441_v25 = vadd.f32 %v5114_v56, %v8211_v46  ;;  %v2434_v46 = vpop.permute.xlu0 %2433 }
 0x35c   : > { %v5116_v16 = vpop.f32.mrf.mxu1  ;;  %v2479_v43 = vmul.f32 %v2434_v46, %v9592_v55 }
 0x35d   : > { %v5117_v54 = vadd.f32 %v5116_v16, %v5115_v2  ;;  %v2090_v49 = vpop.permute.xlu1 %2089  ;;  %v9661_v16 = vld [vmem:[#allocation74_spill] sm:$0xff] }
 0x35e   : > { %v2129_v50 = vmul.f32 %v2090_v49, %v9656_v18  ;;  %v9663_v18 = vld [vmem:[#allocation53_spill] sm:$0xff] }
 0x35f   : > { %v8446_v21 = vadd.f32 %v5117_v54, %v8219_v9  ;;  %v2438_v2 = vpop.permute.xlu0 %2437  ;;  %v9662_v54 = vld [vmem:[#allocation77_spill] sm:$0xff] }
 0x360   : > { %v2146_v15 = vpack.c.bf16 %v2129_v50, %v2128_v42 }
 0x362   : > { %v2426_v20 = vpop.permute.xlu1 %2425  ;;  %3566 = vmatmul.mubr.bf16.gmra.mxu0 %v2146_v15 }
 0x363   : > { %v2477_v17 = vmul.f32 %v2426_v20, %v9576_v61  ;;  %v5149_v61 = vpop.f32.mrf.mxu0  ;;  %v9665_v20 = vld [vmem:[#allocation121_spill] sm:$0xff] }
 0x365   : > { %v2496_v63 = vpack.c.bf16 %v2477_v17, %v2476_v27  ;;  %v5150_v58 = vpop.f32.mrf.mxu0  ;;  %v2480_v27 = vmul.f32 %v2438_v2, %v9665_v20  ;;  %v9666_v17 = vld [vmem:[#allocation122_spill] sm:$0xff] }
 0x366   : > { %v2430_v3 = vpop.permute.xlu1 %2429 }
 0x367   : > { %v2478_v30 = vmul.f32 %v2430_v3, %v9590_v47  ;;  %5340 = vmatprep.mubr.bf16.mxu1 %v2496_v63  ;;  %v5152_v47 = vpop.f32.mrf.mxu0  ;;  %v2450_v63 = vpop.permute.xlu0 %2449 }
 0x369   : > { %v2497_v9 = vpack.c.bf16 %v2479_v43, %v2478_v30  ;;  %v5153_v22 = vpop.f32.mrf.mxu0 }
 0x36b   : > { %v2270_v12 = vpop.permute.xlu1 %2269  ;;  %5341 = vmatmul.mubr.bf16.gmra.mxu1 %v2497_v9  ;;  %v5155_v3 = vpop.f32.mrf.mxu0  ;;  %v9667_v9 = vld [vmem:[#allocation25_spill] sm:$0xff] }
 0x36c   : > { %v2306_v39 = vmul.f32 %v2270_v12, %v9658_v62  ;;  %v2483_v12 = vmul.f32 %v2450_v63, %v9667_v9  ;;  %v5148_v63 = vadd.f32 %v5147_v0, %v8450_v44  ;;  %v8489_v44 = vld [vmem:[%s8975_s5] ss:$0 sm:$0xff] }
 0x36e   : > { %v2323_v32 = vpack.c.bf16 %v2307_v36, %v2306_v39  ;;  %v5118_v1 = vpop.f32.mrf.mxu1  ;;  %v9668_v36 = vld [vmem:[#allocation6_spill] sm:$0xff] }
 0x370   : > { %v2094_v37 = vpop.permute.xlu1 %2093  ;;  %v5119_v41 = vpop.f32.mrf.mxu1  ;;  %3573 = vmatprep.mubr.bf16.mxu0 %v2323_v32 }
 0x371   : > { %v5120_v55 = vadd.f32 %v5119_v41, %v5118_v1  ;;  %v2130_v59 = vmul.f32 %v2094_v37, %v9661_v16  ;;  %v5156_v32 = vpop.f32.mrf.mxu0 }
 0x372   : > { %v5121_v52 = vpop.f32.mrf.mxu1 }
 0x373   : > { %v8458_v51 = vadd.f32 %v5120_v55, %v9659_v8  ;;  %v5158_v37 = vpop.f32.mrf.mxu0 }
 0x374   : > { %v2098_v56 = vpop.permute.xlu1 %2097  ;;  %v5122_v7 = vpop.f32.mrf.mxu1 }
 0x375   : > { %9660 = vst [vmem:[#allocation47_spill] sm:$0xff] %v8458_v51  ;;  %v2131_v49 = vmul.f32 %v2098_v56, %v9662_v54  ;;  %v5123_v10 = vadd.f32 %v5122_v7, %v5121_v52  ;;  %v5159_v41 = vpop.f32.mrf.mxu0  ;;  %v9687_v51 = vld [vmem:[#allocation24_spill] sm:$0xff] }
 0x377   : > { %v2147_v42 = vpack.c.bf16 %v2131_v49, %v2130_v59  ;;  %v8463_v50 = vadd.f32 %v5123_v10, %v9663_v18  ;;  %v5161_v55 = vpop.f32.mrf.mxu0  ;;  %v9669_v59 = vld [vmem:[#allocation86_spill] sm:$0xff]  ;;  %v9671_v18 = vld [vmem:[#allocation92_spill] sm:$0xff] }
 0x379   : > { %9664 = vst [vmem:[#allocation107_spill] sm:$0xff] %v8463_v50  ;;  %v2442_v15 = vpop.permute.xlu1 %2441  ;;  %3574 = vmatmul.mubr.bf16.gmra.mxu0 %v2147_v42  ;;  %v5162_v56 = vpop.f32.mrf.mxu0 }
 0x37a   : > { %v2481_v46 = vmul.f32 %v2442_v15, %v9666_v17  ;;  %v5154_v17 = vadd.f32 %v5153_v22, %v5152_v47 }
 0x37b   : > { %v5164_v16 = vpop.f32.mrf.mxu0 }
 0x37c   : > { %v2498_v43 = vpack.c.bf16 %v2481_v46, %v2480_v27 }
 0x37d   : > { %v2446_v30 = vpop.permute.xlu1 %2445  ;;  %v5165_v42 = vpop.f32.mrf.mxu0 }
 0x37e   : > { %v2482_v39 = vmul.f32 %v2446_v30, %v9668_v36  ;;  %5344 = vmatprep.mubr.bf16.mxu1 %v2498_v43  ;;  %v5157_v43 = vadd.f32 %v5156_v32, %v5155_v3  ;;  %v9673_v30 = vld [vmem:[#allocation67_spill] sm:$0xff] }
 0x37f   : > { %v5167_v20 = vpop.f32.mrf.mxu0  ;;  %v3464_v9 = vadd.f32 %v5154_v17, %v9673_v30  ;;  %v9677_v3 = vld [vmem:[#allocation103_spill] sm:$0xff]  ;;  %v9678_v30 = vld [vmem:[#allocation73_spill] sm:$0xff] }
 0x380   : > { %v2499_v1 = vpack.c.bf16 %v2483_v12, %v2482_v39  ;;  %v5151_v39 = vadd.f32 %v5150_v58, %v5149_v61 }
 0x381   : > { %v5168_v27 = vpop.f32.mrf.mxu0 }
 0x382   : > { %5345 = vmatmul.mubr.bf16.gmra.mxu1 %v2499_v1  ;;  %v3459_v32 = vadd.f32 %v5151_v39, %v9677_v3 }
 0x383   : > { %v8475_v46 = vpop.f32.mrf.mxu0 }
 0x385   : > { %v8479_v12 = vpop.f32.mrf.mxu0 }
 0x387   : > { %v8484_v22 = vpop.f32.mrf.mxu0 }
 0x38a   : > { %v5124_v52 = vpop.f32.mrf.mxu1 }
 0x38c   : > { %v5125_v8 = vpop.f32.mrf.mxu1 }
 0x38d   : > { %v5126_v7 = vadd.f32 %v5125_v8, %v5124_v52  ;;  %v9674_v52 = vld [vmem:[#allocation96_spill] sm:$0xff] }
 0x38e   : > { %v5127_v2 = vpop.f32.mrf.mxu1  ;;  %v3456_v8 = vadd.f32 %v5148_v63, %v9674_v52 }
 0x38f   : > { %v8470_v54 = vadd.f32 %v5126_v7, %v9669_v59 }
 0x390   : > { %v5128_v49 = vpop.f32.mrf.mxu1 }
 0x391   : > { %9670 = vst [vmem:[#allocation106_spill] sm:$0xff] %v8470_v54  ;;  %v5129_v10 = vadd.f32 %v5128_v49, %v5127_v2  ;;  %v9675_v2 = vld [vmem:[#allocation76_spill] sm:$0xff] }
 0x393   : > { %v8473_v15 = vadd.f32 %v5129_v10, %v9671_v18  ;;  %v9676_v10 = vld [vmem:[#allocation100_spill] sm:$0xff] }
 0x394   : > { %v3467_v47 = vadd.f32 %v5157_v43, %v9676_v10  ;;  %v5166_v10 = vadd.f32 %v5165_v42, %v5164_v16  ;;  %v9682_v16 = vld [vmem:[#allocation104_spill] sm:$0xff] }
 0x395   : > { %9672 = vst [vmem:[#allocation116_spill] sm:$0xff] %v8473_v15  ;;  %v5172_v15 = vadd.f32 %v8479_v12, %v8475_v46  ;;  %v9688_v46 = vld [vmem:[#allocation112_spill] sm:$0xff] }
 0x397   : > { %v3488_v12 = vadd.f32 %v5172_v15, %v9688_v46  ;;  %v9690_v15 = vld [vmem:[#allocation97_spill] sm:$0xff] }
 0x3a1   : > { %v5318_v36 = vpop.f32.mrf.mxu1 }
 0x3a2   : > { %v3625_v1 = vadd.f32 %v5318_v36, %v3464_v9 }
 0x3a3   : > { %v3616_v7 = vpop.f32.mrf.mxu1 }
 0x3a4   : > { %v3745_v59 = vadd.f32 %v3625_v1, %v9675_v2  ;;  %v3617_v49 = vadd.f32 %v3616_v7, %v3456_v8  ;;  %v8495_v1 = vpop.f32.mrf.mxu0 }
 0x3a5   : > { %v5319_v18 = vpop.f32.mrf.mxu1  ;;  %v5175_v29 = vadd.f32 %v8495_v1, %v8484_v22  ;;  %v4234_v22 = vld [vmem:[%s8977_s7 + $0xd0] sm:$0xff] }
 0x3a6   : > { %v3777_v0 = vmax.f32 %v3745_v59, 0.0  ;;  %v3743_v61 = vadd.f32 %v3617_v49, %v9658_v62  ;;  %v3628_v58 = vadd.f32 %v5319_v18, %v3467_v47  ;;  %v8499_v2 = vpop.f32.mrf.mxu0  ;;  %v5160_v18 = vadd.f32 %v5159_v41, %v5158_v37 }
 0x3a7   : > { %v3619_v17 = vpop.f32.mrf.mxu1  ;;  %v3491_v54 = vadd.f32 %v5175_v29, %v9687_v51 }
 0x3a8   : > { %v3775_v63 = vmax.f32 %v3743_v61, 0.0  ;;  %v3746_v9 = vadd.f32 %v3628_v58, %v9678_v30  ;;  %v3620_v36 = vadd.f32 %v3619_v17, %v3459_v32  ;;  %v3880_v43 = vmul.f32 %v8489_v44, %v3777_v0  ;;  %v8502_v59 = vpop.f32.mrf.mxu0  ;;  %v9679_v61 = vld [vmem:[#allocation12_spill] sm:$0xff]  ;;  %v9680_v30 = vld [vmem:[#allocation105_spill] sm:$0xff] }
 0x3a9   : > { %v3480_v58 = vadd.f32 %v5166_v10, %v9679_v61  ;;  %v5163_v32 = vadd.f32 %v5162_v56, %v5161_v55  ;;  %v9685_v10 = vld [vmem:[#allocation89_spill] sm:$0xff]  ;;  %v5178_v1 = vadd.f32 %v8502_v59, %v8499_v2  ;;  %v9689_v2 = vld [vmem:[#allocation36_spill] sm:$0xff] }
 0x3aa   : > { %v3778_v52 = vmax.f32 %v3746_v9, 0.0  ;;  %v3744_v8 = vadd.f32 %v3620_v36, %v9657_v24  ;;  %3914 = vadd.xlane.f32.xlu1 %v3880_v43  ;;  %v3878_v7 = vmul.f32 %v8489_v44, %v3775_v63  ;;  %v8505_v47 = vpop.f32.mrf.mxu0  ;;  %v5169_v24 = vadd.f32 %v5168_v27, %v5167_v20  ;;  %v9681_v43 = vld [vmem:[#allocation94_spill] sm:$0xff]  ;;  %v9683_v20 = vld [vmem:[#allocation85_spill] sm:$0xff] }
 0x3ab   : > { %v3472_v9 = vadd.f32 %v5160_v18, %v9680_v30  ;;  %v9686_v30 = vld [vmem:[#allocation81_spill] sm:$0xff]  ;;  %v3496_v59 = vadd.f32 %v5178_v1, %v9689_v2  ;;  %v9697_v2 = vld [vmem:[#allocation91_spill] sm:$0xff] }
 0x3ac   : > { %v3776_v62 = vmax.f32 %v3744_v8, 0.0  ;;  %3910 = vadd.xlane.f32.xlu0 %v3878_v7  ;;  %v3881_v39 = vmul.f32 %v8489_v44, %v3778_v52  ;;  %v8507_v0 = vpop.f32.mrf.mxu0  ;;  %v3483_v42 = vadd.f32 %v5169_v24, %v9682_v16  ;;  %v9693_v1 = vld [vmem:[#allocation109_spill] sm:$0xff] }
 0x3ae   : > { %3916 = vadd.xlane.f32.xlu1 %v3881_v39  ;;  %v3879_v49 = vmul.f32 %v8489_v44, %v3776_v62  ;;  %v8510_v17 = vpop.f32.mrf.mxu0  ;;  %v9684_v39 = vld [vmem:[#allocation23_spill] sm:$0xff] }
 0x3af   : > { %v3475_v55 = vadd.f32 %v5163_v32, %v9684_v39 }
 0x3b0   : > { %v8515_v37 = vpop.f32.mrf.mxu0 }
 0x3b2   : > { %3912 = vadd.xlane.f32.xlu1 %v3879_v49 }
 0x3b8   : > { %v5322_v3 = vpop.f32.mrf.mxu1 }
 0x3b9   : > { %v3641_v63 = vadd.f32 %v5322_v3, %v3480_v58  ;;  %v5185_v3 = vpop.f32.mrf.mxu0 }
 0x3ba   : > { %v3632_v36 = vpop.f32.mrf.mxu1 }
 0x3bb   : > { %v3749_v52 = vadd.f32 %v3641_v63, %v9681_v43  ;;  %v3633_v8 = vadd.f32 %v3632_v36, %v3472_v9 }
 0x3bc   : > { %v5323_v7 = vpop.f32.mrf.mxu1 }
 0x3bd   : > { %v3781_v41 = vmax.f32 %v3749_v52, 0.0  ;;  %v3747_v27 = vadd.f32 %v3633_v8, %v9683_v20  ;;  %v3644_v62 = vadd.f32 %v5323_v7, %v3483_v42  ;;  %v5186_v52 = vpop.f32.mrf.mxu0 }
 0x3be   : > { %v3635_v56 = vpop.f32.mrf.mxu1  ;;  %v5187_v5 = vadd.f32 %v5186_v52, %v5185_v3 }
 0x3bf   : > { %v3779_v49 = vmax.f32 %v3747_v27, 0.0  ;;  %v3750_v61 = vadd.f32 %v3644_v62, %v9685_v10  ;;  %v3636_v18 = vadd.f32 %v3635_v56, %v3475_v55  ;;  %v3884_v58 = vmul.f32 %v8489_v44, %v3781_v41  ;;  %v5188_v8 = vpop.f32.mrf.mxu0 }
 0x3c1   : > { %v3782_v63 = vmax.f32 %v3750_v61, 0.0  ;;  %v3748_v24 = vadd.f32 %v3636_v18, %v9686_v30  ;;  %3922 = vadd.xlane.f32.xlu0 %v3884_v58  ;;  %v3882_v9 = vmul.f32 %v8489_v44, %v3779_v49  ;;  %v5189_v16 = vpop.f32.mrf.mxu0 }
 0x3c2   : > { %v5190_v29 = vadd.f32 %v5189_v16, %v5188_v8  ;;  %v9695_v8 = vld [vmem:[#allocation35_spill] sm:$0xff] }
 0x3c3   : > { %v3780_v36 = vmax.f32 %v3748_v24, 0.0  ;;  %3918 = vadd.xlane.f32.xlu1 %v3882_v9  ;;  %v3885_v43 = vmul.f32 %v8489_v44, %v3782_v63  ;;  %v8525_v42 = vpop.f32.mrf.mxu0 }
 0x3c5   : > { %3924 = vadd.xlane.f32.xlu0 %v3885_v43  ;;  %v3883_v32 = vmul.f32 %v8489_v44, %v3780_v36  ;;  %v8527_v7 = vpop.f32.mrf.mxu0  ;;  %v4239_v36 = vld [vmem:[%s8977_s7 + $0xf8] sm:$0xff]  ;;  %v4238_v43 = vld [vmem:[%s8977_s7 + $0xf0] sm:$0xff] }
 0x3c6   : > { %4496 = vmatprep.subr.mxu0 %v4239_v36 }
 0x3c7   : > { %3920 = vadd.xlane.f32.xlu1 %v3883_v32  ;;  %v5194_v41 = vpop.f32.mrf.mxu0  ;;  %v4237_v32 = vld [vmem:[%s8977_s7 + $0xe8] sm:$0xff]  ;;  %4497 = vmatpush1.msra.mxu0 %v4238_v43 }
 0x3c8   : > { %4498 = vmatprep.subr.mxu0 %v4237_v32  ;;  %v5181_v32 = vadd.f32 %v8507_v0, %v8505_v47  ;;  %v5184_v0 = vadd.f32 %v8515_v37, %v8510_v17 }
 0x3c9   : > { %v5195_v20 = vpop.f32.mrf.mxu0  ;;  %4499 = vmatpush1.msra.mxu0 %v4236_v33 }
 0x3ca   : > { %v5196_v43 = vadd.f32 %v5195_v20, %v5194_v41  ;;  %4500 = vmatprep.subr.mxu0 %v4235_v19  ;;  %v3499_v46 = vadd.f32 %v5181_v32, %v9693_v1  ;;  %v9698_v32 = vld [vmem:[#allocation48_spill] sm:$0xff] }
 0x3cb   : > { %v8529_v27 = vpop.f32.mrf.mxu0  ;;  %4501 = vmatpush1.msra.mxu0 %v4234_v22 }
 0x3cc   : > { %v3520_v19 = vadd.f32 %v5196_v43, %v8345_v6  ;;  %v9696_v43 = vld [vmem:[#allocation111_spill] sm:$0xff] }
 0x3cd   : > { %v8531_v62 = vpop.f32.mrf.mxu0 }
 0x3cf   : > { %v5326_v39 = vpop.f32.mrf.mxu1  ;;  %v5200_v55 = vpop.f32.mrf.mxu0 }
 0x3d0   : > { %v3657_v51 = vadd.f32 %v5326_v39, %v3496_v59  ;;  %v5193_v39 = vadd.f32 %v8527_v7, %v8525_v42  ;;  %v3512_v59 = vadd.f32 %v5190_v29, %v9697_v2  ;;  %v9701_v29 = vld [vmem:[#allocation108_spill] sm:$0xff] }
 0x3d1   : > { %v3648_v56 = vpop.f32.mrf.mxu1  ;;  %v5201_v49 = vpop.f32.mrf.mxu0 }
 0x3d2   : > { %v5202_v31 = vadd.f32 %v5201_v49, %v5200_v55  ;;  %v3649_v41 = vadd.f32 %v3648_v56, %v3488_v12  ;;  %v9694_v56 = vld [vmem:[#allocation101_spill] sm:$0xff] }
 0x3d3   : > { %v5327_v10 = vpop.f32.mrf.mxu1  ;;  %v5203_v61 = vpop.f32.mrf.mxu0 }
 0x3d4   : > { %v3528_v49 = vadd.f32 %v5202_v31, %v8374_v14  ;;  %v9692_v14 = vld [vmem:[#allocation37_spill] sm:$0xff]  ;;  %v3751_v12 = vadd.f32 %v3649_v41, %v9694_v56  ;;  %v3504_v41 = vadd.f32 %v5184_v0, %v9698_v32 }
 0x3d5   : > { %v3651_v18 = vpop.f32.mrf.mxu1  ;;  %v5204_v58 = vpop.f32.mrf.mxu0 }
 0x3d6   : > { %v3652_v55 = vadd.f32 %v3651_v18, %v3491_v54  ;;  %v9691_v18 = vld [vmem:[#allocation83_spill] sm:$0xff]  ;;  %v5205_v37 = vadd.f32 %v5204_v58, %v5203_v61  ;;  %v5199_v58 = vadd.f32 %v8531_v62, %v8529_v27 }
 0x3d7   : > { %v8533_v30 = vpop.f32.mrf.mxu0  ;;  %v3507_v31 = vadd.f32 %v5187_v5, %v9691_v18 }
 0x3d8   : > { %v3752_v54 = vadd.f32 %v3652_v55, %v9690_v15  ;;  %v3753_v55 = vadd.f32 %v3657_v51, %v9696_v43  ;;  %v9699_v15 = vld [vmem:[#allocation114_spill] sm:$0xff] }
 0x3d9   : > { %v8537_v9 = vpop.f32.mrf.mxu0  ;;  %v9700_v51 = vld [vmem:[#allocation102_spill] sm:$0xff] }
 0x3da   : > { %v5208_v32 = vadd.f32 %v8537_v9, %v8533_v30 }
 0x3db   : > { %v8565_v36 = vpop.f32.mrf.mxu0 }
 0x3dd   : > { %v8572_v26 = vpop.f32.mrf.mxu0 }
 0x3df   : > { %v5212_v3 = vpop.f32.mrf.mxu0 }
 0x3e1   : > { %v5213_v5 = vpop.f32.mrf.mxu0 }
 0x3e2   : > { %v5214_v2 = vadd.f32 %v5213_v5, %v5212_v3 }
 0x3e3   : > { %v5215_v7 = vpop.f32.mrf.mxu0 }
 0x3e6   : > { %v5330_v63 = vpop.f32.mrf.mxu1 }
 0x3e8   : > { %v8535_v24 = vpop.f32.mrf.mxu1 }
 0x3ea   : > { %v8553_v50 = vpop.f32.mrf.mxu1 }
 0x3ec   : > { %v3667_v60 = vpop.f32.mrf.mxu1 }
 0x3fd   : > { %v5334_v33 = vpop.f32.mrf.mxu1 }
 0x3fe   : > { %v3689_v20 = vadd.f32 %v5334_v33, %v3528_v49  ;;  %v3668_v49 = vadd.f32 %v3667_v60, %v3507_v31  ;;  %v3660_v33 = vadd.f32 %v5327_v10, %v3499_v46  ;;  %v3783_v60 = vmax.f32 %v3751_v12, 0.0  ;;  %v5216_v12 = vpop.f32.mrf.mxu0 }
 0x3ff   : > { %v3680_v52 = vpop.f32.mrf.mxu1  ;;  %v3515_v31 = vadd.f32 %v5193_v39, %v9700_v51  ;;  %v9704_v39 = vld [vmem:[#allocation4_spill] sm:$0xff] }
 0x400   : > { %v3761_v22 = vadd.f32 %v3689_v20, %v9692_v14  ;;  %v3681_v47 = vadd.f32 %v3680_v52, %v3520_v19  ;;  %v3784_v20 = vmax.f32 %v3752_v54, 0.0  ;;  %v3673_v52 = vadd.f32 %v5330_v63, %v3512_v59  ;;  %v5218_v27 = vpop.f32.mrf.mxu0 }
 0x401   : > { %v3756_v18 = vadd.f32 %v3668_v49, %v9699_v15  ;;  %v3785_v14 = vmax.f32 %v3753_v55, 0.0  ;;  %v3754_v10 = vadd.f32 %v3660_v33, %v9701_v29  ;;  %v3665_v54 = vadd.f32 %v8535_v24, %v3504_v41  ;;  %v9703_v24 = vld [vmem:[#allocation117_spill] sm:$0xff]  ;;  %v9705_v33 = vld [vmem:[#allocation27_spill] sm:$0xff] }
 0x402   : > { %v3793_v6 = vmax.f32 %v3761_v22, 0.0  ;;  %v3759_v16 = vadd.f32 %v3681_v47, %v9695_v8  ;;  %v3887_v61 = vmul.f32 %v8489_v44, %v3784_v20  ;;  %v3531_v63 = vadd.f32 %v5205_v37, %v8381_v45  ;;  %v5335_v22 = vpop.f32.mrf.mxu1  ;;  %v9702_v47 = vld [vmem:[#allocation125_spill] sm:$0xff]  ;;  %v5219_v37 = vpop.f32.mrf.mxu0 }
 0x403   : > { %v3757_v0 = vadd.f32 %v3673_v52, %v9702_v47  ;;  %v3676_v1 = vadd.f32 %v8553_v50, %v3515_v31  ;;  %v3788_v46 = vmax.f32 %v3756_v18, 0.0  ;;  %v3886_v56 = vmul.f32 %v8489_v44, %v3783_v60  ;;  %v9706_v15 = vld [vmem:[#allocation5_spill] sm:$0xff] }
 0x404   : > { %v3791_v19 = vmax.f32 %v3759_v16, 0.0  ;;  %v3896_v17 = vmul.f32 %v8489_v44, %v3793_v6  ;;  %v3786_v49 = vmax.f32 %v3754_v10, 0.0  ;;  %v3755_v6 = vadd.f32 %v3665_v54, %v9703_v24  ;;  %v3683_v62 = vpop.f32.mrf.mxu1 }
 0x405   : > { %v3692_v8 = vadd.f32 %v5335_v22, %v3531_v63  ;;  %v3888_v16 = vmul.f32 %v8489_v44, %v3785_v14  ;;  %v3789_v45 = vmax.f32 %v3757_v0, 0.0  ;;  %v3758_v43 = vadd.f32 %v3676_v1, %v9704_v39 }
 0x406   : > { %3946 = vadd.xlane.f32.xlu0 %v3896_v17  ;;  %v3894_v42 = vmul.f32 %v8489_v44, %v3791_v19  ;;  %v3523_v55 = vadd.f32 %v5199_v58, %v8351_v11  ;;  %v3891_v50 = vmul.f32 %v8489_v44, %v3788_v46  ;;  %v3787_v59 = vmax.f32 %v3755_v6, 0.0 }
 0x407   : > { %v3762_v20 = vadd.f32 %v3692_v8, %v9705_v33  ;;  %v3889_v17 = vmul.f32 %v8489_v44, %v3786_v49  ;;  %v3790_v41 = vmax.f32 %v3758_v43, 0.0  ;;  %v3892_v60 = vmul.f32 %v8489_v44, %v3789_v45 }
 0x408   : > { %3942 = vadd.xlane.f32.xlu1 %v3894_v42  ;;  %v3684_v19 = vadd.f32 %v3683_v62, %v3523_v55  ;;  %v3544_v11 = vadd.f32 %v5214_v2, %v8410_v35  ;;  %v3890_v18 = vmul.f32 %v8489_v44, %v3787_v59  ;;  %v5221_v42 = vpop.f32.mrf.mxu0  ;;  %v5217_v31 = vadd.f32 %v5216_v12, %v5215_v7 }
 0x409   : > { %v3794_v52 = vmax.f32 %v3762_v20, 0.0  ;;  %v3536_v14 = vadd.f32 %v5208_v32, %v8393_v40  ;;  %v3893_v30 = vmul.f32 %v8489_v44, %v3790_v41  ;;  %v5211_v63 = vadd.f32 %v8572_v26, %v8565_v36  ;;  %v3978_v20 = vpop.permute.xlu1 %3977 }
 0x40a   : > { %3928 = vadd.xlane.f32.xlu0 %v3887_v61  ;;  %v3760_v3 = vadd.f32 %v3684_v19, %v9706_v15  ;;  %v5222_v61 = vpop.f32.mrf.mxu0  ;;  %v3547_v7 = vadd.f32 %v5217_v31, %v8414_v13  ;;  %v5220_v62 = vadd.f32 %v5219_v37, %v5218_v27 }
 0x40b   : > { %v3897_v54 = vmul.f32 %v8489_v44, %v3794_v52  ;;  %v3539_v46 = vadd.f32 %v5211_v63, %v8399_v23 }
 0x40c   : > { %3926 = vadd.xlane.f32.xlu1 %v3886_v56  ;;  %v3792_v9 = vmax.f32 %v3760_v3, 0.0  ;;  %v5224_v40 = vpop.f32.mrf.mxu0  ;;  %v9708_v3 = vld [vmem:[#allocation34_spill] sm:$0xff] }
 0x40e   : > { %3930 = vadd.xlane.f32.xlu0 %v3888_v16  ;;  %v3895_v1 = vmul.f32 %v8489_v44, %v3792_v9  ;;  %v5225_v56 = vpop.f32.mrf.mxu0 }
 0x40f   : > { %v5226_v8 = vadd.f32 %v5225_v56, %v5224_v40  ;;  %v4226_v56 = vld [vmem:[%s8977_s7 + $0x90] sm:$0xff] }
 0x410   : > { %3936 = vadd.xlane.f32.xlu1 %v3891_v50  ;;  %v5227_v13 = vpop.f32.mrf.mxu0  ;;  %v5223_v50 = vadd.f32 %v5222_v61, %v5221_v42  ;;  %v4231_v61 = vld [vmem:[%s8977_s7 + $0xb8] sm:$0xff] }
 0x412   : > { %3932 = vadd.xlane.f32.xlu0 %v3889_v17  ;;  %v5228_v16 = vpop.f32.mrf.mxu0 }
 0x413   : > { %v5229_v39 = vadd.f32 %v5228_v16, %v5227_v13 }
 0x414   : > { %v5338_v5 = vpop.f32.mrf.mxu1  ;;  %3938 = vadd.xlane.f32.xlu1 %v3892_v60 }
 0x415   : > { %v3705_v51 = vadd.f32 %v5338_v5, %v3544_v11  ;;  %v3563_v17 = vadd.f32 %v5229_v39, %v8446_v21  ;;  %v9707_v11 = vld [vmem:[#allocation99_spill] sm:$0xff]  ;;  %v4233_v21 = vld [vmem:[%s8977_s7 + $0xc8] sm:$0xff] }
 0x416   : > { %v3696_v29 = vpop.f32.mrf.mxu1  ;;  %3934 = vadd.xlane.f32.xlu0 %v3890_v18  ;;  %v3555_v52 = vadd.f32 %v5223_v50, %v9707_v11  ;;  %4502 = vmatprep.subr.mxu0 %v4233_v21  ;;  %v9715_v11 = vld [vmem:[#allocation15_spill] sm:$0xff] }
 0x417   : > { %v3765_v10 = vadd.f32 %v3705_v51, %v7193_v4  ;;  %v3697_v35 = vadd.f32 %v3696_v29, %v3536_v14  ;;  %v9709_v14 = vld [vmem:[#allocation30_spill] sm:$0xff] }
 0x418   : > { %3940 = vadd.xlane.f32.xlu1 %v3893_v30  ;;  %v5339_v58 = vpop.f32.mrf.mxu1 }
 0x419   : > { %v3797_v22 = vmax.f32 %v3765_v10, 0.0  ;;  %v3763_v47 = vadd.f32 %v3697_v35, %v9545_v28  ;;  %v3708_v0 = vadd.f32 %v5339_v58, %v3547_v7  ;;  %v9710_v10 = vld [vmem:[#allocation61_spill] sm:$0xff] }
 0x41a   : > { %3948 = vadd.xlane.f32.xlu0 %v3897_v54  ;;  %v3699_v4 = vpop.f32.mrf.mxu1  ;;  %v3982_v35 = vsub.s32 0, %v9710_v10  ;;  %v4230_v58 = vld [vmem:[%s8977_s7 + $0xb0] sm:$0xff] }
 0x41b   : > { %v3795_v12 = vmax.f32 %v3763_v47, 0.0  ;;  %v3766_v49 = vadd.f32 %v3708_v0, %v7175_v53  ;;  %v3700_v24 = vadd.f32 %v3699_v4, %v3539_v46  ;;  %v3900_v26 = vmul.f32 %v8489_v44, %v3797_v22  ;;  %v4229_v22 = vld [vmem:[%s8977_s7 + $0xa8] sm:$0xff]  ;;  %v4228_v47 = vld [vmem:[%s8977_s7 + $0xa0] sm:$0xff]  ;;  %v4227_v0 = vld [vmem:[%s8977_s7 + $0x98] sm:$0xff] }
 0x41c   : > { %v3560_v53 = vadd.f32 %v5226_v8, %v8441_v25 }
 0x41d   : > { %v3798_v36 = vmax.f32 %v3766_v49, 0.0  ;;  %v3764_v6 = vadd.f32 %v3700_v24, %v7090_v48  ;;  %v3898_v28 = vmul.f32 %v8489_v44, %v3795_v12  ;;  %v3552_v48 = vadd.f32 %v5220_v62, %v8426_v34  ;;  %v4225_v49 = vld [vmem:[%s8977_s7 + $0x88] sm:$0xff] }
 0x41e   : > { %3944 = vadd.xlane.f32.xlu0 %v3895_v1  ;;  %v8666_v1 = vrot.slane %v3978_v20, %v3982_v35 }
 0x41f   : > { %v3796_v23 = vmax.f32 %v3764_v6, 0.0  ;;  %v3901_v45 = vmul.f32 %v8489_v44, %v3798_v36  ;;  %v4224_v36 = vld [vmem:[%s8977_s7 + $0x80] sm:$0xff] }
 0x421   : > { %v3899_v59 = vmul.f32 %v8489_v44, %v3796_v23  ;;  %v9711_v23 = vld [vmem:[#allocation106_spill] sm:$0xff] }
 0x422   : > { %3954 = vadd.xlane.f32.xlu0 %v3900_v26  ;;  %v8631_v43 = vpop.f32.mrf.mxu0 }
 0x424   : > { %v5231_v37 = vpop.f32.mrf.mxu0 }
 0x426   : > { %3950 = vadd.xlane.f32.xlu0 %v3898_v28  ;;  %v5232_v28 = vadd.f32 %v5231_v37, %v8631_v43 }
 0x42a   : > { %3956 = vadd.xlane.f32.xlu0 %v3901_v45 }
 0x42b   : > { %v5342_v55 = vpop.f32.mrf.mxu1 }
 0x42c   : > { %v3721_v2 = vadd.f32 %v5342_v55, %v3560_v53 }
 0x42d   : > { %v3712_v33 = vpop.f32.mrf.mxu1 }
 0x42e   : > { %v3769_v27 = vadd.f32 %v3721_v2, %v9579_v38  ;;  %v3713_v19 = vadd.f32 %v3712_v33, %v3552_v48  ;;  %3952 = vadd.xlane.f32.xlu0 %v3899_v59  ;;  %v5233_v38 = vpop.f32.mrf.mxu0  ;;  %v9712_v59 = vld [vmem:[#allocation47_spill] sm:$0xff] }
 0x42f   : > { %v5343_v32 = vpop.f32.mrf.mxu1  ;;  %v3568_v33 = vadd.f32 %v5232_v28, %v9712_v59  ;;  %v4213_v59 = vld [vmem:[%s8977_s7 + $0x28] sm:$0xff] }
 0x430   : > { %v3801_v25 = vmax.f32 %v3769_v27, 0.0  ;;  %v3767_v41 = vadd.f32 %v3713_v19, %v9562_v57  ;;  %v3724_v60 = vadd.f32 %v5343_v32, %v3563_v17  ;;  %v4232_v57 = vld [vmem:[%s8977_s7 + $0xc0] sm:$0xff]  ;;  %v5234_v9 = vpop.f32.mrf.mxu0  ;;  %v9713_v27 = vld [vmem:[#allocation58_spill] sm:$0xff] }
 0x431   : > { %v3715_v15 = vpop.f32.mrf.mxu1  ;;  %4503 = vmatpush1.msra.mxu0 %v4232_v57  ;;  %v5235_v50 = vadd.f32 %v5234_v9, %v5233_v38  ;;  %v9714_v32 = vld [vmem:[#allocation116_spill] sm:$0xff]  ;;  %v9718_v9 = vld [vmem:[#allocation63_spill] sm:$0xff] }
 0x432   : > { %v3799_v34 = vmax.f32 %v3767_v41, 0.0  ;;  %v3770_v5 = vadd.f32 %v3724_v60, %v9708_v3  ;;  %v3716_v18 = vadd.f32 %v3715_v15, %v3555_v52  ;;  %v3904_v42 = vmul.f32 %v8489_v44, %v3801_v25  ;;  %4504 = vmatprep.subr.mxu0 %v4231_v61  ;;  %v9716_v15 = vld [vmem:[#allocation107_spill] sm:$0xff] }
 0x433   : > { %v3915_v51 = vpop.xlane.xlu1 %3914  ;;  %4505 = vmatpush1.msra.mxu0 %v4230_v58  ;;  %v4223_v3 = vld [vmem:[%s8977_s7 + $0x78] sm:$0xff] }
 0x434   : > { %3962 = vadd.xlane.f32.xlu0 %v3904_v42  ;;  %v3802_v31 = vmax.f32 %v3770_v5, 0.0  ;;  %v3768_v29 = vadd.f32 %v3716_v18, %v9709_v14  ;;  %v3902_v30 = vmul.f32 %v8489_v44, %v3799_v34  ;;  %4506 = vmatprep.subr.mxu0 %v4229_v22  ;;  %v3986_v39 = vadd.f32 %v8666_v1, %v3915_v51  ;;  %v4222_v5 = vld [vmem:[%s8977_s7 + $0x70] sm:$0xff]  ;;  %v4221_v22 = vld [vmem:[%s8977_s7 + $0x68] sm:$0xff] }
 0x435   : > { %v3911_v12 = vpop.xlane.xlu0 %3910  ;;  %4507 = vmatpush1.msra.mxu0 %v4228_v47  ;;  %v3571_v34 = vadd.f32 %v5235_v50, %v9716_v15  ;;  %v9717_v14 = vld [vmem:[#allocation65_spill] sm:$0xff]  ;;  %v4220_v47 = vld [vmem:[%s8977_s7 + $0x60] sm:$0xff] }
 0x436   : > { %v3800_v7 = vmax.f32 %v3768_v29, 0.0  ;;  %v3905_v40 = vmul.f32 %v8489_v44, %v3802_v31  ;;  %4508 = vmatprep.subr.mxu0 %v4227_v0  ;;  %v3984_v8 = vadd.f32 %v8666_v1, %v3911_v12  ;;  %v4744_v37 = vmul.f32 -1.442695, %v3986_v39  ;;  %v4214_v39 = vld [vmem:[%s8977_s7 + $0x30] sm:$0xff]  ;;  %v4209_v15 = vld [vmem:[%s8977_s7 + $0x8] sm:$0xff] }
 0x437   : > { %v3917_v54 = vpop.xlane.xlu1 %3916  ;;  %4509 = vmatpush1.msra.mxu0 %v4226_v56  ;;  %v4218_v56 = vld [vmem:[%s8977_s7 + $0x50] sm:$0xff] }
 0x438   : > { %3958 = vadd.xlane.f32.xlu0 %v3902_v30  ;;  %v3903_v6 = vmul.f32 %v8489_v44, %v3800_v7  ;;  %4510 = vmatprep.subr.mxu0 %v4225_v49  ;;  %v4742_v2 = vmul.f32 -1.442695, %v3984_v8  ;;  %v3987_v43 = vadd.f32 %v8666_v1, %v3917_v54  ;;  %v4217_v8 = vld [vmem:[%s8977_s7 + $0x48] sm:$0xff] }
 0x439   : > { %v5236_v63 = vpop.f32.mrf.mxu0  ;;  %4511 = vmatpush1.msra.mxu0 %v4224_v36 }
 0x43a   : > { %v4745_v18 = vmul.f32 -1.442695, %v3987_v43  ;;  %4512 = vmatprep.subr.mxu0 %v4223_v3  ;;  %v4211_v43 = vld [vmem:[%s8977_s7 + $0x18] sm:$0xff] }
 0x43b   : > { %v5237_v4 = vpop.f32.mrf.mxu0  ;;  %v3913_v46 = vpop.xlane.xlu1 %3912  ;;  %4513 = vmatpush1.msra.mxu0 %v4222_v5  ;;  %v4271_v3 = vld [vmem:[%s8977_s7 + $0x1f8] sm:$0xff] }
 0x43c   : > { %3964 = vadd.xlane.f32.xlu0 %v3905_v40  ;;  %v5238_v24 = vadd.f32 %v5237_v4, %v5236_v63  ;;  %v3985_v26 = vadd.f32 %v8666_v1, %v3913_v46  ;;  %4514 = vmatprep.subr.mxu0 %v4221_v22  ;;  %v4219_v46 = vld [vmem:[%s8977_s7 + $0x58] sm:$0xff] }
 0x43d   : > { %v5239_v13 = vpop.f32.mrf.mxu0  ;;  %4515 = vmatpush1.msra.mxu0 %v4220_v47 }
 0x43e   : > { %v4743_v62 = vmul.f32 -1.442695, %v3985_v26  ;;  %v3576_v45 = vadd.f32 %v5238_v24, %v9711_v23  ;;  %4516 = vmatprep.subr.mxu0 %v4219_v46 }
 0x43f   : > { %v5240_v16 = vpop.f32.mrf.mxu0  ;;  %4517 = vmatpush1.msra.mxu0 %v4218_v56 }
 0x440   : > { %3960 = vadd.xlane.f32.xlu0 %v3903_v6  ;;  %v5241_v53 = vadd.f32 %v5240_v16, %v5239_v13  ;;  %5530 = vpow2.f32 %v4743_v62  ;;  %v4216_v16 = vld [vmem:[%s8977_s7 + $0x40] sm:$0xff]  ;;  %4518 = vmatprep.subr.mxu0 %v4217_v8 }
 0x441   : > { %5532 = vpow2.f32 %v4742_v2  ;;  %4519 = vmatpush1.msra.mxu0 %v4216_v16 }
 0x442   : > { %v5346_v55 = vpop.f32.mrf.mxu1  ;;  %v3579_v25 = vadd.f32 %v5241_v53, %v9714_v32  ;;  %5534 = vpow2.f32 %v4744_v37 }
 0x443   : > { %v3737_v48 = vadd.f32 %v5346_v55, %v3576_v45  ;;  %5536 = vpow2.f32 %v4745_v18  ;;  %v4215_v45 = vld [vmem:[%s8977_s7 + $0x38] sm:$0xff]  ;;  %v4270_v18 = vld [vmem:[%s8977_s7 + $0x1f0] sm:$0xff] }
 0x444   : > { %v3728_v20 = vpop.f32.mrf.mxu1  ;;  %4520 = vmatprep.subr.mxu0 %v4215_v45 }
 0x445   : > { %v3773_v19 = vadd.f32 %v3737_v48, %v9713_v27  ;;  %v3729_v17 = vadd.f32 %v3728_v20, %v3568_v33  ;;  %4521 = vmatpush1.msra.mxu0 %v4214_v39  ;;  %v4212_v33 = vld [vmem:[%s8977_s7 + $0x20] sm:$0xff]  ;;  %v4210_v20 = vld [vmem:[%s8977_s7 + $0x10] sm:$0xff]  ;;  %v4261_v39 = vld [vmem:[%s8977_s7 + $0x1a8] sm:$0xff] }
 0x446   : > { %v5347_v41 = vpop.f32.mrf.mxu1  ;;  %4522 = vmatprep.subr.mxu0 %v4213_v59 }
 0x447   : > { %v3805_v60 = vmax.f32 %v3773_v19, 0.0  ;;  %v3771_v52 = vadd.f32 %v3729_v17, %v9715_v11  ;;  %v3740_v42 = vadd.f32 %v5347_v41, %v3579_v25  ;;  %4523 = vmatpush1.msra.mxu0 %v4212_v33  ;;  %v9719_v19 = vlaneseq }
 0x448   : > { %v3731_v38 = vpop.f32.mrf.mxu1  ;;  %4524 = vmatprep.subr.mxu0 %v4211_v43  ;;  %v4258_v43 = vld [vmem:[%s8977_s7 + $0x190] sm:$0xff] }
 0x449   : > { %v3803_v51 = vmax.f32 %v3771_v52, 0.0  ;;  %v3732_v21 = vadd.f32 %v3731_v38, %v3571_v34  ;;  %v3908_v57 = vmul.f32 %v8489_v44, %v3805_v60  ;;  %v3774_v35 = vadd.f32 %v3740_v42, %v9718_v9  ;;  %4525 = vmatpush1.msra.mxu0 %v4210_v20  ;;  %v4208_v34 = vld [vmem:[%s8977_s7] sm:$0xff]  ;;  %v4257_v20 = vld [vmem:[%s8977_s7 + $0x188] sm:$0xff] }
 0x44a   : > { %v3923_v31 = vpop.xlane.xlu0 %3922  ;;  %v8742_v17 = vand.u32 127, %v9719_v19  ;;  %4526 = vmatprep.subr.mxu0 %v4209_v15  ;;  %v4250_v15 = vld [vmem:[%s8977_s7 + $0x150] sm:$0xff]  ;;  %vm4587_vm2 = vcmp.lt.s32.totalorder %v9719_v19, 256 }
 0x44b   : > { %v3772_v29 = vadd.f32 %v3732_v21, %v9717_v14  ;;  %v3990_v30 = vadd.f32 %v8666_v1, %v3923_v31  ;;  %3970 = vadd.xlane.f32.xlu0 %v3908_v57  ;;  %v3906_v7 = vmul.f32 %v8489_v44, %v3803_v51  ;;  %v3806_v12 = vmax.f32 %v3774_v35, 0.0  ;;  %4527 = vmatpush1.msra.mxu0 %v4208_v34  ;;  %v4249_v34 = vld [vmem:[%s8977_s7 + $0x148] sm:$0xff] }
 0x44c   : > { %v3919_v54 = vpop.xlane.xlu1 %3918  ;;  %v4310_v41 = vadd.s32 4294967288, %v8742_v17  ;;  %v4317_v38 = vadd.s32 4294967280, %v8742_v17  ;;  %v8763_v51 = vsub.s32 %v8742_v17, %v9710_v10  ;;  %4528 = vmatprep.subr.mxu0 %v4271_v3  ;;  %v4331_v57 = vadd.s32 4294967264, %v8742_v17  ;;  %v4248_v3 = vld [vmem:[%s8977_s7 + $0x140] sm:$0xff] }
 0x44d   : > { %v3804_v61 = vmax.f32 %v3772_v29, 0.0  ;;  %v4748_v58 = vmul.f32 -1.442695, %v3990_v30  ;;  %v3988_v63 = vadd.f32 %v8666_v1, %v3919_v54  ;;  %v5531_v36 = vpop.eup %5530  ;;  %v3909_v23 = vmul.f32 %v8489_v44, %v3806_v12  ;;  %4529 = vmatpush2.msra.mxu0 %v4270_v18  ;;  %v4265_v12 = vld [vmem:[%s8977_s7 + $0x1c8] sm:$0xff]  ;;  %v4247_v18 = vld [vmem:[%s8977_s7 + $0x138] sm:$0xff] }
 0x44e   : > { %v3925_v40 = vpop.xlane.xlu0 %3924  ;;  %v5533_v28 = vpop.eup %5532  ;;  %v4113_v62 = vadd.f32 1.0, %v5531_v36  ;;  %v8755_v5 = vsub.s32 %v4310_v41, %v9710_v10  ;;  %v4324_v31 = vadd.s32 4294967272, %v8742_v17  ;;  %v8769_v29 = vsub.s32 %v4317_v38, %v9710_v10  ;;  %v4254_v41 = vld [vmem:[%s8977_s7 + $0x170] sm:$0xff]  ;;  %v4245_v38 = vld [vmem:[%s8977_s7 + $0x128] sm:$0xff] }
 0x44f   : > { %5538 = vpow2.f32 %v4748_v58  ;;  %v4746_v0 = vmul.f32 -1.442695, %v3988_v63  ;;  %v3991_v4 = vadd.f32 %v8666_v1, %v3925_v40  ;;  %3966 = vadd.xlane.f32.xlu0 %v3906_v7  ;;  %v3907_v13 = vmul.f32 %v8489_v44, %v3804_v61  ;;  %v5535_v53 = vpop.eup %5534  ;;  %v4269_v58 = vld [vmem:[%s8977_s7 + $0x1e8] sm:$0xff]  ;;  %v4268_v63 = vld [vmem:[%s8977_s7 + $0x1e0] sm:$0xff]  ;;  %v4267_v7 = vld [vmem:[%s8977_s7 + $0x1d8] sm:$0xff] }
 0x450   : > { %v3921_v49 = vpop.xlane.xlu1 %3920  ;;  %v4112_v55 = vadd.f32 1.0, %v5533_v28  ;;  %v5537_v50 = vpop.eup %5536  ;;  %v4114_v2 = vadd.f32 1.0, %v5535_v53  ;;  %v4338_v35 = vadd.s32 4294967256, %v8742_v17  ;;  %v4345_v54 = vadd.s32 4294967248, %v8742_v17  ;;  %4530 = vmatprep.subr.mxu0 %v4269_v58  ;;  %v4263_v28 = vld [vmem:[%s8977_s7 + $0x1b8] sm:$0xff] }
 0x451   : > { %5540 = vpow2.f32 %v4746_v0  ;;  %v4749_v24 = vmul.f32 -1.442695, %v3991_v4  ;;  %v3989_v26 = vadd.f32 %v8666_v1, %v3921_v49  ;;  %v4115_v48 = vadd.f32 1.0, %v5537_v50  ;;  %v4266_v4 = vld [vmem:[%s8977_s7 + $0x1d0] sm:$0xff]  ;;  %4531 = vmatpush2.msra.mxu0 %v4268_v63  ;;  %v4260_v50 = vld [vmem:[%s8977_s7 + $0x1a0] sm:$0xff] }
 0x452   : > { %v8775_v61 = vsub.s32 %v4331_v57, %v9710_v10  ;;  %v8787_v22 = vsub.s32 %v4324_v31, %v9710_v10  ;;  %v4352_v0 = vadd.s32 4294967240, %v8742_v17  ;;  %v8799_v49 = vsub.s32 %v4338_v35, %v9710_v10  ;;  %4532 = vmatprep.subr.mxu0 %v4267_v7  ;;  %v4243_v57 = vld [vmem:[%s8977_s7 + $0x118] sm:$0xff]  ;;  %v4242_v31 = vld [vmem:[%s8977_s7 + $0x110] sm:$0xff] }
 0x453   : > { %5542 = vpow2.f32 %v4749_v24  ;;  %v4747_v6 = vmul.f32 -1.442695, %v3989_v26  ;;  %3968 = vadd.xlane.f32.xlu0 %v3907_v13  ;;  %v4264_v24 = vld [vmem:[%s8977_s7 + $0x1c0] sm:$0xff]  ;;  %v8806_v36 = vsub.s32 %v4345_v54, %v9710_v10  ;;  %4533 = vmatpush2.msra.mxu0 %v4266_v4 }
 0x454   : > { %4534 = vmatprep.subr.mxu0 %v4265_v12 }
 0x455   : > { %5544 = vpow2.f32 %v4747_v6  ;;  %4535 = vmatpush2.msra.mxu0 %v4264_v24 }
 0x456   : > { %5546 = vrcp.f32 %v4113_v62  ;;  %v8814_v62 = vsub.s32 %v4352_v0, %v9710_v10  ;;  %4536 = vmatprep.subr.mxu0 %v4263_v28 }
 0x457   : > { %3972 = vadd.xlane.f32.xlu0 %v3909_v23  ;;  %5548 = vrcp.f32 %v4112_v55  ;;  %v4262_v23 = vld [vmem:[%s8977_s7 + $0x1b0] sm:$0xff] }
 0x458   : > { %5550 = vrcp.f32 %v4114_v2  ;;  %4537 = vmatpush2.msra.mxu0 %v4262_v23 }
 0x459   : > { %5552 = vrcp.f32 %v4115_v48  ;;  %v4259_v48 = vld [vmem:[%s8977_s7 + $0x198] sm:$0xff]  ;;  %4538 = vmatprep.subr.mxu0 %v4261_v39 }
 0x45a   : > { %4539 = vmatpush2.msra.mxu0 %v4260_v50 }
 0x45b   : > { %4540 = vmatprep.subr.mxu0 %v4259_v48 }
 0x45c   : > { %v5539_v44 = vpop.eup %5538  ;;  %4541 = vmatpush2.msra.mxu0 %v4258_v43 }
 0x45d   : > { %v4118_v37 = vadd.f32 1.0, %v5539_v44  ;;  %4542 = vmatprep.subr.mxu0 %v4257_v20 }
 0x45e   : > { %v5541_v27 = vpop.eup %5540 }
 0x45f   : > { %v4116_v32 = vadd.f32 1.0, %v5541_v27 }
 0x460   : > { %v5543_v25 = vpop.eup %5542 }
 0x461   : > { %5554 = vrcp.f32 %v4116_v32  ;;  %v4119_v60 = vadd.f32 1.0, %v5543_v25  ;;  %v4255_v25 = vld [vmem:[%s8977_s7 + $0x178] sm:$0xff] }
 0x462   : > { %v5545_v11 = vpop.eup %5544  ;;  %5556 = vrcp.f32 %v4118_v37  ;;  %v4256_v37 = vld [vmem:[%s8977_s7 + $0x180] sm:$0xff] }
 0x463   : > { %v4117_v52 = vadd.f32 1.0, %v5545_v11  ;;  %5558 = vrcp.f32 %v4119_v60  ;;  %v5547_v42 = vpop.eup %5546  ;;  %4543 = vmatpush2.msra.mxu0 %v4256_v37  ;;  %v4253_v60 = vld [vmem:[%s8977_s7 + $0x168] sm:$0xff]  ;;  %v4252_v11 = vld [vmem:[%s8977_s7 + $0x160] sm:$0xff] }
 0x464   : > { %v5549_v21 = vpop.eup %5548  ;;  %v4314_v14 = vrot.slane %v5547_v42, %v8755_v5  ;;  %4544 = vmatprep.subr.mxu0 %v4255_v25  ;;  %v4246_v42 = vld [vmem:[%s8977_s7 + $0x130] sm:$0xff] }
 0x465   : > { %5560 = vrcp.f32 %v4117_v52  ;;  %v5551_v30 = vpop.eup %5550  ;;  %v4309_v9 = vrot.slane %v5549_v21, %v8763_v51  ;;  %4545 = vmatpush2.msra.mxu0 %v4254_v41  ;;  %v4251_v52 = vld [vmem:[%s8977_s7 + $0x158] sm:$0xff]  ;;  %v4244_v21 = vld [vmem:[%s8977_s7 + $0x120] sm:$0xff] }
 0x466   : > { %v5553_v40 = vpop.eup %5552  ;;  %v4321_v56 = vrot.slane %v5551_v30, %v8769_v29  ;;  %4546 = vmatprep.subr.mxu0 %v4253_v60  ;;  %v4240_v30 = vld [vmem:[%s8977_s7 + $0x100] sm:$0xff] }
 0x467   : > { %v4316_v47 = vsel %vm4315_vm3, %v4314_v14, %v4309_v9  ;;  %v4328_v16 = vrot.slane %v5553_v40, %v8787_v22  ;;  %4547 = vmatpush2.msra.mxu0 %v4252_v11  ;;  %v4241_v14 = vld [vmem:[%s8977_s7 + $0x108] sm:$0xff] }
 0x468   : > { %v4323_v13 = vsel %vm4322_vm4, %v4321_v56, %v4316_v47  ;;  %4548 = vmatprep.subr.mxu0 %v4251_v52 }
 0x469   : > { %v4330_v53 = vsel %vm4329_vm5, %v4328_v16, %v4323_v13  ;;  %4549 = vmatpush2.msra.mxu0 %v4250_v15 }
 0x46a   : > { %4550 = vmatprep.subr.mxu0 %v4249_v34 }
 0x46b   : > { %4551 = vmatpush2.msra.mxu0 %v4248_v3 }
 0x46c   : > { %4552 = vmatprep.subr.mxu0 %v4247_v18 }
 0x46d   : > { %4553 = vmatpush2.msra.mxu0 %v4246_v42 }
 0x46e   : > { %v5555_v46 = vpop.eup %5554  ;;  %4554 = vmatprep.subr.mxu0 %v4245_v38 }
 0x46f   : > { %v5557_v26 = vpop.eup %5556  ;;  %v4335_v6 = vrot.slane %v5555_v46, %v8775_v61  ;;  %4555 = vmatpush2.msra.mxu0 %v4244_v21 }
 0x470   : > { %v5559_v8 = vpop.eup %5558  ;;  %v4349_v2 = vrot.slane %v5557_v26, %v8806_v36  ;;  %4556 = vmatprep.subr.mxu0 %v4243_v57 }
 0x471   : > { %v4337_v44 = vsel %vm4336_vm6, %v4335_v6, %v4330_v53  ;;  %v4356_v59 = vrot.slane %v5559_v8, %v8814_v62  ;;  %4557 = vmatpush2.msra.mxu0 %v4242_v31 }
 0x472   : > { %v5561_v45 = vpop.eup %5560  ;;  %4558 = vmatprep.subr.mxu0 %v4241_v14 }
 0x473   : > { %v4342_v55 = vrot.slane %v5561_v45, %v8799_v49  ;;  %4559 = vmatpush2.msra.mxu0 %v4240_v30 }
 0x475   : > { %v4344_v33 = vsel %vm4343_vm7, %v4342_v55, %v4337_v44 }
 0x476   : > { %v4351_v27 = vsel %vm4350_vm8, %v4349_v2, %v4344_v33 }
 0x477   : > { %v8845_v32 = vsel %vm4357_vm9, %v4356_v59, %v4351_v27 }
 0x48f   : > { %v3947_v9 = vpop.xlane.xlu0 %3946 }
 0x490   : > { %v4002_v56 = vadd.f32 %v8666_v1, %v3947_v9 }
 0x491   : > { %v3943_v46 = vpop.xlane.xlu1 %3942 }
 0x492   : > { %v4760_v26 = vmul.f32 -1.442695, %v4002_v56  ;;  %v4000_v13 = vadd.f32 %v8666_v1, %v3943_v46 }
 0x493   : > { %v3929_v35 = vpop.xlane.xlu0 %3928 }
 0x494   : > { %5562 = vpow2.f32 %v4760_v26  ;;  %v4758_v23 = vmul.f32 -1.442695, %v4000_v13  ;;  %v3993_v53 = vadd.f32 %v8666_v1, %v3929_v35 }
 0x495   : > { %v3927_v6 = vpop.xlane.xlu1 %3926 }
 0x496   : > { %v3992_v2 = vadd.f32 %v8666_v1, %v3927_v6  ;;  %v4751_v20 = vmul.f32 -1.442695, %v3993_v53 }
 0x497   : > { %v3931_v54 = vpop.xlane.xlu0 %3930 }
 0x498   : > { %v3994_v48 = vadd.f32 %v8666_v1, %v3931_v54  ;;  %v4750_v25 = vmul.f32 -1.442695, %v3992_v2 }
 0x499   : > { %v3937_v55 = vpop.xlane.xlu1 %3936 }
 0x49a   : > { %v3997_v27 = vadd.f32 %v8666_v1, %v3937_v55  ;;  %v4752_v60 = vmul.f32 -1.442695, %v3994_v48 }
 0x49b   : > { %v3933_v58 = vpop.xlane.xlu0 %3932 }
 0x49c   : > { %v4755_v34 = vmul.f32 -1.442695, %v3997_v27  ;;  %v3995_v3 = vadd.f32 %v8666_v1, %v3933_v58 }
 0x49d   : > { %v3939_v11 = vpop.xlane.xlu1 %3938 }
 0x49e   : > { %v3998_v42 = vadd.f32 %v8666_v1, %v3939_v11  ;;  %v4753_v9 = vmul.f32 -1.442695, %v3995_v3 }
 0x49f   : > { %v3935_v63 = vpop.xlane.xlu0 %3934 }
 0x4a0   : > { %v3996_v14 = vadd.f32 %v8666_v1, %v3935_v63  ;;  %v4756_v54 = vmul.f32 -1.442695, %v3998_v42 }
 0x4a1   : > { %v5563_v31 = vpop.eup %5562 }
 0x4a3   : > { %v3949_v7 = vpop.xlane.xlu0 %3948 }
 0x4a4   : > { %v4003_v16 = vadd.f32 %v8666_v1, %v3949_v7  ;;  %v3941_v7 = vpop.xlane.xlu1 %3940 }
 0x4a5   : > { %v3999_v63 = vadd.f32 %v8666_v1, %v3941_v7 }
 0x4a6   : > { %v4761_v44 = vmul.f32 -1.442695, %v4003_v16 }
 0x4a7   : > { %v3945_v40 = vpop.xlane.xlu0 %3944 }
 0x4a8   : > { %v4001_v12 = vadd.f32 %v8666_v1, %v3945_v40  ;;  %v4130_v40 = vadd.f32 1.0, %v5563_v31 }
 0x4aa   : > { %v4759_v28 = vmul.f32 -1.442695, %v4001_v12 }
 0x4ab   : > { %v3955_v47 = vpop.xlane.xlu0 %3954 }
 0x4ac   : > { %5564 = vpow2.f32 %v4759_v28  ;;  %v4006_v33 = vadd.f32 %v8666_v1, %v3955_v47 }
 0x4ad   : > { %5566 = vpow2.f32 %v4758_v23 }
 0x4ae   : > { %5568 = vpow2.f32 %v4761_v44  ;;  %v4764_v15 = vmul.f32 -1.442695, %v4006_v33 }
 0x4af   : > { %v3951_v0 = vpop.xlane.xlu0 %3950 }
 0x4b0   : > { %v4004_v45 = vadd.f32 %v8666_v1, %v3951_v0  ;;  %v4754_v0 = vmul.f32 -1.442695, %v3996_v14 }
 0x4b2   : > { %v4762_v59 = vmul.f32 -1.442695, %v4004_v45 }
 0x4b3   : > { %v3957_v4 = vpop.xlane.xlu0 %3956 }
 0x4b4   : > { %v4007_v41 = vadd.f32 %v8666_v1, %v3957_v4  ;;  %5570 = vpow2.f32 %v4762_v59 }
 0x4b6   : > { %v4765_v38 = vmul.f32 -1.442695, %v4007_v41 }
 0x4b7   : > { %v3953_v24 = vpop.xlane.xlu0 %3952 }
 0x4b8   : > { %v4005_v39 = vadd.f32 %v8666_v1, %v3953_v24 }
 0x4b9   : > { %v5565_v35 = vpop.eup %5564 }
 0x4ba   : > { %v4763_v43 = vmul.f32 -1.442695, %v4005_v39  ;;  %v5567_v47 = vpop.eup %5566  ;;  %v4129_v46 = vadd.f32 1.0, %v5565_v35 }
 0x4bb   : > { %v5569_v12 = vpop.eup %5568  ;;  %v4128_v24 = vadd.f32 1.0, %v5567_v47 }
 0x4bc   : > { %5572 = vpow2.f32 %v4763_v43  ;;  %v4131_v23 = vadd.f32 1.0, %v5569_v12 }
 0x4bd   : > { %v3963_v8 = vpop.xlane.xlu0 %3962  ;;  %5574 = vpow2.f32 %v4751_v20 }
 0x4be   : > { %5576 = vpow2.f32 %v4750_v25  ;;  %v4010_v58 = vadd.f32 %v8666_v1, %v3963_v8  ;;  %v4757_v8 = vmul.f32 -1.442695, %v3999_v63 }
 0x4bf   : > { %5578 = vpow2.f32 %v4752_v60 }
 0x4c0   : > { %5580 = vpow2.f32 %v4764_v15  ;;  %v4768_v56 = vmul.f32 -1.442695, %v4010_v58 }
 0x4c1   : > { %v3959_v50 = vpop.xlane.xlu0 %3958  ;;  %5582 = vpow2.f32 %v4755_v34  ;;  %v5571_v26 = vpop.eup %5570 }
 0x4c2   : > { %v4008_v52 = vadd.f32 %v8666_v1, %v3959_v50  ;;  %5584 = vpow2.f32 %v4765_v38  ;;  %v4132_v53 = vadd.f32 1.0, %v5571_v26  ;;  %v4359_v26 = vadd.s32 4294967232, %v8742_v17 }
 0x4c4   : > { %v4766_v57 = vmul.f32 -1.442695, %v4008_v52 }
 0x4c5   : > { %v3965_v37 = vpop.xlane.xlu0 %3964 }
 0x4c6   : > { %5586 = vpow2.f32 %v4766_v57  ;;  %v4011_v4 = vadd.f32 %v8666_v1, %v3965_v37 }
 0x4c8   : > { %v4769_v13 = vmul.f32 -1.442695, %v4011_v4 }
 0x4c9   : > { %v3961_v18 = vpop.xlane.xlu0 %3960  ;;  %v5573_v28 = vpop.eup %5572 }
 0x4ca   : > { %v4009_v21 = vadd.f32 %v8666_v1, %v3961_v18  ;;  %v5575_v16 = vpop.eup %5574  ;;  %v4133_v50 = vadd.f32 1.0, %v5573_v28 }
 0x4cb   : > { %v5577_v39 = vpop.eup %5576 }
 0x4cc   : > { %v4767_v30 = vmul.f32 -1.442695, %v4009_v21  ;;  %v5579_v55 = vpop.eup %5578  ;;  %v4120_v20 = vadd.f32 1.0, %v5577_v39 }
 0x4cd   : > { %v5581_v44 = vpop.eup %5580  ;;  %v4122_v35 = vadd.f32 1.0, %v5579_v55 }
 0x4ce   : > { %5588 = vpow2.f32 %v4767_v30  ;;  %v5583_v59 = vpop.eup %5582  ;;  %v4134_v25 = vadd.f32 1.0, %v5581_v44  ;;  %v4121_v30 = vadd.f32 1.0, %v5575_v16 }
 0x4cf   : > { %5590 = vpow2.f32 %v4753_v9  ;;  %v5585_v43 = vpop.eup %5584  ;;  %v4125_v28 = vadd.f32 1.0, %v5583_v59 }
 0x4d0   : > { %5592 = vpow2.f32 %v4756_v54  ;;  %v4135_v15 = vadd.f32 1.0, %v5585_v43  ;;  %v4373_v43 = vadd.s32 4294967216, %v8742_v17 }
 0x4d1   : > { %5594 = vrcp.f32 %v4130_v40 }
 0x4d2   : > { %5596 = vpow2.f32 %v4754_v0 }
 0x4d3   : > { %5598 = vrcp.f32 %v4129_v46  ;;  %v5587_v37 = vpop.eup %5586 }
 0x4d4   : > { %v3971_v6 = vpop.xlane.xlu0 %3970  ;;  %5600 = vpow2.f32 %v4768_v56  ;;  %v4136_v3 = vadd.f32 1.0, %v5587_v37 }
 0x4d5   : > { %v4014_v45 = vadd.f32 %v8666_v1, %v3971_v6  ;;  %5602 = vrcp.f32 %v4128_v24 }
 0x4d6   : > { %5604 = vpow2.f32 %v4769_v13 }
 0x4d7   : > { %5606 = vpow2.f32 %v4757_v8  ;;  %v4772_v33 = vmul.f32 -1.442695, %v4014_v45 }
 0x4d8   : > { %v3967_v2 = vpop.xlane.xlu0 %3966  ;;  %5608 = vrcp.f32 %v4131_v23 }
 0x4d9   : > { %v4012_v48 = vadd.f32 %v8666_v1, %v3967_v2  ;;  %5610 = vrcp.f32 %v4132_v53 }
 0x4da   : > { %5612 = vrcp.f32 %v4133_v50  ;;  %v4362_v50 = vsub.s32 %v4359_v26, %v9710_v10 }
 0x4db   : > { %v4770_v27 = vmul.f32 -1.442695, %v4012_v48  ;;  %v5589_v60 = vpop.eup %5588  ;;  %v4366_v48 = vadd.s32 4294967224, %v8742_v17 }
 0x4dc   : > { %v3969_v41 = vpop.xlane.xlu0 %3968  ;;  %v5591_v52 = vpop.eup %5590  ;;  %v4137_v38 = vadd.f32 1.0, %v5589_v60 }
 0x4dd   : > { %5614 = vpow2.f32 %v4770_v27  ;;  %v4013_v11 = vadd.f32 %v8666_v1, %v3969_v41  ;;  %v5593_v34 = vpop.eup %5592  ;;  %v4123_v58 = vadd.f32 1.0, %v5591_v52  ;;  %v4369_v52 = vsub.s32 %v4366_v48, %v9710_v10 }
 0x4de   : > { %5616 = vpow2.f32 %v4772_v33  ;;  %v5595_v42 = vpop.eup %5594  ;;  %v4126_v16 = vadd.f32 1.0, %v5593_v34 }
 0x4df   : > { %5618 = vrcp.f32 %v4120_v20  ;;  %v4771_v18 = vmul.f32 -1.442695, %v4013_v11  ;;  %v5597_v57 = vpop.eup %5596 }
 0x4e0   : > { %5620 = vrcp.f32 %v4134_v25  ;;  %v3973_v21 = vpop.xlane.xlu0 %3972  ;;  %v5599_v14 = vpop.eup %5598  ;;  %v4124_v47 = vadd.f32 1.0, %v5597_v57 }
 0x4e1   : > { %5622 = vpow2.f32 %v4771_v18  ;;  %v4015_v31 = vadd.f32 %v8666_v1, %v3973_v21  ;;  %v5601_v9 = vpop.eup %5600  ;;  %v4422_v0 = vrot.slane %v5599_v14, %v8755_v5  ;;  %v4427_v5 = vrot.slane %v5595_v42, %v8769_v29 }
 0x4e2   : > { %5624 = vrcp.f32 %v4135_v15  ;;  %v5603_v7 = vpop.eup %5602  ;;  %v4138_v63 = vadd.f32 1.0, %v5601_v9 }
 0x4e3   : > { %5626 = vrcp.f32 %v4136_v3  ;;  %v4773_v54 = vmul.f32 -1.442695, %v4015_v31  ;;  %v5605_v40 = vpop.eup %5604  ;;  %v4418_v1 = vrot.slane %v5603_v7, %v8763_v51  ;;  %v4376_v3 = vsub.s32 %v4373_v43, %v9710_v10 }
 0x4e4   : > { %5628 = vrcp.f32 %v4137_v38  ;;  %v5607_v4 = vpop.eup %5606  ;;  %v4139_v12 = vadd.f32 1.0, %v5605_v40  ;;  %v4394_v7 = vadd.s32 4294967192, %v8742_v17 }
 0x4e5   : > { %5630 = vpow2.f32 %v4773_v54  ;;  %v5609_v46 = vpop.eup %5608  ;;  %v4423_v13 = vsel %vm4315_vm3, %v4422_v0, %v4418_v1  ;;  %v4127_v51 = vadd.f32 1.0, %v5607_v4  ;;  %v4401_v1 = vadd.s32 4294967184, %v8742_v17 }
 0x4e6   : > { %5632 = vrcp.f32 %v4121_v30  ;;  %v5611_v56 = vpop.eup %5610  ;;  %v4428_v39 = vsel %vm4322_vm4, %v4427_v5, %v4423_v13  ;;  %v4432_v2 = vrot.slane %v5609_v46, %v8787_v22  ;;  %v4380_v22 = vadd.s32 4294967208, %v8742_v17 }
 0x4e7   : > { %5634 = vrcp.f32 %v4122_v35  ;;  %v5613_v24 = vpop.eup %5612  ;;  %v4437_v53 = vrot.slane %v5611_v56, %v8775_v61 }
 0x4e8   : > { %5636 = vrcp.f32 %v4123_v58  ;;  %v4442_v44 = vrot.slane %v5613_v24, %v8799_v49  ;;  %v4433_v61 = vsel %vm4329_vm5, %v4432_v2, %v4428_v39  ;;  %v4387_v49 = vadd.s32 4294967200, %v8742_v17 }
 0x4e9   : > { %5638 = vrcp.f32 %v4124_v47  ;;  %v4438_v37 = vsel %vm4336_vm6, %v4437_v53, %v4433_v61  ;;  %v4383_v21 = vsub.s32 %v4380_v22, %v9710_v10  ;;  %v4408_v24 = vadd.s32 4294967176, %v8742_v17 }
 0x4ea   : > { %v5615_v6 = vpop.eup %5614  ;;  %5640 = vrcp.f32 %v4138_v63  ;;  %v4443_v60 = vsel %vm4343_vm7, %v4442_v44, %v4438_v37  ;;  %v4390_v57 = vsub.s32 %v4387_v49, %v9710_v10 }
 0x4eb   : > { %v5617_v8 = vpop.eup %5616  ;;  %v4140_v23 = vadd.f32 1.0, %v5615_v6  ;;  %5642 = vrcp.f32 %v4139_v12  ;;  %v4397_v12 = vsub.s32 %v4394_v7, %v9710_v10  ;;  %v4411_v17 = vsub.s32 %v4408_v24, %v9710_v10 }
 0x4ec   : > { %v5619_v45 = vpop.eup %5618  ;;  %v4142_v59 = vadd.f32 1.0, %v5617_v8 }
 0x4ed   : > { %v5621_v55 = vpop.eup %5620  ;;  %5644 = vrcp.f32 %v4140_v23  ;;  %v4363_v41 = vrot.slane %v5619_v45, %v4362_v50 }
 0x4ee   : > { %v5623_v29 = vpop.eup %5622  ;;  %5646 = vrcp.f32 %v4125_v28  ;;  %v4447_v15 = vrot.slane %v5621_v55, %v8806_v36 }
 0x4ef   : > { %v5625_v33 = vpop.eup %5624  ;;  %5648 = vrcp.f32 %v4126_v16  ;;  %v4141_v20 = vadd.f32 1.0, %v5623_v29  ;;  %v4365_v36 = vsel %vm4364_vm10, %v4363_v41, %v8845_v32  ;;  %v5748_v41 = vmov 1966171168  }
 0x4f0   : > { %v5627_v27 = vpop.eup %5626  ;;  %5650 = vrcp.f32 %v4127_v51  ;;  %v4448_v31 = vsel %vm4350_vm8, %v4447_v15, %v4443_v60  ;;  %v4452_v30 = vrot.slane %v5625_v33, %v8814_v62  ;;  %v4404_v51 = vsub.s32 %v4401_v1, %v9710_v10 }
 0x4f1   : > { %v5629_v25 = vpop.eup %5628  ;;  %5652 = vrcp.f32 %v4141_v20  ;;  %v4457_v38 = vrot.slane %v5627_v27, %v4362_v50  ;;  %v4571_v60 = vunpack.c.l.s4 %v5748_v41 }
 0x4f2   : > { %v5631_v11 = vpop.eup %5630  ;;  %5654 = vrcp.f32 %v4142_v59  ;;  %v4462_v9 = vrot.slane %v5629_v25, %v4369_v52  ;;  %v4453_v47 = vsel %vm4357_vm9, %v4452_v30, %v4448_v31 }
 0x4f3   : > { %v5633_v34 = vpop.eup %5632  ;;  %v4143_v18 = vadd.f32 1.0, %v5631_v11  ;;  %v4458_v63 = vsel %vm4364_vm10, %v4457_v38, %v4453_v47  ;;  %v4572_v11 = vunpack.c.0.s8 %v4571_v60 }
 0x4f4   : > { %v5635_v42 = vpop.eup %5634  ;;  %v4370_v54 = vrot.slane %v5633_v34, %v4369_v52  ;;  %v4463_v32 = vsel %vm4371_vm11, %v4462_v9, %v4458_v63 }
 0x4f5   : > { %v5637_v14 = vpop.eup %5636  ;;  %5656 = vrcp.f32 %v4143_v18  ;;  %v4377_v40 = vrot.slane %v5635_v42, %v4376_v3  ;;  %v4575_v15 = vsub.s32 %v4572_v11, %v9710_v10 }
 0x4f6   : > { %v5639_v35 = vpop.eup %5638  ;;  %v4372_v0 = vsel %vm4371_vm11, %v4370_v54, %v4365_v36  ;;  %v4384_v4 = vrot.slane %v5637_v14, %v4383_v21 }
 0x4f7   : > { %v5641_v58 = vpop.eup %5640  ;;  %v4391_v46 = vrot.slane %v5639_v35, %v4390_v57  ;;  %v4379_v6 = vsel %vm4378_vm12, %v4377_v40, %v4372_v0 }
 0x4f8   : > { %v5643_v62 = vpop.eup %5642  ;;  %v4467_v26 = vrot.slane %v5641_v58, %v4376_v3  ;;  %v4386_v28 = vsel %vm4385_vm13, %v4384_v4, %v4379_v6 }
 0x4f9   : > { %v4393_v45 = vsel %vm4392_vm14, %v4391_v46, %v4386_v28  ;;  %v4472_v39 = vrot.slane %v5643_v62, %v4383_v21 }
 0x4fa   : > { %v5645_v56 = vpop.eup %5644  ;;  %v4468_v8 = vsel %vm4378_vm12, %v4467_v26, %v4463_v32 }
 0x4fb   : > { %v5647_v13 = vpop.eup %5646  ;;  %v4477_v16 = vrot.slane %v5645_v56, %v4390_v57  ;;  %v4473_v2 = vsel %vm4385_vm13, %v4472_v39, %v4468_v8 }
 0x4fc   : > { %v5649_v5 = vpop.eup %5648  ;;  %v4398_v55 = vrot.slane %v5647_v13, %v4397_v12 }
 0x4fd   : > { %v5651_v23 = vpop.eup %5650  ;;  %v4478_v48 = vsel %vm4392_vm14, %v4477_v16, %v4473_v2  ;;  %v4405_v59 = vrot.slane %v5649_v5, %v4404_v51 }
 0x4fe   : > { %v5653_v53 = vpop.eup %5652  ;;  %v4400_v29 = vsel %vm4399_vm15, %v4398_v55, %v4393_v45  ;;  %v4412_v61 = vrot.slane %v5651_v23, %v4411_v17 }
 0x4ff   : > { %v5655_v50 = vpop.eup %5654  ;;  %v4482_v44 = vrot.slane %v5653_v53, %v4397_v12  ;;  %v4407_v27 = vsel %vm4406_vm0, %v4405_v59, %v4400_v29 }
 0x500   : > { %v4487_v20 = vrot.slane %v5655_v50, %v4404_v51  ;;  %v4414_v25 = vsel %vm4413_vm1, %v4412_v61, %v4407_v27 }
 0x501   : > { %v4483_v33 = vsel %vm4399_vm15, %v4482_v44, %v4478_v48 }
 0x502   : > { %v5657_v43 = vpop.eup %5656  ;;  %v4488_v22 = vsel %vm4406_vm0, %v4487_v20, %v4483_v33 }
 0x503   : > { %v4492_v37 = vrot.slane %v5657_v43, %v4411_v17 }
 0x505   : > { %v4493_v49 = vsel %vm4413_vm1, %v4492_v37, %v4488_v22 }
 0x506   : > { %4560 = vmatprep.mubr.f32.mxu0 %v4493_v49 }
 0x507   : > { %4561 = vmatmul.mubr.f32.vlgmr.msra.gmra.mxu0 %v4414_v25 }
 0x5c7   : > { %v4562_v52 = vpop.f32.mrf.mxu0 }
 0x5c9   : > { %v4564_v34 = vpop.f32.mrf.mxu0 }
 0x5ca   : > { %v4569_v3 = vcombine.low %v4562_v52, %v4564_v34 }
 0x5cc   : > { %v4576_v18 = vrot.slane %v4569_v3, %v4575_v15 }
 0x5ce   : > { %v4583_v42 = vrot.slane %v4576_v18, %v4575_v15 }
 0x5d0   : > { %4589 = vst.msk [vmem:[%s305_s20] sm:$0x3] %vm4587_vm2, %v4583_v42 }
 0x5d1 PF: > { %s20_s29 = sadd.s32 1, %s5737_s29  }
 0x5d2   : > { %p17_p4 = scmp.ge.s32.totalorder %s20_s29, 4  }
 0x5d4   :  { %19 = sbr.rel (!%p17_p4) target bundleno = 3 (0x3), region = 82 }

</bundles_post_ra>
